<compile_context>
chip_gen: v7x
topology: tpu7x:2x2x1
jax: 0.10.0
libtpu: 0.0.40
codegen_flags: <defaults>
</compile_context>

<pallas_src>
import math
import functools

import jax
import jax.numpy as jnp
from jax.experimental import pallas as pl
from jax.experimental.pallas import tpu as pltpu


def _conv_bn_relu(h, lpos, w_ref, s_ref, k, length, mxu_dot):
    """Fused Conv1d('same') + folded-BN + ReLU on the lane-batched activation.

    h     : (C_prev, b_blk*L) f32, batch folded into the lane axis
    lpos  : (1, b_blk*L) int32, within-sample position l of every column
    w_ref : (K, C_out, C_prev) BN-scale-folded conv weight taps
    s_ref : (C_out, 1) folded conv-bias + BN shift
    """
    c_out = w_ref.shape[1]
    ncols = h.shape[-1]
    pad = k // 2
    acc = jnp.zeros((c_out, ncols), dtype=jnp.float32)
    for t in range(k):
        d = t - pad                                   # source offset of this tap
        if d == 0:
            tap = h
        else:
            # rolled[:, j] == h[:, (j + d) mod ncols]   (pltpu.roll == jnp.roll semantics)
            rolled = pltpu.roll(h, shift=(-d) % ncols, axis=1)
            # zero columns whose source falls outside the current sample ('same' padding)
            valid = (lpos + d >= 0) & (lpos + d < length)
            tap = jnp.where(valid, rolled, 0.0)
        acc = acc + mxu_dot(w_ref[t], tap)            # one lane-dense MXU dot per tap
    return jnp.maximum(acc + s_ref[...], 0.0)


def _simple_cnn_kernel(x_ref, lpos_ref, pool_ref,
                       w1_ref, s1_ref, w2_ref, s2_ref, w3_ref, s3_ref,
                       wf1_ref, bf1_ref, wf2_ref, bf2_ref,
                       o_ref, *, kernel_sizes, length, use_bf16_mxu):
    """Fused SimpleCNN forward for one batch tile (b_blk samples, batch on the lane axis)."""
    if use_bf16_mxu:
        def mxu_dot(a, b):
            return jnp.dot(a.astype(jnp.bfloat16), b.astype(jnp.bfloat16),
                           preferred_element_type=jnp.float32)
    else:
        def mxu_dot(a, b):
            return jnp.dot(a, b, preferred_element_type=jnp.float32)

    lpos = lpos_ref[...]                              # (1, b_blk*L) int32
    h = x_ref[...].astype(jnp.float32)                # (C_in, b_blk*L)

    for w_ref, s_ref, k in ((w1_ref, s1_ref, kernel_sizes[0]),
                            (w2_ref, s2_ref, kernel_sizes[1]),
                            (w3_ref, s3_ref, kernel_sizes[2])):
        h = _conv_bn_relu(h, lpos, w_ref, s_ref, k, length, mxu_dot)

    # AdaptiveAvgPool1d(1): one MXU matmul against the block-diagonal 1/L selector.
    pooled = mxu_dot(h, pool_ref[...])                                   # (C_mid, b_blk)
    # Classifier head (Dropout == identity in eval).
    z = jnp.maximum(mxu_dot(wf1_ref[...], pooled) + bf1_ref[...], 0.0)   # (hidden, b_blk)
    logits = mxu_dot(wf2_ref[...], z) + bf2_ref[...]                     # (n_cls, b_blk)
    o_ref[0] = logits.astype(o_ref.dtype)


def simple_cnn_forward(x, conv_ws, conv_bs, bn_gammas, bn_betas, bn_means, bn_vars,
                       fc1_w, fc1_b, fc2_w, fc2_b,
                       *, kernel_sizes=(7, 5, 3), eps=1e-5, b_blk=8,
                       use_bf16_mxu=False):
    """x: (N, C_in, L) -> logits (N, n_classes). Inference-mode SimpleCNN."""
    n, c_in, length = x.shape
    hidden = fc1_w.shape[0]
    n_classes = fc2_w.shape[0]

    n_pad = ((n + b_blk - 1) // b_blk) * b_blk        # zero-pad ragged batches
    grid = n_pad // b_blk
    ncols = b_blk * length
    if grid > 1 and ncols % 128 != 0:
        raise ValueError("b_blk * length must be a multiple of 128 when grid > 1")

    xp = x.astype(jnp.float32)
    if n_pad != n:
        xp = jnp.pad(xp, ((0, n_pad - n), (0, 0), (0, 0)))
    # (N, C, L) -> (C, N*L): batch folded into the lane axis (wrapper layout plumbing).
    x2d = jnp.transpose(xp, (1, 0, 2)).reshape(c_in, n_pad * length)

    # Fold BN (inference) scale into conv weights; conv bias + BN shift -> one shift.
    w_taps, shifts = [], []
    for w, b, g, beta, mean, var in zip(conv_ws, conv_bs, bn_gammas, bn_betas,
                                        bn_means, bn_vars):
        s = g / jnp.sqrt(var + eps)                                   # (C_out,)
        wf = (w * s[:, None, None]).astype(jnp.float32)               # (C_out, C_prev, K)
        w_taps.append(jnp.transpose(wf, (2, 0, 1)))                   # (K, C_out, C_prev)
        shifts.append((s * (b - mean) + beta).reshape(-1, 1).astype(jnp.float32))

    # Within-sample lane position for every column of the (C, b_blk*L) tile.
    lane_pos = jnp.tile(jnp.arange(length, dtype=jnp.int32), b_blk)[None, :]   # (1, ncols)
    # Block-diagonal pooling selector: pool[j, b] = 1/L iff column j belongs to sample b.
    rows = jnp.arange(ncols, dtype=jnp.int32)[:, None]
    cols = jnp.arange(b_blk, dtype=jnp.int32)[None, :]
    pool = jnp.where((rows >= cols * length) & (rows < (cols + 1) * length),
                     jnp.float32(1.0 / length), jnp.float32(0.0))              # (ncols, b_blk)

    wf1 = fc1_w.astype(jnp.float32)
    bf1 = fc1_b.reshape(hidden, 1).astype(jnp.float32)
    wf2 = fc2_w.astype(jnp.float32)
    bf2 = fc2_b.reshape(n_classes, 1).astype(jnp.float32)

    const2 = lambda i: (0, 0)
    const3 = lambda i: (0, 0, 0)
    in_specs = [pl.BlockSpec((c_in, ncols), lambda i: (0, i)),
                pl.BlockSpec(lane_pos.shape, const2),
                pl.BlockSpec(pool.shape, const2)]
    args = [x2d, lane_pos, pool]
    for wt, sh in zip(w_taps, shifts):
        in_specs += [pl.BlockSpec(wt.shape, const3), pl.BlockSpec(sh.shape, const2)]
        args += [wt, sh]
    in_specs += [pl.BlockSpec(wf1.shape, const2), pl.BlockSpec(bf1.shape, const2),
                 pl.BlockSpec(wf2.shape, const2), pl.BlockSpec(bf2.shape, const2)]
    args += [wf1, bf1, wf2, bf2]

    kernel = functools.partial(_simple_cnn_kernel, kernel_sizes=tuple(kernel_sizes),
                               length=length, use_bf16_mxu=use_bf16_mxu)

    out = pl.pallas_call(
        kernel,
        out_shape=jax.ShapeDtypeStruct((grid, n_classes, b_blk), jnp.float32),
        grid_spec=pltpu.PrefetchScalarGridSpec(
            num_scalar_prefetch=0,
            grid=(grid,),
            in_specs=in_specs,
            out_specs=pl.BlockSpec((1, n_classes, b_blk), lambda i: (i, 0, 0)),
        ),
        compiler_params=pltpu.CompilerParams(dimension_semantics=("parallel",)),
    )(*args)

    # (grid, n_classes, b_blk) -> (N, n_classes); drop the batch padding.
    out = jnp.transpose(out, (0, 2, 1)).reshape(n_pad, n_classes)[:n]
    return out.astype(x.dtype)


def _reference(x, conv_ws, conv_bs, bn_gammas, bn_betas, bn_means, bn_vars,
               fc1_w, fc1_b, fc2_w, fc2_b, *, kernel_sizes=(7, 5, 3), eps=1e-5):
    """Pure-JAX reference (lax conv) for correctness checking (eval-mode semantics)."""
    h = x
    for w, b, g, beta, mean, var, k in zip(conv_ws, conv_bs, bn_gammas, bn_betas,
                                           bn_means, bn_vars, kernel_sizes):
        pad = k // 2
        h = jax.lax.conv_general_dilated(
            h, w, window_strides=(1,), padding=[(pad, pad)],
            dimension_numbers=("NCH", "OIH", "NCH"),
            precision=jax.lax.Precision.HIGHEST)
        h = h + b[None, :, None]
        s = g / jnp.sqrt(var + eps)
        h = h * s[None, :, None] + (beta - mean * s)[None, :, None]
        h = jnp.maximum(h, 0.0)
    pooled = jnp.mean(h, axis=-1)                             # AdaptiveAvgPool1d(1) + Flatten
    z = jnp.dot(pooled, fc1_w.T, precision=jax.lax.Precision.HIGHEST) + fc1_b
    z = jnp.maximum(z, 0.0)
    return jnp.dot(z, fc2_w.T, precision=jax.lax.Precision.HIGHEST) + fc2_b


if __name__ == "__main__":
    N, C_IN, L = 16, 16, 128
    C_MID, HIDDEN, N_CLASSES = 8, 16, 10
    KS = (7, 5, 3)
    B_BLK = 8                      # grid = 2 -> both v7x TensorCores get a tile

    key = jax.random.PRNGKey(0)
    keys = iter(jax.random.split(key, 24))

    x = jax.random.normal(next(keys), (N, C_IN, L), dtype=jnp.float32)

    conv_ws, conv_bs = [], []
    bn_g, bn_b, bn_m, bn_v = [], [], [], []
    c_prev = C_IN
    for k in KS:
        bound = 1.0 / math.sqrt(c_prev * k)
        conv_ws.append(jax.random.uniform(next(keys), (C_MID, c_prev, k),
                                          minval=-bound, maxval=bound, dtype=jnp.float32))
        conv_bs.append(jax.random.uniform(next(keys), (C_MID,),
                                          minval=-bound, maxval=bound, dtype=jnp.float32))
        bn_g.append(1.0 + 0.1 * jax.random.normal(next(keys), (C_MID,), dtype=jnp.float32))
        bn_b.append(0.1 * jax.random.normal(next(keys), (C_MID,), dtype=jnp.float32))
        bn_m.append(0.1 * jax.random.normal(next(keys), (C_MID,), dtype=jnp.float32))
        bn_v.append(jax.random.uniform(next(keys), (C_MID,), minval=0.5, maxval=1.5,
                                       dtype=jnp.float32))
        c_prev = C_MID

    b1 = 1.0 / math.sqrt(C_MID)
    fc1_w = jax.random.uniform(next(keys), (HIDDEN, C_MID), minval=-b1, maxval=b1,
                               dtype=jnp.float32)
    fc1_b = jax.random.uniform(next(keys), (HIDDEN,), minval=-b1, maxval=b1,
                               dtype=jnp.float32)
    b2 = 1.0 / math.sqrt(HIDDEN)
    fc2_w = jax.random.uniform(next(keys), (N_CLASSES, HIDDEN), minval=-b2, maxval=b2,
                               dtype=jnp.float32)
    fc2_b = jax.random.uniform(next(keys), (N_CLASSES,), minval=-b2, maxval=b2,
                               dtype=jnp.float32)

    ref = _reference(x, conv_ws, conv_bs, bn_g, bn_b, bn_m, bn_v,
                     fc1_w, fc1_b, fc2_w, fc2_b, kernel_sizes=KS)

    # f32 MXU path (v5e-safe default)
    out = simple_cnn_forward(x, conv_ws, conv_bs, bn_g, bn_b, bn_m, bn_v,
                             fc1_w, fc1_b, fc2_w, fc2_b,
                             kernel_sizes=KS, b_blk=B_BLK, use_bf16_mxu=False)
    out = jax.block_until_ready(out)
    assert out.shape == (N, N_CLASSES)
    assert jnp.allclose(out, ref, atol=1e-3, rtol=1e-3), "f32 kernel mismatch vs reference"

    # bf16-at-the-MXU path (v6e / v7x recommendation); looser tolerance by design.
    out_bf16 = simple_cnn_forward(x, conv_ws, conv_bs, bn_g, bn_b, bn_m, bn_v,
                                  fc1_w, fc1_b, fc2_w, fc2_b,
                                  kernel_sizes=KS, b_blk=B_BLK, use_bf16_mxu=True)
    out_bf16 = jax.block_until_ready(out_bf16)
    assert jnp.allclose(out_bf16, ref, atol=5e-2, rtol=5e-2), "bf16 kernel mismatch vs reference"

    print("KERNEL_OK")
</pallas_src>

<mosaic_0001>
module attributes {stable_mosaic.version = 11 : i64} {
  func.func @_simple_cnn_kernel(%arg0: i32, %arg1: memref<16x1024xf32, #tpu.memory_space<vmem>>, %arg2: memref<1x1024xi32, #tpu.memory_space<vmem>>, %arg3: memref<1024x8xf32, #tpu.memory_space<vmem>>, %arg4: memref<7x8x16xf32, #tpu.memory_space<vmem>>, %arg5: memref<8x1xf32, #tpu.memory_space<vmem>>, %arg6: memref<5x8x8xf32, #tpu.memory_space<vmem>>, %arg7: memref<8x1xf32, #tpu.memory_space<vmem>>, %arg8: memref<3x8x8xf32, #tpu.memory_space<vmem>>, %arg9: memref<8x1xf32, #tpu.memory_space<vmem>>, %arg10: memref<16x8xf32, #tpu.memory_space<vmem>>, %arg11: memref<16x1xf32, #tpu.memory_space<vmem>>, %arg12: memref<10x16xf32, #tpu.memory_space<vmem>>, %arg13: memref<10x1xf32, #tpu.memory_space<vmem>>, %arg14: memref<1x10x8xf32, #tpu.memory_space<vmem>>) attributes {dimension_semantics = [#tpu.dimension_semantics<parallel>], iteration_bounds = array<i64: 2>, scalar_prefetch = 0 : i64, scratch_operands = 0 : i64, tpu.core_type = #tpu.core_type<tc>, window_params = [{transform_indices = @transform_0, window_bounds = array<i64: 16, 1024>}, {pipeline_mode = #tpu.pipeline_mode<synchronous>, transform_indices = @transform_1, window_bounds = array<i64: 1, 1024>}, {pipeline_mode = #tpu.pipeline_mode<synchronous>, transform_indices = @transform_2, window_bounds = array<i64: 1024, 8>}, {pipeline_mode = #tpu.pipeline_mode<synchronous>, transform_indices = @transform_3, window_bounds = array<i64: 7, 8, 16>}, {pipeline_mode = #tpu.pipeline_mode<synchronous>, transform_indices = @transform_4, window_bounds = array<i64: 8, 1>}, {pipeline_mode = #tpu.pipeline_mode<synchronous>, transform_indices = @transform_5, window_bounds = array<i64: 5, 8, 8>}, {pipeline_mode = #tpu.pipeline_mode<synchronous>, transform_indices = @transform_6, window_bounds = array<i64: 8, 1>}, {pipeline_mode = #tpu.pipeline_mode<synchronous>, transform_indices = @transform_7, window_bounds = array<i64: 3, 8, 8>}, {pipeline_mode = #tpu.pipeline_mode<synchronous>, transform_indices = @transform_8, window_bounds = array<i64: 8, 1>}, {pipeline_mode = #tpu.pipeline_mode<synchronous>, transform_indices = @transform_9, window_bounds = array<i64: 16, 8>}, {pipeline_mode = #tpu.pipeline_mode<synchronous>, transform_indices = @transform_10, window_bounds = array<i64: 16, 1>}, {pipeline_mode = #tpu.pipeline_mode<synchronous>, transform_indices = @transform_11, window_bounds = array<i64: 10, 16>}, {pipeline_mode = #tpu.pipeline_mode<synchronous>, transform_indices = @transform_12, window_bounds = array<i64: 10, 1>}, {transform_indices = @transform_13, window_bounds = array<i64: 1, 10, 8>}]} {
    %c0 = arith.constant 0 : index
    %c0_0 = arith.constant 0 : index
    %0 = vector.load %arg2[%c0, %c0_0] : memref<1x1024xi32, #tpu.memory_space<vmem>>, vector<1x1024xi32>
    %c0_1 = arith.constant 0 : index
    %c0_2 = arith.constant 0 : index
    %1 = vector.load %arg1[%c0_1, %c0_2] : memref<16x1024xf32, #tpu.memory_space<vmem>>, vector<16x1024xf32>
    %cst = arith.constant 0.000000e+00 : f32
    %2 = vector.broadcast %cst : f32 to vector<8x1024xf32>
    %c3_i32 = arith.constant 3 : i32
    %3 = tpu.dynamic_rotate %1 by %c3_i32 dim 1 : vector<16x1024xf32>, i32 -> vector<16x1024xf32>
    %c-3_i32 = arith.constant -3 : i32
    %4 = vector.broadcast %c-3_i32 : i32 to vector<1x1024xi32>
    %5 = arith.addi %0, %4 : vector<1x1024xi32>
    %c0_i32 = arith.constant 0 : i32
    %6 = vector.broadcast %c0_i32 : i32 to vector<1x1024xi32>
    %7 = arith.cmpi sge, %5, %6 : vector<1x1024xi32>
    %c-3_i32_3 = arith.constant -3 : i32
    %8 = vector.broadcast %c-3_i32_3 : i32 to vector<1x1024xi32>
    %9 = arith.addi %0, %8 : vector<1x1024xi32>
    %c128_i32 = arith.constant 128 : i32
    %10 = vector.broadcast %c128_i32 : i32 to vector<1x1024xi32>
    %11 = arith.cmpi slt, %9, %10 : vector<1x1024xi32>
    %12 = arith.andi %7, %11 : vector<1x1024xi1>
    %cst_4 = arith.constant 0.000000e+00 : f32
    %13 = vector.shape_cast %12 : vector<1x1024xi1> to vector<1x1024xi1>
    %14 = vector.broadcast %13 : vector<1x1024xi1> to vector<16x1024xi1>
    %15 = vector.broadcast %cst_4 : f32 to vector<16x1024xf32>
    %16 = arith.select %14, %3, %15 : vector<16x1024xi1>, vector<16x1024xf32>
    %c0_5 = arith.constant 0 : index
    %c0_6 = arith.constant 0 : index
    %c0_7 = arith.constant 0 : index
    %17 = vector.load %arg4[%c0_5, %c0_6, %c0_7] : memref<7x8x16xf32, #tpu.memory_space<vmem>>, vector<1x8x16xf32>
    %18 = vector.shape_cast %17 : vector<1x8x16xf32> to vector<8x16xf32>
    %cst_8 = arith.constant dense<0.000000e+00> : vector<8x1024xf32>
    %19 = tpu.matmul %18, %16, %cst_8 {dimension_numbers = #tpu.dot_dimension_numbers<[1], [0], [0], [1], [0, 0, 1, 1], [], []>} : vector<8x16xf32>, vector<16x1024xf32>, vector<8x1024xf32> -> vector<8x1024xf32>
    %20 = arith.addf %2, %19 : vector<8x1024xf32>
    %c2_i32 = arith.constant 2 : i32
    %21 = tpu.dynamic_rotate %1 by %c2_i32 dim 1 : vector<16x1024xf32>, i32 -> vector<16x1024xf32>
    %c-2_i32 = arith.constant -2 : i32
    %22 = vector.broadcast %c-2_i32 : i32 to vector<1x1024xi32>
    %23 = arith.addi %0, %22 : vector<1x1024xi32>
    %c0_i32_9 = arith.constant 0 : i32
    %24 = vector.broadcast %c0_i32_9 : i32 to vector<1x1024xi32>
    %25 = arith.cmpi sge, %23, %24 : vector<1x1024xi32>
    %c-2_i32_10 = arith.constant -2 : i32
    %26 = vector.broadcast %c-2_i32_10 : i32 to vector<1x1024xi32>
    %27 = arith.addi %0, %26 : vector<1x1024xi32>
    %c128_i32_11 = arith.constant 128 : i32
    %28 = vector.broadcast %c128_i32_11 : i32 to vector<1x1024xi32>
    %29 = arith.cmpi slt, %27, %28 : vector<1x1024xi32>
    %30 = arith.andi %25, %29 : vector<1x1024xi1>
    %cst_12 = arith.constant 0.000000e+00 : f32
    %31 = vector.shape_cast %30 : vector<1x1024xi1> to vector<1x1024xi1>
    %32 = vector.broadcast %31 : vector<1x1024xi1> to vector<16x1024xi1>
    %33 = vector.broadcast %cst_12 : f32 to vector<16x1024xf32>
    %34 = arith.select %32, %21, %33 : vector<16x1024xi1>, vector<16x1024xf32>
    %c1 = arith.constant 1 : index
    %c0_13 = arith.constant 0 : index
    %c0_14 = arith.constant 0 : index
    %35 = vector.load %arg4[%c1, %c0_13, %c0_14] : memref<7x8x16xf32, #tpu.memory_space<vmem>>, vector<1x8x16xf32>
    %36 = vector.shape_cast %35 : vector<1x8x16xf32> to vector<8x16xf32>
    %cst_15 = arith.constant dense<0.000000e+00> : vector<8x1024xf32>
    %37 = tpu.matmul %36, %34, %cst_15 {dimension_numbers = #tpu.dot_dimension_numbers<[1], [0], [0], [1], [0, 0, 1, 1], [], []>} : vector<8x16xf32>, vector<16x1024xf32>, vector<8x1024xf32> -> vector<8x1024xf32>
    %38 = arith.addf %20, %37 : vector<8x1024xf32>
    %c1_i32 = arith.constant 1 : i32
    %39 = tpu.dynamic_rotate %1 by %c1_i32 dim 1 : vector<16x1024xf32>, i32 -> vector<16x1024xf32>
    %c-1_i32 = arith.constant -1 : i32
    %40 = vector.broadcast %c-1_i32 : i32 to vector<1x1024xi32>
    %41 = arith.addi %0, %40 : vector<1x1024xi32>
    %c0_i32_16 = arith.constant 0 : i32
    %42 = vector.broadcast %c0_i32_16 : i32 to vector<1x1024xi32>
    %43 = arith.cmpi sge, %41, %42 : vector<1x1024xi32>
    %c-1_i32_17 = arith.constant -1 : i32
    %44 = vector.broadcast %c-1_i32_17 : i32 to vector<1x1024xi32>
    %45 = arith.addi %0, %44 : vector<1x1024xi32>
    %c128_i32_18 = arith.constant 128 : i32
    %46 = vector.broadcast %c128_i32_18 : i32 to vector<1x1024xi32>
    %47 = arith.cmpi slt, %45, %46 : vector<1x1024xi32>
    %48 = arith.andi %43, %47 : vector<1x1024xi1>
    %cst_19 = arith.constant 0.000000e+00 : f32
    %49 = vector.shape_cast %48 : vector<1x1024xi1> to vector<1x1024xi1>
    %50 = vector.broadcast %49 : vector<1x1024xi1> to vector<16x1024xi1>
    %51 = vector.broadcast %cst_19 : f32 to vector<16x1024xf32>
    %52 = arith.select %50, %39, %51 : vector<16x1024xi1>, vector<16x1024xf32>
    %c2 = arith.constant 2 : index
    %c0_20 = arith.constant 0 : index
    %c0_21 = arith.constant 0 : index
    %53 = vector.load %arg4[%c2, %c0_20, %c0_21] : memref<7x8x16xf32, #tpu.memory_space<vmem>>, vector<1x8x16xf32>
    %54 = vector.shape_cast %53 : vector<1x8x16xf32> to vector<8x16xf32>
    %cst_22 = arith.constant dense<0.000000e+00> : vector<8x1024xf32>
    %55 = tpu.matmul %54, %52, %cst_22 {dimension_numbers = #tpu.dot_dimension_numbers<[1], [0], [0], [1], [0, 0, 1, 1], [], []>} : vector<8x16xf32>, vector<16x1024xf32>, vector<8x1024xf32> -> vector<8x1024xf32>
    %56 = arith.addf %38, %55 : vector<8x1024xf32>
    %c3 = arith.constant 3 : index
    %c0_23 = arith.constant 0 : index
    %c0_24 = arith.constant 0 : index
    %57 = vector.load %arg4[%c3, %c0_23, %c0_24] : memref<7x8x16xf32, #tpu.memory_space<vmem>>, vector<1x8x16xf32>
    %58 = vector.shape_cast %57 : vector<1x8x16xf32> to vector<8x16xf32>
    %cst_25 = arith.constant dense<0.000000e+00> : vector<8x1024xf32>
    %59 = tpu.matmul %58, %1, %cst_25 {dimension_numbers = #tpu.dot_dimension_numbers<[1], [0], [0], [1], [0, 0, 1, 1], [], []>} : vector<8x16xf32>, vector<16x1024xf32>, vector<8x1024xf32> -> vector<8x1024xf32>
    %60 = arith.addf %56, %59 : vector<8x1024xf32>
    %c1023_i32 = arith.constant 1023 : i32
    %61 = tpu.dynamic_rotate %1 by %c1023_i32 dim 1 : vector<16x1024xf32>, i32 -> vector<16x1024xf32>
    %c1_i32_26 = arith.constant 1 : i32
    %62 = vector.broadcast %c1_i32_26 : i32 to vector<1x1024xi32>
    %63 = arith.addi %0, %62 : vector<1x1024xi32>
    %c0_i32_27 = arith.constant 0 : i32
    %64 = vector.broadcast %c0_i32_27 : i32 to vector<1x1024xi32>
    %65 = arith.cmpi sge, %63, %64 : vector<1x1024xi32>
    %c1_i32_28 = arith.constant 1 : i32
    %66 = vector.broadcast %c1_i32_28 : i32 to vector<1x1024xi32>
    %67 = arith.addi %0, %66 : vector<1x1024xi32>
    %c128_i32_29 = arith.constant 128 : i32
    %68 = vector.broadcast %c128_i32_29 : i32 to vector<1x1024xi32>
    %69 = arith.cmpi slt, %67, %68 : vector<1x1024xi32>
    %70 = arith.andi %65, %69 : vector<1x1024xi1>
    %cst_30 = arith.constant 0.000000e+00 : f32
    %71 = vector.shape_cast %70 : vector<1x1024xi1> to vector<1x1024xi1>
    %72 = vector.broadcast %71 : vector<1x1024xi1> to vector<16x1024xi1>
    %73 = vector.broadcast %cst_30 : f32 to vector<16x1024xf32>
    %74 = arith.select %72, %61, %73 : vector<16x1024xi1>, vector<16x1024xf32>
    %c4 = arith.constant 4 : index
    %c0_31 = arith.constant 0 : index
    %c0_32 = arith.constant 0 : index
    %75 = vector.load %arg4[%c4, %c0_31, %c0_32] : memref<7x8x16xf32, #tpu.memory_space<vmem>>, vector<1x8x16xf32>
    %76 = vector.shape_cast %75 : vector<1x8x16xf32> to vector<8x16xf32>
    %cst_33 = arith.constant dense<0.000000e+00> : vector<8x1024xf32>
    %77 = tpu.matmul %76, %74, %cst_33 {dimension_numbers = #tpu.dot_dimension_numbers<[1], [0], [0], [1], [0, 0, 1, 1], [], []>} : vector<8x16xf32>, vector<16x1024xf32>, vector<8x1024xf32> -> vector<8x1024xf32>
    %78 = arith.addf %60, %77 : vector<8x1024xf32>
    %c1022_i32 = arith.constant 1022 : i32
    %79 = tpu.dynamic_rotate %1 by %c1022_i32 dim 1 : vector<16x1024xf32>, i32 -> vector<16x1024xf32>
    %c2_i32_34 = arith.constant 2 : i32
    %80 = vector.broadcast %c2_i32_34 : i32 to vector<1x1024xi32>
    %81 = arith.addi %0, %80 : vector<1x1024xi32>
    %c0_i32_35 = arith.constant 0 : i32
    %82 = vector.broadcast %c0_i32_35 : i32 to vector<1x1024xi32>
    %83 = arith.cmpi sge, %81, %82 : vector<1x1024xi32>
    %c2_i32_36 = arith.constant 2 : i32
    %84 = vector.broadcast %c2_i32_36 : i32 to vector<1x1024xi32>
    %85 = arith.addi %0, %84 : vector<1x1024xi32>
    %c128_i32_37 = arith.constant 128 : i32
    %86 = vector.broadcast %c128_i32_37 : i32 to vector<1x1024xi32>
    %87 = arith.cmpi slt, %85, %86 : vector<1x1024xi32>
    %88 = arith.andi %83, %87 : vector<1x1024xi1>
    %cst_38 = arith.constant 0.000000e+00 : f32
    %89 = vector.shape_cast %88 : vector<1x1024xi1> to vector<1x1024xi1>
    %90 = vector.broadcast %89 : vector<1x1024xi1> to vector<16x1024xi1>
    %91 = vector.broadcast %cst_38 : f32 to vector<16x1024xf32>
    %92 = arith.select %90, %79, %91 : vector<16x1024xi1>, vector<16x1024xf32>
    %c5 = arith.constant 5 : index
    %c0_39 = arith.constant 0 : index
    %c0_40 = arith.constant 0 : index
    %93 = vector.load %arg4[%c5, %c0_39, %c0_40] : memref<7x8x16xf32, #tpu.memory_space<vmem>>, vector<1x8x16xf32>
    %94 = vector.shape_cast %93 : vector<1x8x16xf32> to vector<8x16xf32>
    %cst_41 = arith.constant dense<0.000000e+00> : vector<8x1024xf32>
    %95 = tpu.matmul %94, %92, %cst_41 {dimension_numbers = #tpu.dot_dimension_numbers<[1], [0], [0], [1], [0, 0, 1, 1], [], []>} : vector<8x16xf32>, vector<16x1024xf32>, vector<8x1024xf32> -> vector<8x1024xf32>
    %96 = arith.addf %78, %95 : vector<8x1024xf32>
    %c1021_i32 = arith.constant 1021 : i32
    %97 = tpu.dynamic_rotate %1 by %c1021_i32 dim 1 : vector<16x1024xf32>, i32 -> vector<16x1024xf32>
    %c3_i32_42 = arith.constant 3 : i32
    %98 = vector.broadcast %c3_i32_42 : i32 to vector<1x1024xi32>
    %99 = arith.addi %0, %98 : vector<1x1024xi32>
    %c0_i32_43 = arith.constant 0 : i32
    %100 = vector.broadcast %c0_i32_43 : i32 to vector<1x1024xi32>
    %101 = arith.cmpi sge, %99, %100 : vector<1x1024xi32>
    %c3_i32_44 = arith.constant 3 : i32
    %102 = vector.broadcast %c3_i32_44 : i32 to vector<1x1024xi32>
    %103 = arith.addi %0, %102 : vector<1x1024xi32>
    %c128_i32_45 = arith.constant 128 : i32
    %104 = vector.broadcast %c128_i32_45 : i32 to vector<1x1024xi32>
    %105 = arith.cmpi slt, %103, %104 : vector<1x1024xi32>
    %106 = arith.andi %101, %105 : vector<1x1024xi1>
    %cst_46 = arith.constant 0.000000e+00 : f32
    %107 = vector.shape_cast %106 : vector<1x1024xi1> to vector<1x1024xi1>
    %108 = vector.broadcast %107 : vector<1x1024xi1> to vector<16x1024xi1>
    %109 = vector.broadcast %cst_46 : f32 to vector<16x1024xf32>
    %110 = arith.select %108, %97, %109 : vector<16x1024xi1>, vector<16x1024xf32>
    %c6 = arith.constant 6 : index
    %c0_47 = arith.constant 0 : index
    %c0_48 = arith.constant 0 : index
    %111 = vector.load %arg4[%c6, %c0_47, %c0_48] : memref<7x8x16xf32, #tpu.memory_space<vmem>>, vector<1x8x16xf32>
    %112 = vector.shape_cast %111 : vector<1x8x16xf32> to vector<8x16xf32>
    %cst_49 = arith.constant dense<0.000000e+00> : vector<8x1024xf32>
    %113 = tpu.matmul %112, %110, %cst_49 {dimension_numbers = #tpu.dot_dimension_numbers<[1], [0], [0], [1], [0, 0, 1, 1], [], []>} : vector<8x16xf32>, vector<16x1024xf32>, vector<8x1024xf32> -> vector<8x1024xf32>
    %114 = arith.addf %96, %113 : vector<8x1024xf32>
    %c0_50 = arith.constant 0 : index
    %c0_51 = arith.constant 0 : index
    %115 = vector.load %arg5[%c0_50, %c0_51] : memref<8x1xf32, #tpu.memory_space<vmem>>, vector<8x1xf32>
    %116 = vector.broadcast %115 : vector<8x1xf32> to vector<8x1024xf32>
    %117 = arith.addf %114, %116 : vector<8x1024xf32>
    %cst_52 = arith.constant 0.000000e+00 : f32
    %118 = vector.broadcast %cst_52 : f32 to vector<8x1024xf32>
    %119 = arith.maximumf %117, %118 : vector<8x1024xf32>
    %cst_53 = arith.constant 0.000000e+00 : f32
    %120 = vector.broadcast %cst_53 : f32 to vector<8x1024xf32>
    %c2_i32_54 = arith.constant 2 : i32
    %121 = tpu.dynamic_rotate %119 by %c2_i32_54 dim 1 : vector<8x1024xf32>, i32 -> vector<8x1024xf32>
    %c-2_i32_55 = arith.constant -2 : i32
    %122 = vector.broadcast %c-2_i32_55 : i32 to vector<1x1024xi32>
    %123 = arith.addi %0, %122 : vector<1x1024xi32>
    %c0_i32_56 = arith.constant 0 : i32
    %124 = vector.broadcast %c0_i32_56 : i32 to vector<1x1024xi32>
    %125 = arith.cmpi sge, %123, %124 : vector<1x1024xi32>
    %c-2_i32_57 = arith.constant -2 : i32
    %126 = vector.broadcast %c-2_i32_57 : i32 to vector<1x1024xi32>
    %127 = arith.addi %0, %126 : vector<1x1024xi32>
    %c128_i32_58 = arith.constant 128 : i32
    %128 = vector.broadcast %c128_i32_58 : i32 to vector<1x1024xi32>
    %129 = arith.cmpi slt, %127, %128 : vector<1x1024xi32>
    %130 = arith.andi %125, %129 : vector<1x1024xi1>
    %cst_59 = arith.constant 0.000000e+00 : f32
    %131 = vector.shape_cast %130 : vector<1x1024xi1> to vector<1x1024xi1>
    %132 = vector.broadcast %131 : vector<1x1024xi1> to vector<8x1024xi1>
    %133 = vector.broadcast %cst_59 : f32 to vector<8x1024xf32>
    %134 = arith.select %132, %121, %133 : vector<8x1024xi1>, vector<8x1024xf32>
    %c0_60 = arith.constant 0 : index
    %c0_61 = arith.constant 0 : index
    %c0_62 = arith.constant 0 : index
    %135 = vector.load %arg6[%c0_60, %c0_61, %c0_62] : memref<5x8x8xf32, #tpu.memory_space<vmem>>, vector<1x8x8xf32>
    %136 = vector.shape_cast %135 : vector<1x8x8xf32> to vector<8x8xf32>
    %cst_63 = arith.constant dense<0.000000e+00> : vector<8x1024xf32>
    %137 = tpu.matmul %136, %134, %cst_63 {dimension_numbers = #tpu.dot_dimension_numbers<[1], [0], [0], [1], [0, 0, 1, 1], [], []>} : vector<8x8xf32>, vector<8x1024xf32>, vector<8x1024xf32> -> vector<8x1024xf32>
    %138 = arith.addf %120, %137 : vector<8x1024xf32>
    %c1_i32_64 = arith.constant 1 : i32
    %139 = tpu.dynamic_rotate %119 by %c1_i32_64 dim 1 : vector<8x1024xf32>, i32 -> vector<8x1024xf32>
    %c-1_i32_65 = arith.constant -1 : i32
    %140 = vector.broadcast %c-1_i32_65 : i32 to vector<1x1024xi32>
    %141 = arith.addi %0, %140 : vector<1x1024xi32>
    %c0_i32_66 = arith.constant 0 : i32
    %142 = vector.broadcast %c0_i32_66 : i32 to vector<1x1024xi32>
    %143 = arith.cmpi sge, %141, %142 : vector<1x1024xi32>
    %c-1_i32_67 = arith.constant -1 : i32
    %144 = vector.broadcast %c-1_i32_67 : i32 to vector<1x1024xi32>
    %145 = arith.addi %0, %144 : vector<1x1024xi32>
    %c128_i32_68 = arith.constant 128 : i32
    %146 = vector.broadcast %c128_i32_68 : i32 to vector<1x1024xi32>
    %147 = arith.cmpi slt, %145, %146 : vector<1x1024xi32>
    %148 = arith.andi %143, %147 : vector<1x1024xi1>
    %cst_69 = arith.constant 0.000000e+00 : f32
    %149 = vector.shape_cast %148 : vector<1x1024xi1> to vector<1x1024xi1>
    %150 = vector.broadcast %149 : vector<1x1024xi1> to vector<8x1024xi1>
    %151 = vector.broadcast %cst_69 : f32 to vector<8x1024xf32>
    %152 = arith.select %150, %139, %151 : vector<8x1024xi1>, vector<8x1024xf32>
    %c1_70 = arith.constant 1 : index
    %c0_71 = arith.constant 0 : index
    %c0_72 = arith.constant 0 : index
    %153 = vector.load %arg6[%c1_70, %c0_71, %c0_72] : memref<5x8x8xf32, #tpu.memory_space<vmem>>, vector<1x8x8xf32>
    %154 = vector.shape_cast %153 : vector<1x8x8xf32> to vector<8x8xf32>
    %cst_73 = arith.constant dense<0.000000e+00> : vector<8x1024xf32>
    %155 = tpu.matmul %154, %152, %cst_73 {dimension_numbers = #tpu.dot_dimension_numbers<[1], [0], [0], [1], [0, 0, 1, 1], [], []>} : vector<8x8xf32>, vector<8x1024xf32>, vector<8x1024xf32> -> vector<8x1024xf32>
    %156 = arith.addf %138, %155 : vector<8x1024xf32>
    %c2_74 = arith.constant 2 : index
    %c0_75 = arith.constant 0 : index
    %c0_76 = arith.constant 0 : index
    %157 = vector.load %arg6[%c2_74, %c0_75, %c0_76] : memref<5x8x8xf32, #tpu.memory_space<vmem>>, vector<1x8x8xf32>
    %158 = vector.shape_cast %157 : vector<1x8x8xf32> to vector<8x8xf32>
    %cst_77 = arith.constant dense<0.000000e+00> : vector<8x1024xf32>
    %159 = tpu.matmul %158, %119, %cst_77 {dimension_numbers = #tpu.dot_dimension_numbers<[1], [0], [0], [1], [0, 0, 1, 1], [], []>} : vector<8x8xf32>, vector<8x1024xf32>, vector<8x1024xf32> -> vector<8x1024xf32>
    %160 = arith.addf %156, %159 : vector<8x1024xf32>
    %c1023_i32_78 = arith.constant 1023 : i32
    %161 = tpu.dynamic_rotate %119 by %c1023_i32_78 dim 1 : vector<8x1024xf32>, i32 -> vector<8x1024xf32>
    %c1_i32_79 = arith.constant 1 : i32
    %162 = vector.broadcast %c1_i32_79 : i32 to vector<1x1024xi32>
    %163 = arith.addi %0, %162 : vector<1x1024xi32>
    %c0_i32_80 = arith.constant 0 : i32
    %164 = vector.broadcast %c0_i32_80 : i32 to vector<1x1024xi32>
    %165 = arith.cmpi sge, %163, %164 : vector<1x1024xi32>
    %c1_i32_81 = arith.constant 1 : i32
    %166 = vector.broadcast %c1_i32_81 : i32 to vector<1x1024xi32>
    %167 = arith.addi %0, %166 : vector<1x1024xi32>
    %c128_i32_82 = arith.constant 128 : i32
    %168 = vector.broadcast %c128_i32_82 : i32 to vector<1x1024xi32>
    %169 = arith.cmpi slt, %167, %168 : vector<1x1024xi32>
    %170 = arith.andi %165, %169 : vector<1x1024xi1>
    %cst_83 = arith.constant 0.000000e+00 : f32
    %171 = vector.shape_cast %170 : vector<1x1024xi1> to vector<1x1024xi1>
    %172 = vector.broadcast %171 : vector<1x1024xi1> to vector<8x1024xi1>
    %173 = vector.broadcast %cst_83 : f32 to vector<8x1024xf32>
    %174 = arith.select %172, %161, %173 : vector<8x1024xi1>, vector<8x1024xf32>
    %c3_84 = arith.constant 3 : index
    %c0_85 = arith.constant 0 : index
    %c0_86 = arith.constant 0 : index
    %175 = vector.load %arg6[%c3_84, %c0_85, %c0_86] : memref<5x8x8xf32, #tpu.memory_space<vmem>>, vector<1x8x8xf32>
    %176 = vector.shape_cast %175 : vector<1x8x8xf32> to vector<8x8xf32>
    %cst_87 = arith.constant dense<0.000000e+00> : vector<8x1024xf32>
    %177 = tpu.matmul %176, %174, %cst_87 {dimension_numbers = #tpu.dot_dimension_numbers<[1], [0], [0], [1], [0, 0, 1, 1], [], []>} : vector<8x8xf32>, vector<8x1024xf32>, vector<8x1024xf32> -> vector<8x1024xf32>
    %178 = arith.addf %160, %177 : vector<8x1024xf32>
    %c1022_i32_88 = arith.constant 1022 : i32
    %179 = tpu.dynamic_rotate %119 by %c1022_i32_88 dim 1 : vector<8x1024xf32>, i32 -> vector<8x1024xf32>
    %c2_i32_89 = arith.constant 2 : i32
    %180 = vector.broadcast %c2_i32_89 : i32 to vector<1x1024xi32>
    %181 = arith.addi %0, %180 : vector<1x1024xi32>
    %c0_i32_90 = arith.constant 0 : i32
    %182 = vector.broadcast %c0_i32_90 : i32 to vector<1x1024xi32>
    %183 = arith.cmpi sge, %181, %182 : vector<1x1024xi32>
    %c2_i32_91 = arith.constant 2 : i32
    %184 = vector.broadcast %c2_i32_91 : i32 to vector<1x1024xi32>
    %185 = arith.addi %0, %184 : vector<1x1024xi32>
    %c128_i32_92 = arith.constant 128 : i32
    %186 = vector.broadcast %c128_i32_92 : i32 to vector<1x1024xi32>
    %187 = arith.cmpi slt, %185, %186 : vector<1x1024xi32>
    %188 = arith.andi %183, %187 : vector<1x1024xi1>
    %cst_93 = arith.constant 0.000000e+00 : f32
    %189 = vector.shape_cast %188 : vector<1x1024xi1> to vector<1x1024xi1>
    %190 = vector.broadcast %189 : vector<1x1024xi1> to vector<8x1024xi1>
    %191 = vector.broadcast %cst_93 : f32 to vector<8x1024xf32>
    %192 = arith.select %190, %179, %191 : vector<8x1024xi1>, vector<8x1024xf32>
    %c4_94 = arith.constant 4 : index
    %c0_95 = arith.constant 0 : index
    %c0_96 = arith.constant 0 : index
    %193 = vector.load %arg6[%c4_94, %c0_95, %c0_96] : memref<5x8x8xf32, #tpu.memory_space<vmem>>, vector<1x8x8xf32>
    %194 = vector.shape_cast %193 : vector<1x8x8xf32> to vector<8x8xf32>
    %cst_97 = arith.constant dense<0.000000e+00> : vector<8x1024xf32>
    %195 = tpu.matmul %194, %192, %cst_97 {dimension_numbers = #tpu.dot_dimension_numbers<[1], [0], [0], [1], [0, 0, 1, 1], [], []>} : vector<8x8xf32>, vector<8x1024xf32>, vector<8x1024xf32> -> vector<8x1024xf32>
    %196 = arith.addf %178, %195 : vector<8x1024xf32>
    %c0_98 = arith.constant 0 : index
    %c0_99 = arith.constant 0 : index
    %197 = vector.load %arg7[%c0_98, %c0_99] : memref<8x1xf32, #tpu.memory_space<vmem>>, vector<8x1xf32>
    %198 = vector.broadcast %197 : vector<8x1xf32> to vector<8x1024xf32>
    %199 = arith.addf %196, %198 : vector<8x1024xf32>
    %cst_100 = arith.constant 0.000000e+00 : f32
    %200 = vector.broadcast %cst_100 : f32 to vector<8x1024xf32>
    %201 = arith.maximumf %199, %200 : vector<8x1024xf32>
    %cst_101 = arith.constant 0.000000e+00 : f32
    %202 = vector.broadcast %cst_101 : f32 to vector<8x1024xf32>
    %c1_i32_102 = arith.constant 1 : i32
    %203 = tpu.dynamic_rotate %201 by %c1_i32_102 dim 1 : vector<8x1024xf32>, i32 -> vector<8x1024xf32>
    %c-1_i32_103 = arith.constant -1 : i32
    %204 = vector.broadcast %c-1_i32_103 : i32 to vector<1x1024xi32>
    %205 = arith.addi %0, %204 : vector<1x1024xi32>
    %c0_i32_104 = arith.constant 0 : i32
    %206 = vector.broadcast %c0_i32_104 : i32 to vector<1x1024xi32>
    %207 = arith.cmpi sge, %205, %206 : vector<1x1024xi32>
    %c-1_i32_105 = arith.constant -1 : i32
    %208 = vector.broadcast %c-1_i32_105 : i32 to vector<1x1024xi32>
    %209 = arith.addi %0, %208 : vector<1x1024xi32>
    %c128_i32_106 = arith.constant 128 : i32
    %210 = vector.broadcast %c128_i32_106 : i32 to vector<1x1024xi32>
    %211 = arith.cmpi slt, %209, %210 : vector<1x1024xi32>
    %212 = arith.andi %207, %211 : vector<1x1024xi1>
    %cst_107 = arith.constant 0.000000e+00 : f32
    %213 = vector.shape_cast %212 : vector<1x1024xi1> to vector<1x1024xi1>
    %214 = vector.broadcast %213 : vector<1x1024xi1> to vector<8x1024xi1>
    %215 = vector.broadcast %cst_107 : f32 to vector<8x1024xf32>
    %216 = arith.select %214, %203, %215 : vector<8x1024xi1>, vector<8x1024xf32>
    %c0_108 = arith.constant 0 : index
    %c0_109 = arith.constant 0 : index
    %c0_110 = arith.constant 0 : index
    %217 = vector.load %arg8[%c0_108, %c0_109, %c0_110] : memref<3x8x8xf32, #tpu.memory_space<vmem>>, vector<1x8x8xf32>
    %218 = vector.shape_cast %217 : vector<1x8x8xf32> to vector<8x8xf32>
    %cst_111 = arith.constant dense<0.000000e+00> : vector<8x1024xf32>
    %219 = tpu.matmul %218, %216, %cst_111 {dimension_numbers = #tpu.dot_dimension_numbers<[1], [0], [0], [1], [0, 0, 1, 1], [], []>} : vector<8x8xf32>, vector<8x1024xf32>, vector<8x1024xf32> -> vector<8x1024xf32>
    %220 = arith.addf %202, %219 : vector<8x1024xf32>
    %c1_112 = arith.constant 1 : index
    %c0_113 = arith.constant 0 : index
    %c0_114 = arith.constant 0 : index
    %221 = vector.load %arg8[%c1_112, %c0_113, %c0_114] : memref<3x8x8xf32, #tpu.memory_space<vmem>>, vector<1x8x8xf32>
    %222 = vector.shape_cast %221 : vector<1x8x8xf32> to vector<8x8xf32>
    %cst_115 = arith.constant dense<0.000000e+00> : vector<8x1024xf32>
    %223 = tpu.matmul %222, %201, %cst_115 {dimension_numbers = #tpu.dot_dimension_numbers<[1], [0], [0], [1], [0, 0, 1, 1], [], []>} : vector<8x8xf32>, vector<8x1024xf32>, vector<8x1024xf32> -> vector<8x1024xf32>
    %224 = arith.addf %220, %223 : vector<8x1024xf32>
    %c1023_i32_116 = arith.constant 1023 : i32
    %225 = tpu.dynamic_rotate %201 by %c1023_i32_116 dim 1 : vector<8x1024xf32>, i32 -> vector<8x1024xf32>
    %c1_i32_117 = arith.constant 1 : i32
    %226 = vector.broadcast %c1_i32_117 : i32 to vector<1x1024xi32>
    %227 = arith.addi %0, %226 : vector<1x1024xi32>
    %c0_i32_118 = arith.constant 0 : i32
    %228 = vector.broadcast %c0_i32_118 : i32 to vector<1x1024xi32>
    %229 = arith.cmpi sge, %227, %228 : vector<1x1024xi32>
    %c1_i32_119 = arith.constant 1 : i32
    %230 = vector.broadcast %c1_i32_119 : i32 to vector<1x1024xi32>
    %231 = arith.addi %0, %230 : vector<1x1024xi32>
    %c128_i32_120 = arith.constant 128 : i32
    %232 = vector.broadcast %c128_i32_120 : i32 to vector<1x1024xi32>
    %233 = arith.cmpi slt, %231, %232 : vector<1x1024xi32>
    %234 = arith.andi %229, %233 : vector<1x1024xi1>
    %cst_121 = arith.constant 0.000000e+00 : f32
    %235 = vector.shape_cast %234 : vector<1x1024xi1> to vector<1x1024xi1>
    %236 = vector.broadcast %235 : vector<1x1024xi1> to vector<8x1024xi1>
    %237 = vector.broadcast %cst_121 : f32 to vector<8x1024xf32>
    %238 = arith.select %236, %225, %237 : vector<8x1024xi1>, vector<8x1024xf32>
    %c2_122 = arith.constant 2 : index
    %c0_123 = arith.constant 0 : index
    %c0_124 = arith.constant 0 : index
    %239 = vector.load %arg8[%c2_122, %c0_123, %c0_124] : memref<3x8x8xf32, #tpu.memory_space<vmem>>, vector<1x8x8xf32>
    %240 = vector.shape_cast %239 : vector<1x8x8xf32> to vector<8x8xf32>
    %cst_125 = arith.constant dense<0.000000e+00> : vector<8x1024xf32>
    %241 = tpu.matmul %240, %238, %cst_125 {dimension_numbers = #tpu.dot_dimension_numbers<[1], [0], [0], [1], [0, 0, 1, 1], [], []>} : vector<8x8xf32>, vector<8x1024xf32>, vector<8x1024xf32> -> vector<8x1024xf32>
    %242 = arith.addf %224, %241 : vector<8x1024xf32>
    %c0_126 = arith.constant 0 : index
    %c0_127 = arith.constant 0 : index
    %243 = vector.load %arg9[%c0_126, %c0_127] : memref<8x1xf32, #tpu.memory_space<vmem>>, vector<8x1xf32>
    %244 = vector.broadcast %243 : vector<8x1xf32> to vector<8x1024xf32>
    %245 = arith.addf %242, %244 : vector<8x1024xf32>
    %cst_128 = arith.constant 0.000000e+00 : f32
    %246 = vector.broadcast %cst_128 : f32 to vector<8x1024xf32>
    %247 = arith.maximumf %245, %246 : vector<8x1024xf32>
    %c0_129 = arith.constant 0 : index
    %c0_130 = arith.constant 0 : index
    %248 = vector.load %arg3[%c0_129, %c0_130] : memref<1024x8xf32, #tpu.memory_space<vmem>>, vector<1024x8xf32>
    %cst_131 = arith.constant dense<0.000000e+00> : vector<8x8xf32>
    %249 = tpu.matmul %247, %248, %cst_131 {dimension_numbers = #tpu.dot_dimension_numbers<[1], [0], [0], [1], [0, 0, 1, 1], [], []>} : vector<8x1024xf32>, vector<1024x8xf32>, vector<8x8xf32> -> vector<8x8xf32>
    %c0_132 = arith.constant 0 : index
    %c0_133 = arith.constant 0 : index
    %250 = vector.load %arg10[%c0_132, %c0_133] : memref<16x8xf32, #tpu.memory_space<vmem>>, vector<16x8xf32>
    %cst_134 = arith.constant dense<0.000000e+00> : vector<16x8xf32>
    %251 = tpu.matmul %250, %249, %cst_134 {dimension_numbers = #tpu.dot_dimension_numbers<[1], [0], [0], [1], [0, 0, 1, 1], [], []>} : vector<16x8xf32>, vector<8x8xf32>, vector<16x8xf32> -> vector<16x8xf32>
    %c0_135 = arith.constant 0 : index
    %c0_136 = arith.constant 0 : index
    %252 = vector.load %arg11[%c0_135, %c0_136] : memref<16x1xf32, #tpu.memory_space<vmem>>, vector<16x1xf32>
    %253 = vector.broadcast %252 : vector<16x1xf32> to vector<16x8xf32>
    %254 = arith.addf %251, %253 : vector<16x8xf32>
    %cst_137 = arith.constant 0.000000e+00 : f32
    %255 = vector.broadcast %cst_137 : f32 to vector<16x8xf32>
    %256 = arith.maximumf %254, %255 : vector<16x8xf32>
    %c0_138 = arith.constant 0 : index
    %c0_139 = arith.constant 0 : index
    %257 = vector.load %arg12[%c0_138, %c0_139] : memref<10x16xf32, #tpu.memory_space<vmem>>, vector<10x16xf32>
    %cst_140 = arith.constant dense<0.000000e+00> : vector<10x8xf32>
    %258 = tpu.matmul %257, %256, %cst_140 {dimension_numbers = #tpu.dot_dimension_numbers<[1], [0], [0], [1], [0, 0, 1, 1], [], []>} : vector<10x16xf32>, vector<16x8xf32>, vector<10x8xf32> -> vector<10x8xf32>
    %c0_141 = arith.constant 0 : index
    %c0_142 = arith.constant 0 : index
    %259 = vector.load %arg13[%c0_141, %c0_142] : memref<10x1xf32, #tpu.memory_space<vmem>>, vector<10x1xf32>
    %260 = vector.broadcast %259 : vector<10x1xf32> to vector<10x8xf32>
    %261 = arith.addf %258, %260 : vector<10x8xf32>
    %c0_143 = arith.constant 0 : index
    %c0_144 = arith.constant 0 : index
    %c0_145 = arith.constant 0 : index
    %262 = vector.load %arg14[%c0_143, %c0_144, %c0_145] : memref<1x10x8xf32, #tpu.memory_space<vmem>>, vector<1x10x8xf32>
    %263 = vector.shape_cast %262 : vector<1x10x8xf32> to vector<10x8xf32>
    %264 = vector.shape_cast %261 : vector<10x8xf32> to vector<1x10x8xf32>
    tpu.vector_store %arg14[%c0_143, %c0_144, %c0_145], %264 {strides = array<i32>} : memref<1x10x8xf32, #tpu.memory_space<vmem>>, vector<1x10x8xf32>,
    return
  }
  func.func @transform_0(%arg0: i32) -> (i32, i32) {
    %c0_i32 = arith.constant 0 : i32
    %c0_i32_0 = arith.constant 0 : i32
    return %c0_i32, %arg0 : i32, i32
  }
  func.func @transform_1(%arg0: i32) -> (i32, i32) {
    %c0_i32 = arith.constant 0 : i32
    %c0_i32_0 = arith.constant 0 : i32
    %c0_i32_1 = arith.constant 0 : i32
    return %c0_i32, %c0_i32_0 : i32, i32
  }
  func.func @transform_2(%arg0: i32) -> (i32, i32) {
    %c0_i32 = arith.constant 0 : i32
    %c0_i32_0 = arith.constant 0 : i32
    %c0_i32_1 = arith.constant 0 : i32
    return %c0_i32, %c0_i32_0 : i32, i32
  }
  func.func @transform_3(%arg0: i32) -> (i32, i32, i32) {
    %c0_i32 = arith.constant 0 : i32
    %c0_i32_0 = arith.constant 0 : i32
    %c0_i32_1 = arith.constant 0 : i32
    %c0_i32_2 = arith.constant 0 : i32
    return %c0_i32, %c0_i32_0, %c0_i32_1 : i32, i32, i32
  }
  func.func @transform_4(%arg0: i32) -> (i32, i32) {
    %c0_i32 = arith.constant 0 : i32
    %c0_i32_0 = arith.constant 0 : i32
    %c0_i32_1 = arith.constant 0 : i32
    return %c0_i32, %c0_i32_0 : i32, i32
  }
  func.func @transform_5(%arg0: i32) -> (i32, i32, i32) {
    %c0_i32 = arith.constant 0 : i32
    %c0_i32_0 = arith.constant 0 : i32
    %c0_i32_1 = arith.constant 0 : i32
    %c0_i32_2 = arith.constant 0 : i32
    return %c0_i32, %c0_i32_0, %c0_i32_1 : i32, i32, i32
  }
  func.func @transform_6(%arg0: i32) -> (i32, i32) {
    %c0_i32 = arith.constant 0 : i32
    %c0_i32_0 = arith.constant 0 : i32
    %c0_i32_1 = arith.constant 0 : i32
    return %c0_i32, %c0_i32_0 : i32, i32
  }
  func.func @transform_7(%arg0: i32) -> (i32, i32, i32) {
    %c0_i32 = arith.constant 0 : i32
    %c0_i32_0 = arith.constant 0 : i32
    %c0_i32_1 = arith.constant 0 : i32
    %c0_i32_2 = arith.constant 0 : i32
    return %c0_i32, %c0_i32_0, %c0_i32_1 : i32, i32, i32
  }
  func.func @transform_8(%arg0: i32) -> (i32, i32) {
    %c0_i32 = arith.constant 0 : i32
    %c0_i32_0 = arith.constant 0 : i32
    %c0_i32_1 = arith.constant 0 : i32
    return %c0_i32, %c0_i32_0 : i32, i32
  }
  func.func @transform_9(%arg0: i32) -> (i32, i32) {
    %c0_i32 = arith.constant 0 : i32
    %c0_i32_0 = arith.constant 0 : i32
    %c0_i32_1 = arith.constant 0 : i32
    return %c0_i32, %c0_i32_0 : i32, i32
  }
  func.func @transform_10(%arg0: i32) -> (i32, i32) {
    %c0_i32 = arith.constant 0 : i32
    %c0_i32_0 = arith.constant 0 : i32
    %c0_i32_1 = arith.constant 0 : i32
    return %c0_i32, %c0_i32_0 : i32, i32
  }
  func.func @transform_11(%arg0: i32) -> (i32, i32) {
    %c0_i32 = arith.constant 0 : i32
    %c0_i32_0 = arith.constant 0 : i32
    %c0_i32_1 = arith.constant 0 : i32
    return %c0_i32, %c0_i32_0 : i32, i32
  }
  func.func @transform_12(%arg0: i32) -> (i32, i32) {
    %c0_i32 = arith.constant 0 : i32
    %c0_i32_0 = arith.constant 0 : i32
    %c0_i32_1 = arith.constant 0 : i32
    return %c0_i32, %c0_i32_0 : i32, i32
  }
  func.func @transform_13(%arg0: i32) -> (i32, i32, i32) {
    %c0_i32 = arith.constant 0 : i32
    %c0_i32_0 = arith.constant 0 : i32
    %c0_i32_1 = arith.constant 0 : i32
    return %arg0, %c0_i32, %c0_i32_0 : i32, i32, i32
  }
}

</mosaic_0001>

<bundles_post_ra>
// kernel: tpu_custom_call.1
= control target key start
LH: loop header
LB: loop body
LE: loop exit
PB: predicated region body
PF: predicated region fallthrough
CT: control target
= control target key end

     0   :  { %s7657_s25 = smov 0   ;;  %s7659_s26 = smov 0   ;;  %s9730_s0 = inlined_call_operand.vmem [shape: f32[16,2048], index: 0, kind: input, shape index: {}]   ;;  %s9731_s1 = inlined_call_operand.vmem [shape: s32[1,1024], index: 1, kind: input, shape index: {}]   ;;  %s9732_s2 = inlined_call_operand.vmem [shape: f32[1024,8], index: 2, kind: input, shape index: {}]   ;;  %s9733_s3 = inlined_call_operand.vmem [shape: f32[7,8,16], index: 3, kind: input, shape index: {}]   ;;  %s9734_s4 = inlined_call_operand.vmem [shape: f32[8,1], index: 4, kind: input, shape index: {}]   ;;  %s9735_s5 = inlined_call_operand.vmem [shape: f32[5,8,8], index: 5, kind: input, shape index: {}]   ;;  %s9736_s6 = inlined_call_operand.vmem [shape: f32[8,1], index: 6, kind: input, shape index: {}]   ;;  %s9737_s7 = inlined_call_operand.vmem [shape: f32[3,8,8], index: 7, kind: input, shape index: {}]   ;;  %s9738_s8 = inlined_call_operand.vmem [shape: f32[8,1], index: 8, kind: input, shape index: {}]   ;;  %s9739_s9 = inlined_call_operand.vmem [shape: f32[16,8], index: 9, kind: input, shape index: {}]   ;;  %s9740_s10 = inlined_call_operand.vmem [shape: f32[16,1], index: 10, kind: input, shape index: {}]   ;;  %s9741_s11 = inlined_call_operand.vmem [shape: f32[10,16], index: 11, kind: input, shape index: {}]   ;;  %s9742_s12 = inlined_call_operand.vmem [shape: f32[10,1], index: 12, kind: input, shape index: {}]   ;;  %s9743_s13 = inlined_call_operand.vmem [shape: f32[2,10,8], index: 13, kind: output, shape index: {}]  }
   0x1   :  { %s7661_s27 = smov 0  }
   0x2 LB: > { %s6499_s28 = sadd.s32 4294967295, %s7577_s27   ;;  %s7674_s29 = sadd.s32 1, %s7577_s27   ;;  %s7577_s27 = sphi %s7661_s27, %s10139_s27   ;;  %s7573_s26 = sphi %s7659_s26, %s10138_s26   ;;  %s7569_s25 = sphi %s7657_s25, %s10137_s25  }
   0x3   : > { %s27_s30 = ssub.s32 %s7577_s27, %s7674_s29  ;;  %s30_s14 = sadd.s32 1, %s7573_s26 }
   0x4   : > { %p28_p0 = scmp.eq.s32.totalorder %s27_s30, 0  ;;  %p37_p1 = scmp.ne.s32.totalorder %s7573_s26, %s7569_s25 }
   0x5   : > { %p38_p2 = scmp.eq.s32.totalorder %s7577_s27, 0  ;;  %p6502_p4 = scmp.ge.s32.totalorder %s7577_s27, 2 }
   0x6   : > { %s7683_s15 = scalar_select %p28_p0, %s7573_s26, %s30_s14  }
   0x7   : > { %p39_p3 = por %p38_p2, %p37_p1  ;;  %377 = sbr.rel (%p6502_p4) target bundleno = 26 (0x1a), region = 64 }
   0xe   : > { %380 = sbr.rel (!%p39_p3) target bundleno = 26 (0x1a), region = 68  ;;  %s382_s16 = sand.u32 (%p39_p3), 1, %s7573_s26  }
   0xf   : > { %s6732_s17 = sshll.u32 (%p39_p3), %s7577_s27, 6  ;;  %s6503_s18 = sshll.u32 (%p39_p3), %s382_s16, 7 }
  0x10   : > { %s7691_s21 = scalar_lea.vmem (%p39_p3), %s9730_s0, %s6732_s17  ;;  %s384_s22 = scalar_lea.vmem (%p39_p3), [#allocation2], %s6503_s18 }
  0x11   : > { %v400_v0 = vld [vmem:[%s7691_s21] sm:$0xff] (%p39_p3)  ;;  %v402_v1 = vld [vmem:[%s7691_s21 + $0x8] sm:$0xff] (%p39_p3)  ;;  %v404_v2 = vld [vmem:[%s7691_s21 + $0x10] sm:$0xff] (%p39_p3) }
  0x12   : > { %401 = vst [vmem:[%s384_s22] sm:$0xff] (%p39_p3), %v400_v0  ;;  %403 = vst [vmem:[%s384_s22 + $0x8] sm:$0xff] (%p39_p3), %v402_v1  ;;  %v406_v3 = vld [vmem:[%s7691_s21 + $0x18] sm:$0xff] (%p39_p3)  ;;  %v408_v4 = vld [vmem:[%s7691_s21 + $0x20] sm:$0xff] (%p39_p3) }
  0x13   : > { %405 = vst [vmem:[%s384_s22 + $0x10] sm:$0xff] (%p39_p3), %v404_v2  ;;  %v410_v5 = vld [vmem:[%s7691_s21 + $0x28] sm:$0xff] (%p39_p3)  ;;  %407 = vst [vmem:[%s384_s22 + $0x18] sm:$0xff] (%p39_p3), %v406_v3  ;;  %v412_v6 = vld [vmem:[%s7691_s21 + $0x30] sm:$0xff] (%p39_p3) }
  0x14   : > { %409 = vst [vmem:[%s384_s22 + $0x20] sm:$0xff] (%p39_p3), %v408_v4  ;;  %411 = vst [vmem:[%s384_s22 + $0x28] sm:$0xff] (%p39_p3), %v410_v5  ;;  %v414_v7 = vld [vmem:[%s7691_s21 + $0x38] sm:$0xff] (%p39_p3)  ;;  %v416_v8 = vld [vmem:[%s7691_s21 + $0x80] sm:$0xff] (%p39_p3) }
  0x15   : > { %413 = vst [vmem:[%s384_s22 + $0x30] sm:$0xff] %v412_v6  ;;  %415 = vst [vmem:[%s384_s22 + $0x38] sm:$0xff] %v414_v7  ;;  %v418_v9 = vld [vmem:[%s7691_s21 + $0x88] sm:$0xff]  ;;  %v420_v10 = vld [vmem:[%s7691_s21 + $0x90] sm:$0xff] }
  0x16   : > { %417 = vst [vmem:[%s384_s22 + $0x40] sm:$0xff] %v416_v8  ;;  %v422_v11 = vld [vmem:[%s7691_s21 + $0x98] sm:$0xff]  ;;  %419 = vst [vmem:[%s384_s22 + $0x48] sm:$0xff] %v418_v9  ;;  %v424_v12 = vld [vmem:[%s7691_s21 + $0xa0] sm:$0xff] }
  0x17   : > { %421 = vst [vmem:[%s384_s22 + $0x50] sm:$0xff] %v420_v10  ;;  %423 = vst [vmem:[%s384_s22 + $0x58] sm:$0xff] %v422_v11  ;;  %v426_v13 = vld [vmem:[%s7691_s21 + $0xa8] sm:$0xff]  ;;  %v428_v14 = vld [vmem:[%s7691_s21 + $0xb0] sm:$0xff] }
  0x18   : > { %425 = vst [vmem:[%s384_s22 + $0x60] sm:$0xff] %v424_v12  ;;  %427 = vst [vmem:[%s384_s22 + $0x68] sm:$0xff] %v426_v13  ;;  %v430_v15 = vld [vmem:[%s7691_s21 + $0xb8] sm:$0xff] }
  0x19   : > { %429 = vst [vmem:[%s384_s22 + $0x70] sm:$0xff] %v428_v14  ;;  %431 = vst [vmem:[%s384_s22 + $0x78] sm:$0xff] %v430_v15 }
  0x1a PF: > { %p6506_p5 = scmp.ge.s32.totalorder %s7577_s27, 1  ;;  %p436_p6 = scmp.lt.s32.totalorder %s7577_s27, 3 }
  0x1c   : > { %p437_p7 = pnand %p6506_p5, %p436_p6 }
  0x1e   : > { %440 = sbr.rel (%p437_p7) target bundleno = 1935 (0x78f), region = 91 }
  0x25   : > { %s443_s23 = sand.u32 1, %s7569_s25   ;;  %v9759_v16 = vmov 0   ;;  %s7580_s25 = smov 2   ;;  %v9757_v41 = vmov 0.0   ;;  %v3234_v50 = vld [vmem:[%s9734_s4] sm:$0xff]  ;;  %v541_v53 = vlaneseq  ;;  %v9797_v8 = vmov 0 }
  0x26   : > { %s6507_s24 = sshll.u32 %s443_s23, 7  ;;  %7553 = vset.pattern.permute.xlu0 %v9759_v16  ;;  %7554 = vset.pattern.permute.xlu1 %v9759_v16  ;;  %s7582_s14 = smov 3   ;;  %v7858_v51 = vld [vmem:[%s9731_s1] sm:$0xff]  ;;  %v9799_v9 = vmov 0  ;;  %v9801_v10 = vmov 0  ;;  %v9803_v11 = vmov 0 }
  0x27   : > { %s445_s30 = scalar_lea.vmem [#allocation2], %s6507_s24  ;;  %873 = vmatprep.mubr.f32.mxu1 %v9757_v41  ;;  %802 = vmatprep.mubr.f32.mxu0 %v9757_v41  ;;  %s7583_s16 = smov 1   ;;  %v671_v52 = vadd.s32 4294967294, %v7858_v51  ;;  %v566_v54 = vshrl.u32 %v541_v53, 7  ;;  %v560_v61 = vadd.s32 4294967293, %v7858_v51  ;;  %v7875_v62 = vand.u32 127, %v541_v53 }
  0x28   : > { %v7714_v17 = vld [vmem:[%s445_s30 + $0x10] sm:$0xff]  ;;  %v7718_v19 = vld [vmem:[%s445_s30] sm:$0xff]  ;;  %v7726_v22 = vld [vmem:[%s445_s30 + $0x18] sm:$0xff]  ;;  %s7584_s17 = smov 127   ;;  %s7585_s18 = smov 126   ;;  %v9806_v14 = vmov 0 }
  0x29   : > { %v7716_v18 = vld [vmem:[%s445_s30 + $0x50] sm:$0xff]  ;;  %v7724_v21 = vld [vmem:[%s445_s30 + $0x40] sm:$0xff]  ;;  %v7728_v23 = vld [vmem:[%s445_s30 + $0x58] sm:$0xff]  ;;  %s7586_s19 = smov 125   ;;  %vm672_vm0 = vcmp.ge.s32.totalorder %v671_v52, 0  ;;  %vm673_vm1 = vcmp.lt.s32.totalorder %v671_v52, 128 }
  0x2a   : > { %v7722_v20 = vpack.i.bf16 %v7716_v18, %v7714_v17  ;;  %v7732_v24 = vpack.i.bf16 %v7724_v21, %v7718_v19  ;;  %v7734_v25 = vld [vmem:[%s445_s30 + $0x8] sm:$0xff]  ;;  %v7742_v27 = vpack.i.bf16 %v7728_v23, %v7726_v22  ;;  %v7750_v29 = vld [vmem:[%s445_s30 + $0x38] sm:$0xff]  ;;  %v7754_v31 = vld [vmem:[%s445_s30 + $0x30] sm:$0xff]  ;;  %v7861_v55 = vsub.s32 1, %v566_v54  ;;  %p487_p8 = scmp.lt.s32.totalorder %s6499_s28, 1 }
  0x2b   : > { %v7736_v26 = vld [vmem:[%s445_s30 + $0x48] sm:$0xff]  ;;  %v7752_v30 = vld [vmem:[%s445_s30 + $0x78] sm:$0xff]  ;;  %v7756_v32 = vld [vmem:[%s445_s30 + $0x70] sm:$0xff]  ;;  %v7866_v57 = vsub.s32 3, %v566_v54  ;;  %v7868_v58 = vsub.s32 2, %v566_v54  ;;  %v7870_v59 = vsub.s32 0, %v566_v54 }
  0x2c   : > { %7314 = vrot.lane.b32.xlu0 %v7722_v20, %s7580_s25  ;;  %7324 = vrot.lane.b32.xlu1 %v7732_v24, %s7580_s25  ;;  %v7748_v28 = vpack.i.bf16 %v7736_v26, %v7734_v25  ;;  %v7758_v33 = vld [vmem:[%s445_s30 + $0x20] sm:$0xff]  ;;  %v7766_v35 = vpack.i.bf16 %v7752_v30, %v7750_v29  ;;  %v7768_v36 = vld [vmem:[%s445_s30 + $0x28] sm:$0xff]  ;;  %v7338_v38 = vpack.i.bf16 %v7756_v32, %v7754_v31  ;;  %vm674_vm2 = vmand %vm672_vm0, %vm673_vm1  ;;  %v7872_v60 = vsub.s32 7, %v566_v54  ;;  %s10141_s28 = smov (!%p487_p8, %s6499_s28), 1 }
  0x2d   : > { %v7760_v34 = vld [vmem:[%s445_s30 + $0x60] sm:$0xff]  ;;  %v7770_v37 = vld [vmem:[%s445_s30 + $0x68] sm:$0xff]  ;;  %v7864_v56 = vsel %vm674_vm2, 1, %v9759_v16  ;;  %v7887_v5 = vsub.s32 5, %v566_v54  ;;  %v7889_v6 = vsub.s32 6, %v566_v54  ;;  %vm561_vm3 = vcmp.ge.s32.totalorder %v560_v61, 0 }
  0x2e   : > { %v7343_v39 = vpack.i.bf16 %v7760_v34, %v7758_v33  ;;  %v7348_v40 = vpack.i.bf16 %v7770_v37, %v7768_v36  ;;  %v683_v63 = vrot.slane %v7864_v56, %v7861_v55  ;;  %v691_v0 = vrot.slane %v7864_v56, %v7866_v57 }
  0x2f   : > { %v687_v1 = vrot.slane %v7864_v56, %v7868_v58  ;;  %v679_v2 = vrot.slane %v7864_v56, %v7870_v59  ;;  %v707_v4 = vrot.slane %v7864_v56, %v7872_v60  ;;  %vm562_vm4 = vcmp.lt.s32.totalorder %v560_v61, 128 }
  0x30   : > { %7319 = vrot.lane.b32.xlu0 %v7742_v27, %s7580_s25  ;;  %7329 = vrot.lane.b32.xlu1 %v7748_v28, %s7580_s25  ;;  %vm9744_vm5 = vcmp.lt.s32.totalorder %v7875_v62, 2  ;;  %vm7892_vm6 = vcmp.eq.s32.totalorder %v683_v63, 1  ;;  %vm7896_vm7 = vcmp.eq.s32.totalorder %v691_v0, 1  ;;  %v7908_v12 = vsub.s32 4, %v566_v54  ;;  %vm563_vm12 = vmand %vm561_vm3, %vm562_vm4 }
  0x31   : > { %v9798_v8 = vsel %vm7892_vm6, 4294967295, %v9797_v8  ;;  %v9800_v9 = vsel %vm7896_vm7, 4294967295, %v9799_v9  ;;  %vm7900_vm8 = vcmp.eq.s32.totalorder %v687_v1, 1  ;;  %vm7904_vm9 = vcmp.eq.s32.totalorder %v679_v2, 1  ;;  %vm6900_vm13 = vmpackc.low %vm7896_vm7, %vm7896_vm7 }
  0x32   : > { %v9802_v10 = vsel %vm7900_vm8, 4294967295, %v9801_v10  ;;  %v9804_v11 = vsel %vm7904_vm9, 4294967295, %v9803_v11  ;;  %vm7912_vm10 = vcmp.eq.s32.totalorder %v707_v4, 1  ;;  %vm9745_vm11 = vcmask 130048   ;;  %vm6894_vm14 = vmpackc.low %vm7892_vm6, %vm7892_vm6 }
  0x33   : > { %9805 = vst [vmem:[#allocation3_spill] sm:$0xff] %v9804_v11  ;;  %v9807_v14 = vsel %vm7912_vm10, 4294967295, %v9806_v14  ;;  %v699_v15 = vrot.slane %v7864_v56, %v7887_v5  ;;  %v695_v63 = vrot.slane %v7864_v56, %v7908_v12  ;;  %v7935_v0 = vsel %vm563_vm12, 1, %v9759_v16  ;;  %vm6903_vm15 = vmpackc.low %vm7900_vm8, %vm7900_vm8 }
  0x34   : > { %7334 = vrot.lane.b32.xlu0 %v7766_v35, %s7580_s25  ;;  %7339 = vrot.lane.b32.xlu1 %v7338_v38, %s7580_s25  ;;  %9808 = vst [vmem:[#allocation4_spill] sm:$0xff] %v9807_v14  ;;  %vm9746_vm0 = vcmp.lt.s32.totalorder %v7875_v62, 3  ;;  %vm6897_vm2 = vmpackc.low %vm7904_vm9, %vm7904_vm9 }
  0x35   : > { %vm7957_vm1 = vcmp.eq.s32.totalorder %v699_v15, 1  ;;  %vm6912_vm4 = vmpackc.low %vm7912_vm10, %vm7912_vm10 }
  0x38   : > { %7344 = vrot.lane.b32.xlu0 %v7343_v39, %s7580_s25  ;;  %7349 = vrot.lane.b32.xlu1 %v7348_v40, %s7580_s25 }
  0x3c   : > { %7354 = vrot.lane.b32.xlu0 %v7722_v20, %s7582_s14  ;;  %7359 = vrot.lane.b32.xlu1 %v7742_v27, %s7582_s14 }
  0x40   : > { %7364 = vrot.lane.b32.xlu0 %v7732_v24, %s7582_s14  ;;  %7369 = vrot.lane.b32.xlu1 %v7748_v28, %s7582_s14 }
  0x44   : > { %7374 = vrot.lane.b32.xlu0 %v7766_v35, %s7582_s14  ;;  %7379 = vrot.lane.b32.xlu1 %v7338_v38, %s7582_s14 }
  0x48   : > { %7384 = vrot.lane.b32.xlu0 %v7343_v39, %s7582_s14  ;;  %7389 = vrot.lane.b32.xlu1 %v7348_v40, %s7582_s14  ;;  %s6733_s14 = sshll.u32 %s10141_s28, 4 }
  0x49   : > { %s491_s20 = scalar_lea.vmem %s9743_s13, %s6733_s14 }
  0x4c   : > { %7394 = vrot.lane.b32.xlu0 %v7722_v20, %s7583_s16  ;;  %7399 = vrot.lane.b32.xlu1 %v7742_v27, %s7583_s16 }
  0x50   : > { %7404 = vrot.lane.b32.xlu0 %v7732_v24, %s7583_s16  ;;  %7409 = vrot.lane.b32.xlu1 %v7748_v28, %s7583_s16 }
  0x54   : > { %7414 = vrot.lane.b32.xlu0 %v7766_v35, %s7583_s16  ;;  %7419 = vrot.lane.b32.xlu1 %v7338_v38, %s7583_s16 }
  0x58   : > { %7424 = vrot.lane.b32.xlu0 %v7343_v39, %s7583_s16  ;;  %7429 = vrot.lane.b32.xlu1 %v7348_v40, %s7583_s16 }
  0x5c   : > { %7434 = vrot.lane.b32.xlu0 %v7742_v27, %s7584_s17  ;;  %7439 = vrot.lane.b32.xlu1 %v7343_v39, %s7584_s17 }
  0x60   : > { %7444 = vrot.lane.b32.xlu0 %v7748_v28, %s7584_s17  ;;  %7449 = vrot.lane.b32.xlu1 %v7722_v20, %s7584_s17 }
  0x64   : > { %7454 = vrot.lane.b32.xlu0 %v7732_v24, %s7584_s17  ;;  %7459 = vrot.lane.b32.xlu1 %v7766_v35, %s7584_s17 }
  0x68   : > { %7464 = vrot.lane.b32.xlu0 %v7348_v40, %s7584_s17  ;;  %7469 = vrot.lane.b32.xlu1 %v7338_v38, %s7584_s17 }
  0x6c   : > { %7474 = vrot.lane.b32.xlu0 %v7742_v27, %s7585_s18  ;;  %7479 = vrot.lane.b32.xlu1 %v7343_v39, %s7585_s18 }
  0x70   : > { %7484 = vrot.lane.b32.xlu0 %v7748_v28, %s7585_s18  ;;  %7489 = vrot.lane.b32.xlu1 %v7722_v20, %s7585_s18 }
  0x74   : > { %7494 = vrot.lane.b32.xlu0 %v7732_v24, %s7585_s18  ;;  %7499 = vrot.lane.b32.xlu1 %v7766_v35, %s7585_s18 }
  0x78   : > { %7504 = vrot.lane.b32.xlu0 %v7348_v40, %s7585_s18  ;;  %7509 = vrot.lane.b32.xlu1 %v7338_v38, %s7585_s18 }
  0x7c   : > { %7514 = vrot.lane.b32.xlu0 %v7742_v27, %s7586_s19  ;;  %7519 = vrot.lane.b32.xlu1 %v7343_v39, %s7586_s19 }
  0x80   : > { %7524 = vrot.lane.b32.xlu0 %v7748_v28, %s7586_s19  ;;  %7529 = vrot.lane.b32.xlu1 %v7722_v20, %s7586_s19  ;;  %v703_v20 = vrot.slane %v7864_v56, %v7889_v6 }
  0x82   : > { %vm7968_vm3 = vcmp.eq.s32.totalorder %v703_v20, 1  ;;  %v7984_v20 = vld [vmem:[%s9733_s3 + $0x8] sm:$0xff] }
  0x84   : > { %7534 = vrot.lane.b32.xlu0 %v7732_v24, %s7586_s19  ;;  %7539 = vrot.lane.b32.xlu1 %v7766_v35, %s7586_s19  ;;  %v7921_v24 = vadd.s32 4294967295, %v7858_v51 }
  0x86   : > { %vm1359_vm12 = vcmp.ge.s32.totalorder %v7921_v24, 0 }
  0x88   : > { %7544 = vrot.lane.b32.xlu0 %v7348_v40, %s7586_s19  ;;  %7549 = vrot.lane.b32.xlu1 %v7338_v38, %s7586_s19 }
  0x8c   : > { %3237 = vperm.xlu0 %7553, %v3234_v50  }
  0x9e   : > { %v7315_v3 = vpop.permute.xlu0 %7314  ;;  %v7325_v7 = vpop.permute.xlu1 %7324 }
  0x9f   : > { %v7317_v27 = vunpack.i.h.bf16 %v7315_v3  ;;  %v7316_v28 = vunpack.i.l.bf16 %v7315_v3  ;;  %v7327_v40 = vunpack.i.h.bf16 %v7325_v7  ;;  %v7326_v50 = vunpack.i.l.bf16 %v7325_v7 }
  0xa2   : > { %v7910_v13 = vpop.permute.xlu0 %7319  ;;  %v7330_v39 = vpop.permute.xlu1 %7329 }
  0xa3   : > { %v7322_v35 = vunpack.i.h.bf16 %v7910_v13  ;;  %v7321_v38 = vunpack.i.l.bf16 %v7910_v13  ;;  %v7332_v52 = vunpack.i.h.bf16 %v7330_v39  ;;  %v7331_v53 = vunpack.i.l.bf16 %v7330_v39 }
  0xa5   : > { %v663_v54 = vsel %vm9744_vm5, %v7316_v28, %v7321_v38  ;;  %v664_v61 = vsel %vm9744_vm5, %v7317_v27, %v7322_v35  ;;  %v667_v2 = vsel %vm9744_vm5, %v7326_v50, %v7331_v53  ;;  %v668_v3 = vsel %vm9744_vm5, %v7327_v40, %v7332_v52 }
  0xa6   : > { %v7335_v1 = vpop.permute.xlu0 %7334  ;;  %v6899_v4 = vpack.c.bf16 %v664_v61, %v663_v54  ;;  %v665_v7 = vsel %vm9744_vm5, %v7331_v53, %v7316_v28  ;;  %v7340_v39 = vpop.permute.xlu1 %7339  ;;  %v6893_v49 = vpack.c.bf16 %v668_v3, %v667_v2  ;;  %v666_v48 = vsel %vm9744_vm5, %v7332_v52, %v7317_v27 }
  0xa7   : > { %v7337_v13 = vunpack.i.h.bf16 %v7335_v1  ;;  %v7336_v56 = vunpack.i.l.bf16 %v7335_v1  ;;  %v7342_v47 = vunpack.i.h.bf16 %v7340_v39  ;;  %v7341_v46 = vunpack.i.l.bf16 %v7340_v39 }
  0xa8   : > { %6901 = vmatprep.subr.msk.bf16.mxu1 %vm6900_vm13, %v6899_v4  ;;  %v6902_v28 = vpack.c.bf16 %v666_v48, %v665_v7  ;;  %v9809_v53 = vmov 0  ;;  %6895 = vmatprep.subr.msk.bf16.mxu0 %vm6894_vm14, %v6893_v49  ;;  %v9812_v54 = vmov 0  ;;  %v580_v48 = vrot.slane %v7935_v0, %v7866_v57 }
  0xa9   : > { %v9810_v53 = vsel %vm7957_vm1, 4294967295, %v9809_v53  ;;  %v669_v27 = vsel %vm9744_vm5, %v7336_v56, %v7326_v50  ;;  %v670_v52 = vsel %vm9744_vm5, %v7337_v13, %v7327_v40  ;;  %v9813_v54 = vsel %vm7968_vm3, 4294967295, %v9812_v54 }
  0xaa   : > { %9811 = vst [vmem:[#allocation5_spill] sm:$0xff] %v9810_v53  ;;  %9814 = vst [vmem:[#allocation6_spill] sm:$0xff] %v9813_v54  ;;  %v656_v49 = vsel %vm9744_vm5, %v7342_v47, %v7337_v13  ;;  %v655_v15 = vsel %vm9744_vm5, %v7341_v46, %v7336_v56  ;;  %6904 = vmatpush1.bf16.msk.msra.mxu1 %vm6903_vm15, %v6902_v28  ;;  %v7345_v50 = vpop.permute.xlu0 %7344  ;;  %v6896_v40 = vpack.c.bf16 %v670_v52, %v669_v27  ;;  %v7350_v2 = vpop.permute.xlu1 %7349  ;;  %v9815_v4 = vmov 0 }
  0xab   : > { %v7347_v61 = vunpack.i.h.bf16 %v7345_v50  ;;  %v7346_v1 = vunpack.i.l.bf16 %v7345_v50  ;;  %v6911_v3 = vpack.c.bf16 %v656_v49, %v655_v15  ;;  %vm7987_vm13 = vcmp.eq.s32.totalorder %v695_v63, 1 }
  0xac   : > { %v9816_v4 = vsel %vm7987_vm13, 4294967295, %v9815_v4  ;;  %v7352_v7 = vunpack.i.h.bf16 %v7350_v2  ;;  %v7351_v13 = vunpack.i.l.bf16 %v7350_v2  ;;  %6898 = vmatpush1.bf16.msk.msra.mxu0 %vm6897_vm2, %v6896_v40  ;;  %v572_v56 = vrot.slane %v7935_v0, %v7861_v55  ;;  %vm6915_vm2 = vmpackc.low %vm7968_vm3, %vm7968_vm3 }
  0xad   : > { %9817 = vst [vmem:[#allocation7_spill] sm:$0xff] %v9816_v4  ;;  %vm1360_vm14 = vcmp.lt.s32.totalorder %v7921_v24, 128  ;;  %v661_v39 = vsel %vm9744_vm5, %v7321_v38, %v7346_v1  ;;  %v662_v63 = vsel %vm9744_vm5, %v7322_v35, %v7347_v61  ;;  %6913 = vmatprep.subr.msk.bf16.mxu1 %vm6912_vm4, %v6911_v3  ;;  %6520 = vmatmul.mubr.msk.f32.vlgmr.msra.gmra.mrb[0].mxu1 %vm9745_vm11, %v7984_v20  ;;  %vm8005_vm15 = vcmp.eq.s32.totalorder %v580_v48, 1  ;;  %vm6906_vm4 = vmpackc.low %vm7957_vm1, %vm7957_vm1 }
  0xae   : > { %v576_v27 = vrot.slane %v7935_v0, %v7868_v58  ;;  %v6908_v52 = vpack.c.bf16 %v662_v63, %v661_v39  ;;  %v660_v49 = vsel %vm9744_vm5, %v7347_v61, %v7352_v7  ;;  %v657_v38 = vsel %vm9744_vm5, %v7351_v13, %v7341_v46  ;;  %v7355_v15 = vpop.permute.xlu0 %7354  ;;  %1015 = vmatprep.mubr.f32.mxu1 %v9757_v41  ;;  %v8023_v61 = vpop.permute.xlu1 %7359 }
  0xaf   : > { %v658_v35 = vsel %vm9744_vm5, %v7352_v7, %v7342_v47  ;;  %v659_v48 = vsel %vm9744_vm5, %v7346_v1, %v7351_v13  ;;  %v7357_v40 = vunpack.i.h.bf16 %v7355_v15  ;;  %v7356_v2 = vunpack.i.l.bf16 %v7355_v15  ;;  %6515 = vmatmul.mubr.msk.f32.vlgmr.msra.gmra.mrb[0].mxu0 %vm9745_vm11, %v7984_v20  ;;  %vm6909_vm5 = vmpackc.low %vm7987_vm13, %vm7987_vm13 }
  0xb0   : > { %v6914_v50 = vpack.c.bf16 %v658_v35, %v657_v38  ;;  %v6905_v46 = vpack.c.bf16 %v660_v49, %v659_v48  ;;  %v7362_v47 = vunpack.i.h.bf16 %v8023_v61  ;;  %v7361_v3 = vunpack.i.l.bf16 %v8023_v61  ;;  %944 = vmatprep.mubr.f32.mxu0 %v9757_v41  ;;  %vm8044_vm11 = vmand %vm1359_vm12, %vm1360_vm14 }
  0xb1   : > { %v568_v1 = vrot.slane %v7935_v0, %v7870_v59  ;;  %v596_v7 = vrot.slane %v7935_v0, %v7872_v60  ;;  %vm8059_vm12 = vcmp.eq.s32.totalorder %v572_v56, 1  ;;  %vm8063_vm14 = vcmp.eq.s32.totalorder %v576_v27, 1 }
  0xb2   : > { %6916 = vmatpush1.bf16.msk.msra.mxu1 %vm6915_vm2, %v6914_v50  ;;  %v553_v39 = vsel %vm9746_vm0, %v7357_v40, %v7362_v47  ;;  %v552_v63 = vsel %vm9746_vm0, %v7356_v2, %v7361_v3  ;;  %6907 = vmatprep.subr.msk.bf16.mxu0 %vm6906_vm4, %v6905_v46  ;;  %v7365_v49 = vpop.permute.xlu0 %7364  ;;  %vm6924_vm2 = vmpackc.low %vm8005_vm15, %vm8005_vm15  ;;  %v7370_v48 = vpop.permute.xlu1 %7369  ;;  %vm9826_vm4 = vcmask 130048   ;;  %v588_v56 = vrot.slane %v7935_v0, %v7887_v5 }
  0xb3   : > { %v6923_v38 = vpack.c.bf16 %v553_v39, %v552_v63  ;;  %6910 = vmatpush1.bf16.msk.msra.mxu0 %vm6909_vm5, %v6908_v52  ;;  %v7367_v35 = vunpack.i.h.bf16 %v7365_v49  ;;  %v7366_v15 = vunpack.i.l.bf16 %v7365_v49  ;;  %v7372_v45 = vunpack.i.h.bf16 %v7370_v48  ;;  %vm6927_vm3 = vmpackc.low %vm8063_vm14, %vm8063_vm14 }
  0xb4   : > { %v7371_v46 = vunpack.i.l.bf16 %v7370_v48  ;;  %v592_v28 = vrot.slane %v7935_v0, %v7889_v6  ;;  %vm8076_vm15 = vcmp.eq.s32.totalorder %v568_v1, 1  ;;  %vm8080_vm0 = vcmp.eq.s32.totalorder %v596_v7, 1  ;;  %vm9837_vm14 = vmpackc.low %vm8059_vm12, %vm8059_vm12 }
  0xb5   : > { %6530 = vmatmul.mubr.msk.f32.vlgmr.msra.gmra.mrb[2].mxu1 %vm9826_vm4, %v7984_v20  ;;  %6925 = vmatprep.subr.msk.bf16.mxu1 %vm6924_vm2, %v6923_v38  ;;  %v584_v39 = vrot.slane %v7935_v0, %v7908_v12  ;;  %v8090_v63 = vsel %vm8044_vm11, 1, %v9759_v16  ;;  %vm9831_vm2 = vcmp.lt.s32.totalorder %v7875_v62, 3  ;;  %vm9835_vm11 = vcmask 130048  }
  0xb6   : > { %1160 = vmatprep.mubr.f32.mxu1 %v9757_v41  ;;  %v555_v1 = vsel %vm9831_vm2, %v7372_v45, %v7357_v40  ;;  %vm9832_vm4 = vmmov %vm9831_vm2  ;;  %v7375_v48 = vpop.permute.xlu0 %7374  ;;  %6525 = vmatmul.mubr.msk.f32.vlgmr.msra.gmra.mrb[2].mxu0 %vm9835_vm11, %v7984_v20  ;;  %v7380_v43 = vpop.permute.xlu1 %7379  ;;  %vm8124_vm11 = vcmp.eq.s32.totalorder %v588_v56, 1  ;;  %v1366_v20 = vrot.slane %v8090_v63, %v7870_v59 }
  0xb7   : > { %v557_v49 = vsel %vm9832_vm4, %v7367_v35, %v7372_v45  ;;  %vm9833_vm5 = vmmov %vm9831_vm2  ;;  %v7377_v40 = vunpack.i.h.bf16 %v7375_v48  ;;  %v7376_v44 = vunpack.i.l.bf16 %v7375_v48  ;;  %1089 = vmatprep.mubr.f32.mxu0 %v9757_v41  ;;  %v7382_v45 = vunpack.i.h.bf16 %v7380_v43 }
  0xb8   : > { %v554_v7 = vsel %vm9833_vm5, %v7371_v46, %v7356_v2  ;;  %vm9834_vm13 = vmmov %vm9831_vm2  ;;  %vm9749_vm5 = vcmp.lt.s32.totalorder %v7875_v62, 1  ;;  %v7381_v2 = vunpack.i.l.bf16 %v7380_v43  ;;  %v8122_v43 = vld [vmem:[%s9733_s3] sm:$0xff] }
  0xb9   : > { %v556_v38 = vsel %vm9834_vm13, %v7366_v15, %v7371_v46  ;;  %v6926_v13 = vpack.c.bf16 %v555_v1, %v554_v7  ;;  %vm9836_vm13 = vmmov %vm9831_vm2  ;;  %v559_v50 = vsel %vm9831_vm2, %v7377_v40, %v7367_v35  ;;  %v1378_v35 = vrot.slane %v8090_v63, %v7866_v57 }
  0xba   : > { %v6917_v0 = vpack.c.bf16 %v557_v49, %v556_v38  ;;  %v558_v46 = vsel %vm9836_vm13, %v7376_v44, %v7366_v15  ;;  %vm6921_vm4 = vmpackc.low %vm8076_vm15, %vm8076_vm15  ;;  %v7385_v49 = vpop.permute.xlu0 %7384 }
  0xbb   : > { %6928 = vmatpush1.bf16.msk.msra.mxu1 %vm6927_vm3, %v6926_v13  ;;  %v6920_v24 = vpack.c.bf16 %v559_v50, %v558_v46  ;;  %vm9840_vm12 = vmmov %vm9831_vm2  ;;  %v7387_v38 = vunpack.i.h.bf16 %v7385_v49  ;;  %v7386_v48 = vunpack.i.l.bf16 %v7385_v49  ;;  %vm8164_vm15 = vcmp.eq.s32.totalorder %v1378_v35, 1 }
  0xbc   : > { %6919 = vmatprep.subr.msk.bf16.mxu0 %vm9837_vm14, %v6917_v0  ;;  %v545_v15 = vsel %vm9840_vm12, %v7382_v45, %v7377_v40  ;;  %vm9841_vm3 = vmmov %vm9831_vm2  ;;  %vm8137_vm2 = vcmp.eq.s32.totalorder %v592_v28, 1  ;;  %v7390_v0 = vpop.permute.xlu1 %7389  ;;  %vm8141_vm14 = vcmp.eq.s32.totalorder %v584_v39, 1  ;;  %v1374_v28 = vrot.slane %v8090_v63, %v7868_v58 }
  0xbd   : > { %v544_v1 = vsel %vm9841_vm3, %v7381_v2, %v7376_v44  ;;  %vm6936_vm13 = vmpackc.low %vm8080_vm0, %vm8080_vm0  ;;  %v7392_v40 = vunpack.i.h.bf16 %v7390_v0  ;;  %v7391_v46 = vunpack.i.l.bf16 %v7390_v0  ;;  %6922 = vmatpush1.bf16.msk.msra.mxu0 %vm6921_vm4, %v6920_v24  ;;  %vm9846_vm0 = vcmask 130048  }
  0xbe   : > { %v6935_v7 = vpack.c.bf16 %v545_v15, %v544_v1  ;;  %6540 = vmatmul.mubr.msk.f32.vlgmr.msra.gmra.mrb[0].mxu1 %vm9846_vm0, %v8122_v43  ;;  %v1370_v44 = vrot.slane %v8090_v63, %v7861_v55  ;;  %vm9847_vm12 = vmmov %vm9841_vm3  ;;  %v551_v27 = vsel %vm9841_vm3, %v7362_v47, %v7387_v38  ;;  %v2062_v50 = vadd.s32 1, %v7858_v51  ;;  %v7395_v47 = vpop.permute.xlu0 %7394 }
  0xbf   : > { %v550_v52 = vsel %vm9847_vm12, %v7361_v3, %v7386_v48  ;;  %1302 = vmatprep.mubr.f32.mxu1 %v9757_v41  ;;  %vm9850_vm4 = vmmov %vm9841_vm3  ;;  %v7397_v49 = vunpack.i.h.bf16 %v7395_v47 }
  0xc0   : > { %6937 = vmatprep.subr.msk.bf16.mxu1 %vm6936_vm13, %v6935_v7  ;;  %v6932_v24 = vpack.c.bf16 %v551_v27, %v550_v52  ;;  %v549_v15 = vsel %vm9850_vm4, %v7387_v38, %v7392_v40  ;;  %vm9851_vm0 = vmmov %vm9841_vm3  ;;  %v7396_v7 = vunpack.i.l.bf16 %v7395_v47  ;;  %v8181_v0 = vpop.permute.xlu1 %7399  ;;  %vm9869_vm1 = vcmp.lt.s32.totalorder %v2062_v50, 128 }
  0xc1   : > { %v546_v3 = vsel %vm9851_vm0, %v7391_v46, %v7381_v2  ;;  %vm9852_vm12 = vmmov %vm9851_vm0  ;;  %v9753_v2 = vunpack.i.h.bf16 %v8181_v0  ;;  %v7401_v56 = vunpack.i.l.bf16 %v8181_v0  ;;  %vm9870_vm10 = vcmp.ge.s32.totalorder %v2062_v50, 0 }
  0xc2   : > { %v547_v61 = vsel %vm9852_vm12, %v7392_v40, %v7382_v45  ;;  %vm6939_vm13 = vmpackc.low %vm8137_vm2, %vm8137_vm2  ;;  %vm8194_vm12 = vcmp.eq.s32.totalorder %v1370_v44, 1  ;;  %v9857_v44 = vmov 0 }
  0xc3   : > { %vm9853_vm3 = vmmov %vm9851_vm0  ;;  %v6938_v1 = vpack.c.bf16 %v547_v61, %v546_v3  ;;  %vm9854_vm0 = vcmask 130048   ;;  %v1351_v13 = vsel %vm9749_vm5, %v7397_v49, %v9753_v2  ;;  %v1350_v40 = vsel %vm9749_vm5, %v7396_v7, %v7401_v56 }
  0xc4   : > { %v548_v35 = vsel %vm9853_vm3, %v7386_v48, %v7391_v46  ;;  %vm6930_vm4 = vmpackc.low %vm8124_vm11, %vm8124_vm11  ;;  %6535 = vmatmul.mubr.msk.f32.vlgmr.msra.gmra.mrb[0].mxu0 %vm9854_vm0, %v8122_v43  ;;  %v1394_v48 = vrot.slane %v8090_v63, %v7872_v60  ;;  %v7405_v46 = vpop.permute.xlu0 %7404  ;;  %v6947_v52 = vpack.c.bf16 %v1351_v13, %v1350_v40  ;;  %v7410_v3 = vpop.permute.xlu1 %7409  ;;  %vm8225_vm5 = vcmp.eq.s32.totalorder %v1366_v20, 1 }
  0xc5   : > { %v6929_v45 = vpack.c.bf16 %v549_v15, %v548_v35  ;;  %vm6933_vm2 = vmpackc.low %vm8141_vm14, %vm8141_vm14  ;;  %1231 = vmatprep.mubr.f32.mxu0 %v9757_v41  ;;  %6940 = vmatpush1.bf16.msk.msra.mxu1 %vm6939_vm13, %v6938_v1  ;;  %vm8213_vm14 = vcmp.eq.s32.totalorder %v1374_v28, 1  ;;  %v7407_v27 = vunpack.i.h.bf16 %v7405_v46  ;;  %v7406_v15 = vunpack.i.l.bf16 %v7405_v46 }
  0xc6   : > { %vm6948_vm11 = vmpackc.low %vm8164_vm15, %vm8164_vm15  ;;  %v9858_v44 = vsel %vm8213_vm14, 4294967295, %v9857_v44  ;;  %v7412_v61 = vunpack.i.h.bf16 %v7410_v3  ;;  %v7411_v47 = vunpack.i.l.bf16 %v7410_v3  ;;  %v9860_v28 = vmov 0 }
  0xc7   : > { %6931 = vmatprep.subr.msk.bf16.mxu0 %vm6930_vm4, %v6929_v45  ;;  %vm9859_vm4 = vmmov %vm9854_vm0  ;;  %6949 = vmatprep.subr.msk.bf16.mxu1 %vm6948_vm11, %v6947_v52  ;;  %v9861_v28 = vsel %vm8225_vm5, 4294967295, %v9860_v28  ;;  %v1386_v35 = vrot.slane %v8090_v63, %v7887_v5  ;;  %v1390_v1 = vrot.slane %v8090_v63, %v7889_v6  ;;  %vm9864_vm11 = vcmp.lt.s32.totalorder %v7875_v62, 1 }
  0xc8   : > { %6934 = vmatpush1.bf16.msk.msra.mxu0 %vm6933_vm2, %v6932_v24  ;;  %6550 = vmatmul.mubr.msk.f32.vlgmr.msra.gmra.mrb[2].mxu1 %vm9859_vm4, %v8122_v43  ;;  %vm8229_vm2 = vcmp.eq.s32.totalorder %v1394_v48, 1  ;;  %v9862_v24 = vmov 0  ;;  %v1353_v45 = vsel %vm9864_vm11, %v7412_v61, %v7397_v49  ;;  %vm9865_vm4 = vmmov %vm9864_vm11  ;;  %v7415_v40 = vpop.permute.xlu0 %7414  ;;  %vm9868_vm3 = vcmask 130048   ;;  %v7420_v42 = vpop.permute.xlu1 %7419 }
  0xc9   : > { %v9863_v24 = vsel %vm8229_vm2, 4294967295, %v9862_v24  ;;  %1559 = vmatprep.mubr.f32.mxu1 %v9757_v41  ;;  %v1355_v20 = vsel %vm9865_vm4, %v7407_v27, %v7412_v61  ;;  %vm9866_vm13 = vmmov %vm9865_vm4  ;;  %v7417_v3 = vunpack.i.h.bf16 %v7415_v40  ;;  %v7416_v61 = vunpack.i.l.bf16 %v7415_v40 }
  0xca   : > { %v1352_v48 = vsel %vm9866_vm13, %v7411_v47, %v7396_v7  ;;  %vm9867_vm0 = vmmov %vm9865_vm4  ;;  %v7422_v7 = vunpack.i.h.bf16 %v7420_v42  ;;  %v7421_v2 = vunpack.i.l.bf16 %v7420_v42  ;;  %v8277_v42 = vld [vmem:[%s9733_s3 + $0x10] sm:$0xff] }
  0xcb   : > { %v1354_v13 = vsel %vm9867_vm0, %v7406_v15, %v7411_v47  ;;  %6545 = vmatmul.mubr.msk.f32.vlgmr.msra.gmra.mrb[2].mxu0 %vm9868_vm3, %v8122_v43  ;;  %vm8250_vm9 = vmand %vm9870_vm10, %vm9869_vm1  ;;  %v6950_v52 = vpack.c.bf16 %v1353_v45, %v1352_v48  ;;  %v1382_v47 = vrot.slane %v8090_v63, %v7908_v12 }
  0xcc   : > { %v6941_v49 = vpack.c.bf16 %v1355_v20, %v1354_v13  ;;  %1488 = vmatprep.mubr.f32.mxu0 %v9757_v41  ;;  %vm9873_vm13 = vmmov %vm9867_vm0  ;;  %v8282_v63 = vsel %vm8250_vm9, 1, %v9759_v16  ;;  %v1342_v20 = vsel %vm9865_vm4, %v7421_v2, %v7416_v61  ;;  %v7425_v48 = vpop.permute.xlu0 %7424  ;;  %v9878_v13 = vmov 0 }
  0xcd   : > { %v1356_v43 = vsel %vm9873_vm13, %v7416_v61, %v7406_v15  ;;  %vm9874_vm10 = vmmov %vm9867_vm0  ;;  %v7427_v46 = vunpack.i.h.bf16 %v7425_v48  ;;  %vm8296_vm9 = vcmp.eq.s32.totalorder %v1390_v1, 1  ;;  %v2082_v1 = vrot.slane %v8282_v63, %v7866_v57 }
  0xce   : > { %v1357_v50 = vsel %vm9874_vm10, %v7417_v3, %v7407_v27  ;;  %vm9875_vm1 = vmpackc.low %vm8194_vm12, %vm8194_vm12  ;;  %v2469_v27 = vadd.s32 2, %v7858_v51  ;;  %vm8292_vm10 = vcmp.eq.s32.totalorder %v1386_v35, 1  ;;  %v9883_v35 = vmov 0 }
  0xcf   : > { %6943 = vmatprep.subr.msk.bf16.mxu0 %vm9875_vm1, %v6941_v49  ;;  %vm9876_vm3 = vmpackc.low %vm8213_vm14, %vm8213_vm14  ;;  %v6944_v15 = vpack.c.bf16 %v1357_v50, %v1356_v43  ;;  %v9879_v13 = vsel %vm8292_vm10, 4294967295, %v9878_v13  ;;  %v7426_v49 = vunpack.i.l.bf16 %v7425_v48  ;;  %v9880_v43 = vmov 0 }
  0xd0   : > { %6952 = vmatpush1.bf16.msk.msra.mxu1 %vm9876_vm3, %v6950_v52  ;;  %vm6945_vm0 = vmpackc.low %vm8225_vm5, %vm8225_vm5  ;;  %v7430_v52 = vpop.permute.xlu1 %7429  ;;  %v9881_v43 = vsel %vm8296_vm9, 4294967295, %v9880_v43  ;;  %vm9882_vm1 = vcmask 130048   ;;  %vm8307_vm3 = vcmp.eq.s32.totalorder %v1382_v47, 1  ;;  %vm2471_vm8 = vcmp.lt.s32.totalorder %v2469_v27, 128 }
  0xd1   : > { %vm9877_vm11 = vmmov %vm9865_vm4  ;;  %v7431_v50 = vunpack.i.l.bf16 %v7430_v52  ;;  %6946 = vmatpush1.bf16.msk.msra.mxu0 %vm6945_vm0, %v6944_v15  ;;  %v9884_v35 = vsel %vm8307_vm3, 4294967295, %v9883_v35  ;;  %v2074_v48 = vrot.slane %v8282_v63, %v7861_v55 }
  0xd2   : > { %v1343_v45 = vsel %vm9877_vm11, %v7422_v7, %v7417_v3  ;;  %vm6960_vm13 = vmpackc.low %vm8229_vm2, %vm8229_vm2  ;;  %v7432_v3 = vunpack.i.h.bf16 %v7430_v52 }
  0xd3   : > { %v6959_v40 = vpack.c.bf16 %v1343_v45, %v1342_v20  ;;  %6561 = vmatmul.mubr.msk.f32.vlgmr.msra.gmra.mrb[0].mxu1 %vm9882_vm1, %v8277_v42  ;;  %vm9885_vm11 = vmmov %vm9865_vm4  ;;  %v9886_v45 = vunpack.i.h.bf16 %v8181_v0  ;;  %vm2470_vm1 = vcmp.ge.s32.totalorder %v2469_v27, 0  ;;  %v8331_v20 = vpop.permute.xlu0 %7434  ;;  %v1346_v52 = vsel %vm9865_vm4, %v7426_v49, %v7431_v50 }
  0xd4   : > { %v1348_v61 = vsel %vm9885_vm11, %v7401_v56, %v7426_v49  ;;  %vm6954_vm0 = vmpackc.low %vm8292_vm10, %vm8292_vm10  ;;  %1701 = vmatprep.mubr.f32.mxu1 %v9757_v41  ;;  %v2098_v49 = vrot.slane %v8282_v63, %v7872_v60 }
  0xd5   : > { %v1349_v15 = vsel %vm9865_vm4, %v9886_v45, %v7427_v46  ;;  %6961 = vmatprep.subr.msk.bf16.mxu1 %vm6960_vm13, %v6959_v40  ;;  %vm9887_vm6 = vmmov %vm9865_vm4  ;;  %v8340_v45 = vpop.permute.xlu1 %7439 }
  0xd6   : > { %v1347_v47 = vsel %vm9887_vm6, %v7427_v46, %v7432_v3  ;;  %vm9888_vm7 = vmmov %vm9865_vm4  ;;  %v6956_v40 = vpack.c.bf16 %v1349_v15, %v1348_v61  ;;  %vm9890_vm6 = vcmask 130048   ;;  %v7437_v15 = vunpack.i.h.bf16 %v8331_v20 }
  0xd7   : > { %v1344_v56 = vsel %vm9888_vm7, %v7431_v50, %v7421_v2  ;;  %vm9889_vm11 = vmmov %vm9865_vm4  ;;  %6556 = vmatmul.mubr.msk.f32.vlgmr.msra.gmra.mrb[0].mxu0 %vm9890_vm6, %v8277_v42  ;;  %v2078_v2 = vrot.slane %v8282_v63, %v7868_v58  ;;  %v2090_v50 = vrot.slane %v8282_v63, %v7887_v5  ;;  %vm9760_vm4 = vcmp.lt.s32.totalorder %v7875_v62, 127  ;;  %v7445_v27 = vpop.permute.xlu0 %7444 }
  0xd8   : > { %v1345_v0 = vsel %vm9889_vm11, %v7432_v3, %v7422_v7  ;;  %vm6963_vm13 = vmpackc.low %vm8296_vm9, %vm8296_vm9  ;;  %v6953_v7 = vpack.c.bf16 %v1347_v47, %v1346_v52  ;;  %1630 = vmatprep.mubr.f32.mxu0 %v9757_v41  ;;  %v2070_v3 = vrot.slane %v8282_v63, %v7870_v59  ;;  %v7436_v47 = vunpack.i.l.bf16 %v8331_v20 }
  0xd9   : > { %v6962_v46 = vpack.c.bf16 %v1345_v0, %v1344_v56  ;;  %vm6957_vm7 = vmpackc.low %vm8307_vm3, %vm8307_vm3  ;;  %v9765_v56 = vunpack.i.h.bf16 %v8340_v45  ;;  %v9893_v20 = vpack.c.bf16 %v7728_v23, %v7726_v22  ;;  %v9894_v52 = vmov 0  ;;  %v7450_v23 = vpop.permute.xlu1 %7449 }
  0xda   : > { %vm8358_vm11 = vmand %vm2470_vm1, %vm2471_vm8  ;;  %6955 = vmatprep.subr.msk.bf16.mxu0 %vm6954_vm0, %v6953_v7  ;;  %vm8380_vm8 = vcmp.eq.s32.totalorder %v2082_v1, 1  ;;  %vm8384_vm1 = vcmp.eq.s32.totalorder %v2074_v48, 1  ;;  %v9896_v41 = vmov 0  ;;  %v7447_v7 = vunpack.i.h.bf16 %v7445_v27 }
  0xdb   : > { %6964 = vmatpush1.bf16.msk.msra.mxu1 %vm6963_vm13, %v6962_v46  ;;  %v9895_v52 = vsel %vm8380_vm8, 4294967295, %v9894_v52  ;;  %v9897_v41 = vsel %vm8384_vm1, 4294967295, %v9896_v41  ;;  %v2094_v46 = vrot.slane %v8282_v63, %v7889_v6  ;;  %6958 = vmatpush1.bf16.msk.msra.mxu0 %vm6957_vm7, %v6956_v40  ;;  %v7446_v22 = vunpack.i.l.bf16 %v7445_v27  ;;  %vm9900_vm13 = vmmov %vm9890_vm6  ;;  %v5851_v27 = vld [vmem:[%s9732_s2 + $0x80] sm:$0xff] }
  0xdc   : > { %6970 = vmatprep.subr.bf16.mxu1 %v9893_v20  ;;  %vm8395_vm0 = vcmp.eq.s32.totalorder %v2078_v2, 1  ;;  %v8402_v48 = vsel %vm8358_vm11, 1, %v9759_v16  ;;  %v7452_v20 = vunpack.i.h.bf16 %v7450_v23  ;;  %v7451_v0 = vunpack.i.l.bf16 %v7450_v23  ;;  %vm6988_vm3 = vmpackc.low %vm8380_vm8, %vm8380_vm8  ;;  %v5869_v2 = vld [vmem:[%s9732_s2 + $0x110] sm:$0xff] }
  0xdd   : > { %v9901_v40 = vpack.c.bf16 %v7736_v26, %v7734_v25  ;;  %vm8409_vm6 = vcmp.eq.s32.totalorder %v2070_v3, 1  ;;  %vm8413_vm7 = vcmp.eq.s32.totalorder %v2098_v49, 1  ;;  %v2053_v61 = vsel %vm9760_vm4, %v7437_v15, %v9765_v56  ;;  %v8432_v3 = vld [vmem:[%s9733_s3 + $0x18] sm:$0xff]  ;;  %v7460_v54 = vpop.permute.xlu1 %7459 }
  0xde   : > { %6571 = vmatmul.mubr.msk.f32.vlgmr.msra.gmra.mrb[2].mxu1 %vm9900_vm13, %v8277_v42  ;;  %v9906_v23 = vunpack.i.l.bf16 %v8340_v45  ;;  %v9907_v25 = vpack.c.bf16 %v7716_v18, %v7714_v17  ;;  %v9908_v26 = vmov 0.0   ;;  %vm8434_vm11 = vcmp.eq.s32.totalorder %v2090_v50, 1  ;;  %6566 = vmatmul.mubr.msk.f32.vlgmr.msra.gmra.mrb[2].mxu0 %vm9900_vm13, %v8277_v42 }
  0xdf   : > { %6966 = vmatprep.subr.bf16.mxu0 %v9901_v40  ;;  %1856 = vmatprep.mubr.f32.mxu1 %v9908_v26  ;;  %v9909_v49 = vmov 0  ;;  %v2086_v40 = vrot.slane %v8282_v63, %v7908_v12  ;;  %v9911_v17 = vmov 0  ;;  %v2489_v18 = vrot.slane %v8402_v48, %v7866_v57 }
  0xe0   : > { %v2052_v16 = vsel %vm9760_vm4, %v7436_v47, %v9906_v23  ;;  %6972 = vmatpush1.bf16.msra.mxu1 %v9907_v25  ;;  %v9910_v49 = vsel %vm8434_vm11, 4294967295, %v9909_v49  ;;  %v7455_v23 = vpop.permute.xlu0 %7454  ;;  %vm8442_vm4 = vcmp.eq.s32.totalorder %v2094_v46, 1  ;;  %vm9913_vm9 = vcmp.lt.s32.totalorder %v7875_v62, 127  ;;  %1785 = vmatprep.mubr.f32.mxu0 %v9908_v26 }
  0xe1   : > { %v9912_v17 = vsel %vm8442_vm4, 4294967295, %v9911_v17  ;;  %v2057_v63 = vsel %vm9913_vm9, %v7447_v7, %v7452_v20  ;;  %vm9914_vm13 = vmmov %vm9913_vm9  ;;  %v9915_v46 = vpack.c.bf16 %v7724_v21, %v7718_v19  ;;  %v7457_v56 = vunpack.i.h.bf16 %v7455_v23 }
  0xe2   : > { %v2056_v42 = vsel %vm9914_vm13, %v7446_v22, %v7451_v0  ;;  %v7456_v4 = vunpack.i.l.bf16 %v7455_v23  ;;  %v9916_v50 = vpack.c.bf16 %v7752_v30, %v7750_v29  ;;  %v6987_v25 = vpack.c.bf16 %v2053_v61, %v2052_v16  ;;  %vm9918_vm10 = vmmov %vm9913_vm9 }
  0xe3   : > { %6968 = vmatpush1.bf16.msra.mxu0 %v9915_v46  ;;  %v2055_v53 = vsel %vm9913_vm9, %v7452_v20, %v7437_v15  ;;  %v7462_v14 = vunpack.i.h.bf16 %v7460_v54  ;;  %v7461_v11 = vunpack.i.l.bf16 %v7460_v54  ;;  %vm9917_vm13 = vcmask 130048   ;;  %vm9919_vm2 = vmmov %vm9913_vm9 }
  0xe4   : > { %6978 = vmatprep.subr.bf16.mxu1 %v9916_v50  ;;  %6574 = vmatmul.mubr.msk.f32.vlgmr.msra.gmra.mrb[0].mxu1 %vm9917_vm13, %v8432_v3  ;;  %v2054_v19 = vsel %vm9918_vm10, %v7451_v0, %v7436_v47  ;;  %v2058_v21 = vsel %vm9919_vm2, %v7456_v4, %v7446_v22  ;;  %vm9920_vm5 = vmmov %vm9919_vm2  ;;  %v9921_v16 = vpack.c.bf16 %v7770_v37, %v7768_v36  ;;  %v2876_v54 = vadd.s32 3, %v7858_v51 }
  0xe5   : > { %v2059_v29 = vsel %vm9920_vm5, %v7457_v56, %v7447_v7  ;;  %v9922_v30 = vpack.c.bf16 %v7756_v32, %v7754_v31  ;;  %vm6982_vm9 = vmpackc.low %vm8384_vm1, %vm8384_vm1  ;;  %v6981_v15 = vpack.c.bf16 %v2057_v63, %v2056_v42  ;;  %v2061_v47 = vsel %vm9919_vm2, %v7462_v14, %v7457_v56  ;;  %v7465_v31 = vpop.permute.xlu0 %7464  ;;  %v7470_v56 = vpop.permute.xlu1 %7469  ;;  %1998 = vmatprep.mubr.f32.mxu1 %v9908_v26  ;;  %v6577_v42 = vld [vmem:[%s9733_s3 + $0x20] sm:$0xff] }
  0xe6   : > { %6974 = vmatprep.subr.bf16.mxu0 %v9921_v16  ;;  %vm9923_vm5 = vmmov %vm9919_vm2  ;;  %v9925_v32 = vmov 0  ;;  %v9927_v37 = vpack.c.bf16 %v7760_v34, %v7758_v33  ;;  %v7467_v51 = vunpack.i.h.bf16 %v7465_v31  ;;  %v9928_v7 = vmov 0 }
  0xe7   : > { %6980 = vmatpush1.bf16.msra.mxu1 %v9922_v30  ;;  %v2060_v0 = vsel %vm9923_vm5, %v7461_v11, %v7456_v4  ;;  %vm9924_vm10 = vmmov %vm9917_vm13  ;;  %vm8498_vm13 = vcmp.eq.s32.totalorder %v2086_v40, 1  ;;  %v7466_v4 = vunpack.i.l.bf16 %v7465_v31  ;;  %v6990_v22 = vpack.c.bf16 %v2055_v53, %v2054_v19 }
  0xe8   : > { %6573 = vmatmul.mubr.msk.f32.vlgmr.msra.gmra.mrb[0].mxu0 %vm9924_vm10, %v8432_v3  ;;  %6989 = vmatprep.subr.msk.bf16.mxu1 %vm6988_vm3, %v6987_v25  ;;  %v9926_v32 = vsel %vm8498_vm13, 4294967295, %v9925_v32  ;;  %v6999_v36 = vpack.c.bf16 %v2061_v47, %v2060_v0  ;;  %vm8509_vm3 = vcmp.eq.s32.totalorder %v2489_v18, 1  ;;  %v6984_v20 = vpack.c.bf16 %v2059_v29, %v2058_v21  ;;  %vm9931_vm10 = vmmov %vm9919_vm2 }
  0xe9   : > { %6976 = vmatpush1.bf16.msra.mxu0 %v9927_v37  ;;  %v9929_v7 = vsel %vm8509_vm3, 4294967295, %v9928_v7  ;;  %v7472_v61 = vunpack.i.h.bf16 %v7470_v56  ;;  %v7471_v40 = vunpack.i.l.bf16 %v7470_v56  ;;  %1927 = vmatprep.mubr.f32.mxu0 %v9908_v26  ;;  %v9930_v33 = vunpack.i.l.bf16 %v8340_v45  ;;  %vm9934_vm1 = vmmov %vm9919_vm2  ;;  %v7475_v63 = vpop.permute.xlu0 %7474  ;;  %v8563_v21 = vpop.permute.xlu1 %7479 }
  0xea   : > { %6983 = vmatprep.subr.msk.bf16.mxu0 %vm6982_vm9, %v6981_v15  ;;  %v9932_v53 = vunpack.i.h.bf16 %v8340_v45  ;;  %vm9933_vm8 = vcmask 130048   ;;  %vm6985_vm9 = vmpackc.low %vm8409_vm6, %vm8409_vm6  ;;  %v2477_v18 = vrot.slane %v8402_v48, %v7870_v59  ;;  %v7477_v46 = vunpack.i.h.bf16 %v7475_v63 }
  0xeb   : > { %v2050_v34 = vsel %vm9931_vm10, %v9930_v33, %v7466_v4  ;;  %6576 = vmatmul.mubr.msk.f32.vlgmr.msra.gmra.mrb[2].mxu1 %vm9933_vm8, %v8432_v3  ;;  %v2049_v50 = vsel %vm9934_vm1, %v7467_v51, %v7472_v61  ;;  %vm9935_vm10 = vmmov %vm9934_vm1  ;;  %v7476_v19 = vunpack.i.l.bf16 %v7475_v63  ;;  %v7481_v30 = vunpack.i.l.bf16 %v8563_v21 }
  0xec   : > { %v2051_v23 = vsel %vm9919_vm2, %v9932_v53, %v7467_v51  ;;  %v2046_v45 = vsel %vm9935_vm10, %v7471_v40, %v7461_v11  ;;  %vm9936_vm14 = vmmov %vm9934_vm1  ;;  %vm2878_vm2 = vcmp.lt.s32.totalorder %v2876_v54, 128  ;;  %2263 = vmatprep.mubr.f32.mxu1 %v9908_v26  ;;  %v2505_v15 = vrot.slane %v8402_v48, %v7872_v60 }
  0xed   : > { %v2047_v25 = vsel %vm9936_vm14, %v7472_v61, %v7462_v14  ;;  %vm9937_vm8 = vmpackc.low %vm8395_vm0, %vm8395_vm0  ;;  %vm9939_vm14 = vcmask 130048   ;;  %v6996_v29 = vpack.c.bf16 %v2051_v23, %v2050_v34  ;;  %v7485_v31 = vpop.permute.xlu0 %7484  ;;  %v9944_v37 = vmov 0 }
  0xee   : > { %6992 = vmatpush1.bf16.msk.msra.mxu1 %vm9937_vm8, %v6990_v22  ;;  %vm6994_vm1 = vmpackc.low %vm8434_vm11, %vm8434_vm11  ;;  %v7002_v14 = vpack.c.bf16 %v2047_v25, %v2046_v45  ;;  %6575 = vmatmul.mubr.msk.f32.vlgmr.msra.gmra.mrb[2].mxu0 %vm9939_vm14, %v8432_v3  ;;  %v7482_v3 = vunpack.i.h.bf16 %v8563_v21  ;;  %v7487_v56 = vunpack.i.h.bf16 %v7485_v31  ;;  %v7486_v22 = vunpack.i.l.bf16 %v7485_v31 }
  0xef   : > { %vm9938_vm10 = vmmov %vm9923_vm5  ;;  %6986 = vmatpush1.bf16.msk.msra.mxu0 %vm6985_vm9, %v6984_v20  ;;  %2192 = vmatprep.mubr.f32.mxu0 %v9908_v26  ;;  %vm9941_vm9 = vcmp.lt.s32.totalorder %v7875_v62, 126  ;;  %v7490_v20 = vpop.permute.xlu1 %7489  ;;  %v9950_v61 = vrot.slane %v8402_v48, %v7868_v58  ;;  %v9954_v34 = vmov 0  ;;  %v9957_v53 = vmov 0 }
  0xf0   : > { %v2048_v11 = vsel %vm9938_vm10, %v7466_v4, %v7471_v40  ;;  %vm9940_vm8 = vmpackc.low %vm8413_vm7, %vm8413_vm7  ;;  %v2460_v47 = vsel %vm9941_vm9, %v7477_v46, %v7482_v3  ;;  %v9951_v40 = vmov 0  ;;  %v7491_v33 = vunpack.i.l.bf16 %v7490_v20 }
  0xf1   : > { %7001 = vmatprep.subr.msk.bf16.mxu1 %vm9940_vm8, %v6999_v36  ;;  %vm7003_vm5 = vmpackc.low %vm8442_vm4, %vm8442_vm4  ;;  %v6993_v16 = vpack.c.bf16 %v2049_v50, %v2048_v11  ;;  %6587 = vmatmul.mubr.msk.f32.vlgmr.msra.gmra.mrb[0].mxu1 %vm9939_vm14, %v6577_v42  ;;  %v9943_v36 = vrot.slane %v8402_v48, %v7861_v55  ;;  %v2497_v23 = vrot.slane %v8402_v48, %v7887_v5  ;;  %v9959_v50 = vmov 0  }
  0xf2   : > { %vm9942_vm10 = vmmov %vm9941_vm9  ;;  %7004 = vmatpush1.bf16.msk.msra.mxu1 %vm7003_vm5, %v7002_v14  ;;  %vm9946_vm9 = vcmp.ge.s32.totalorder %v2876_v54, 0  ;;  %2405 = vmatprep.mubr.f32.mxu1 %v9908_v26  ;;  %vm8617_vm5 = vcmp.eq.s32.totalorder %v9950_v61, 1  ;;  %v7492_v54 = vunpack.i.h.bf16 %v7490_v20 }
  0xf3   : > { %v2459_v0 = vsel %vm9942_vm10, %v7476_v19, %v7481_v30  ;;  %6995 = vmatprep.subr.msk.bf16.mxu0 %vm6994_vm1, %v6993_v16  ;;  %vm8602_vm14 = vcmp.eq.s32.totalorder %v9943_v36, 1  ;;  %vm8608_vm8 = vmand %vm9946_vm9, %vm2878_vm2  ;;  %vm9949_vm10 = vcmask 130048   ;;  %v9952_v40 = vsel %vm8617_vm5, 4294967295, %v9951_v40 }
  0xf4   : > { %v9945_v37 = vsel %vm8602_vm14, 4294967295, %v9944_v37  ;;  %v7011_v4 = vpack.c.bf16 %v2460_v47, %v2459_v0  ;;  %6582 = vmatmul.mubr.msk.f32.vlgmr.msra.gmra.mrb[0].mxu0 %vm9949_vm10, %v6577_v42  ;;  %vm9953_vm1 = vmpackc.low %vm8498_vm13, %vm8498_vm13  ;;  %vm8627_vm2 = vcmp.eq.s32.totalorder %v2477_v18, 1  ;;  %vm8640_vm13 = vcmp.eq.s32.totalorder %v2505_v15, 1  ;;  %v7500_v0 = vpop.permute.xlu1 %7499 }
  0xf5   : > { %6998 = vmatpush1.bf16.msk.msra.mxu0 %vm9953_vm1, %v6996_v29  ;;  %2334 = vmatprep.mubr.f32.mxu0 %v9908_v26  ;;  %v9955_v34 = vsel %vm8627_vm2, 4294967295, %v9954_v34  ;;  %vm9956_vm9 = vmpackc.low %vm8509_vm3, %vm8509_vm3  ;;  %v9958_v53 = vsel %vm8640_vm13, 4294967295, %v9957_v53  ;;  %v2501_v18 = vrot.slane %v8402_v48, %v7889_v6  ;;  %v8651_v45 = vsel %vm8608_vm8, 1, %v9959_v50  ;;  %v7495_v29 = vpop.permute.xlu0 %7494 }
  0xf6   : > { %7013 = vmatprep.subr.msk.bf16.mxu1 %vm9956_vm9, %v7011_v4  ;;  %6597 = vmatmul.mubr.msk.f32.vlgmr.msra.gmra.mrb[2].mxu1 %vm9949_vm10, %v6577_v42  ;;  %vm9960_vm9 = vcmp.lt.s32.totalorder %v7875_v62, 126  ;;  %vm7015_vm3 = vmpackc.low %vm8617_vm5, %vm8617_vm5  ;;  %v7497_v47 = vunpack.i.h.bf16 %v7495_v29  ;;  %vm9964_vm8 = vcmask 130048   ;;  %v7502_v31 = vunpack.i.h.bf16 %v7500_v0 }
  0xf7   : > { %v2462_v25 = vsel %vm9960_vm9, %v7492_v54, %v7477_v46  ;;  %vm9961_vm10 = vmmov %vm9960_vm9  ;;  %2670 = vmatprep.mubr.f32.mxu1 %v9908_v26  ;;  %v7496_v46 = vunpack.i.l.bf16 %v7495_v29  ;;  %v7501_v36 = vunpack.i.l.bf16 %v7500_v0  ;;  %vm10000_vm5 = vcmask 130048  }
  0xf8   : > { %v2464_v63 = vsel %vm9961_vm10, %v7487_v56, %v7492_v54  ;;  %vm9962_vm1 = vmmov %vm9960_vm9  ;;  %6592 = vmatmul.mubr.msk.f32.vlgmr.msra.gmra.mrb[2].mxu0 %vm9964_vm8, %v6577_v42  ;;  %v2896_v42 = vrot.slane %v8651_v45, %v7866_v57  ;;  %v9969_v54 = vmov 0  ;;  %v7510_v57 = vpop.permute.xlu1 %7509  ;;  %vm8700_vm8 = vcmp.eq.s32.totalorder %v2501_v18, 1 }
  0xf9   : > { %v2461_v11 = vsel %vm9962_vm1, %v7491_v33, %v7476_v19  ;;  %vm9963_vm11 = vmmov %vm9962_vm1  ;;  %2599 = vmatprep.mubr.f32.mxu0 %v9908_v26  ;;  %v2493_v19 = vrot.slane %v8402_v48, %v7908_v12  ;;  %v2466_v4 = vsel %vm9962_vm1, %v7497_v47, %v7487_v56  ;;  %v8685_v48 = vld [vmem:[%s9733_s3 + $0x28] sm:$0xff]  ;;  %v7505_v61 = vpop.permute.xlu0 %7504  ;;  %v2888_v18 = vrot.slane %v8651_v45, %v7861_v55 }
  0xfa   : > { %v2463_v14 = vsel %vm9963_vm11, %v7486_v22, %v7491_v33  ;;  %v7014_v15 = vpack.c.bf16 %v2462_v25, %v2461_v11  ;;  %vm9965_vm11 = vmmov %vm9962_vm1  ;;  %v7507_v50 = vunpack.i.h.bf16 %v7505_v61  ;;  %v7506_v25 = vunpack.i.l.bf16 %v7505_v61 }
  0xfb   : > { %v7005_v16 = vpack.c.bf16 %v2464_v63, %v2463_v14  ;;  %v2465_v51 = vsel %vm9965_vm11, %v7496_v46, %v7486_v22  ;;  %vm9966_vm9 = vmpackc.low %vm8602_vm14, %vm8602_vm14  ;;  %v9971_v63 = vmov 0  ;;  %v7512_v11 = vunpack.i.h.bf16 %v7510_v57 }
  0xfc   : > { %7016 = vmatpush1.bf16.msk.msra.mxu1 %vm7015_vm3, %v7014_v15  ;;  %vm7009_vm10 = vmpackc.low %vm8627_vm2, %vm8627_vm2  ;;  %v7008_v56 = vpack.c.bf16 %v2466_v4, %v2465_v51  ;;  %v9972_v63 = vsel %vm8700_vm8, 4294967295, %v9971_v63  ;;  %v7511_v14 = vunpack.i.l.bf16 %v7510_v57  ;;  %v2892_v55 = vrot.slane %v8651_v45, %v7868_v58  ;;  %v8743_v4 = vpop.permute.xlu1 %7519 }
  0xfd   : > { %7007 = vmatprep.subr.msk.bf16.mxu0 %vm9966_vm9, %v7005_v16  ;;  %vm9967_vm11 = vmmov %vm9962_vm1  ;;  %vm8696_vm9 = vcmp.eq.s32.totalorder %v2497_v23, 1  ;;  %v9974_v23 = vmov 0  ;;  %v2908_v15 = vrot.slane %v8651_v45, %v7889_v6 }
  0xfe   : > { %v2468_v22 = vsel %vm9967_vm11, %v7502_v31, %v7497_v47  ;;  %vm9968_vm3 = vmmov %vm9962_vm1  ;;  %v9970_v54 = vsel %vm8696_vm9, 4294967295, %v9969_v54  ;;  %7010 = vmatpush1.bf16.msk.msra.mxu0 %vm7009_vm10, %v7008_v56  ;;  %vm9973_vm11 = vcmask 130048   ;;  %vm8725_vm10 = vcmp.eq.s32.totalorder %v2896_v42, 1 }
  0xff   : > { %v2467_v20 = vsel %vm9968_vm3, %v7501_v36, %v7496_v46  ;;  %vm7024_vm1 = vmpackc.low %vm8640_vm13, %vm8640_vm13  ;;  %6608 = vmatmul.mubr.msk.f32.vlgmr.msra.gmra.mrb[0].mxu1 %vm9973_vm11, %v8685_v48  ;;  %vm8711_vm3 = vcmp.eq.s32.totalorder %v2493_v19, 1  ;;  %vm9976_vm13 = vcmp.lt.s32.totalorder %v7875_v62, 126  ;;  %v7521_v42 = vunpack.i.l.bf16 %v8743_v4 }
 0x100   : > { %v7023_v33 = vpack.c.bf16 %v2468_v22, %v2467_v20  ;;  %v9975_v23 = vsel %vm8711_vm3, 4294967295, %v9974_v23  ;;  %v2457_v29 = vsel %vm9976_vm13, %v7481_v30, %v7506_v25  ;;  %vm9977_vm2 = vmmov %vm9976_vm13  ;;  %2812 = vmatprep.mubr.f32.mxu1 %v9908_v26  ;;  %v7515_v30 = vpop.permute.xlu0 %7514  ;;  %v2884_v56 = vrot.slane %v8651_v45, %v7870_v59  ;;  %v7530_v57 = vpop.permute.xlu1 %7529 }
 0x101   : > { %v2458_v16 = vsel %vm9977_vm2, %v7482_v3, %v7507_v50  ;;  %vm9980_vm11 = vmmov %vm9977_vm2  ;;  %v7517_v58 = vunpack.i.h.bf16 %v7515_v30  ;;  %v7516_v51 = vunpack.i.l.bf16 %v7515_v30  ;;  %v2912_v22 = vrot.slane %v8651_v45, %v7872_v60 }
 0x102   : > { %7025 = vmatprep.subr.msk.bf16.mxu1 %vm7024_vm1, %v7023_v33  ;;  %v7020_v47 = vpack.c.bf16 %v2458_v16, %v2457_v29  ;;  %v2456_v46 = vsel %vm9980_vm11, %v7507_v50, %v7512_v11  ;;  %vm9981_vm13 = vmmov %vm9977_vm2  ;;  %v7531_v29 = vunpack.i.l.bf16 %v7530_v57 }
 0x103   : > { %v2453_v21 = vsel %vm9981_vm13, %v7511_v14, %v7501_v36  ;;  %vm9982_vm14 = vmmov %vm9977_vm2  ;;  %vm9984_vm13 = vcmask 130048   ;;  %v7522_v36 = vunpack.i.h.bf16 %v8743_v4 }
 0x104   : > { %v2454_v3 = vsel %vm9982_vm14, %v7512_v11, %v7502_v31  ;;  %vm7027_vm2 = vmpackc.low %vm8700_vm8, %vm8700_vm8  ;;  %6603 = vmatmul.mubr.msk.f32.vlgmr.msra.gmra.mrb[0].mxu0 %vm9984_vm13, %v8685_v48  ;;  %v7525_v33 = vpop.permute.xlu0 %7524 }
 0x105   : > { %vm9983_vm1 = vmmov %vm9980_vm11  ;;  %v7026_v19 = vpack.c.bf16 %v2454_v3, %v2453_v21  ;;  %2741 = vmatprep.mubr.f32.mxu0 %v9908_v26  ;;  %v7527_v50 = vunpack.i.h.bf16 %v7525_v33 }
 0x106   : > { %v2455_v0 = vsel %vm9983_vm1, %v7506_v25, %v7511_v14  ;;  %vm7018_vm11 = vmpackc.low %vm8696_vm9, %vm8696_vm9  ;;  %vm9985_vm1 = vcmp.lt.s32.totalorder %v7875_v62, 125  ;;  %v7526_v25 = vunpack.i.l.bf16 %v7525_v33  ;;  %v7532_v14 = vunpack.i.h.bf16 %v7530_v57 }
 0x107   : > { %v7017_v31 = vpack.c.bf16 %v2456_v46, %v2455_v0  ;;  %vm7021_vm14 = vmpackc.low %vm8711_vm3, %vm8711_vm3  ;;  %7028 = vmatpush1.bf16.msk.msra.mxu1 %vm7027_vm2, %v7026_v19  ;;  %v2867_v20 = vsel %vm9985_vm1, %v7517_v58, %v7522_v36  ;;  %vm8771_vm3 = vcmp.eq.s32.totalorder %v2888_v18, 1 }
 0x108   : > { %vm9986_vm13 = vmmov %vm9985_vm1  ;;  %vm8775_vm1 = vcmp.eq.s32.totalorder %v2892_v55, 1  ;;  %v7535_v3 = vpop.permute.xlu0 %7534 }
 0x109   : > { %v2866_v61 = vsel %vm9986_vm13, %v7516_v51, %v7521_v42  ;;  %7019 = vmatprep.subr.msk.bf16.mxu0 %vm7018_vm11, %v7017_v31  ;;  %vm7036_vm2 = vmpackc.low %vm8725_vm10, %vm8725_vm10  ;;  %vm9991_vm11 = vcmask 130048   ;;  %vm8789_vm13 = vcmp.eq.s32.totalorder %v2912_v22, 1  ;;  %v7537_v0 = vunpack.i.h.bf16 %v7535_v3 }
 0x10a   : > { %v7035_v60 = vpack.c.bf16 %v2867_v20, %v2866_v61  ;;  %7022 = vmatpush1.bf16.msk.msra.mxu0 %vm7021_vm14, %v7020_v47  ;;  %6618 = vmatmul.mubr.msk.f32.vlgmr.msra.gmra.mrb[2].mxu1 %vm9991_vm11, %v8685_v48  ;;  %vm8785_vm14 = vcmp.eq.s32.totalorder %v2884_v56, 1  ;;  %vm9996_vm11 = vcmp.lt.s32.totalorder %v7875_v62, 125  ;;  %vm7039_vm8 = vmpackc.low %vm8775_vm1, %vm8775_vm1  ;;  %v7536_v19 = vunpack.i.l.bf16 %v7535_v3 }
 0x10b   : > { %3077 = vmatprep.mubr.f32.mxu1 %v9908_v26  ;;  %v2869_v55 = vsel %vm9996_vm11, %v7532_v14, %v7517_v58  ;;  %v7540_v58 = vpop.permute.xlu1 %7539  ;;  %v2904_v56 = vrot.slane %v8651_v45, %v7887_v5  ;;  %v2900_v5 = vrot.slane %v8651_v45, %v7908_v12 }
 0x10c   : > { %7037 = vmatprep.subr.msk.bf16.mxu1 %vm7036_vm2, %v7035_v60  ;;  %vm9997_vm2 = vmmov %vm9996_vm11  ;;  %v7542_v31 = vunpack.i.h.bf16 %v7540_v58  ;;  %v7545_v60 = vpop.permute.xlu0 %7544 }
 0x10d   : > { %v2871_v47 = vsel %vm9997_vm2, %v7527_v50, %v7532_v14  ;;  %vm9998_vm10 = vmmov %vm9997_vm2  ;;  %6613 = vmatmul.mubr.msk.f32.vlgmr.msra.gmra.mrb[2].mxu0 %vm10000_vm5, %v8685_v48  ;;  %v6619_v48 = vld [vmem:[%s9733_s3 + $0x30] sm:$0xff]  ;;  %v7546_v57 = vunpack.i.l.bf16 %v7545_v60 }
 0x10e   : > { %v2868_v46 = vsel %vm9998_vm10, %v7531_v29, %v7516_v51  ;;  %vm9999_vm9 = vmmov %vm9997_vm2  ;;  %3006 = vmatprep.mubr.f32.mxu0 %v9908_v26  ;;  %v7541_v51 = vunpack.i.l.bf16 %v7540_v58 }
 0x10f   : > { %v2870_v21 = vsel %vm9999_vm9, %v7526_v25, %v7531_v29  ;;  %v7038_v30 = vpack.c.bf16 %v2869_v55, %v2868_v46  ;;  %vm10001_vm9 = vmmov %vm9997_vm2  ;;  %v7550_v11 = vpop.permute.xlu1 %7549 }
 0x110   : > { %v7029_v6 = vpack.c.bf16 %v2871_v47, %v2870_v21  ;;  %v2872_v22 = vsel %vm10001_vm9, %v7536_v19, %v7526_v25  ;;  %vm10002_vm1 = vmmov %vm9997_vm2  ;;  %v7547_v25 = vunpack.i.h.bf16 %v7545_v60  ;;  %v7552_v12 = vunpack.i.h.bf16 %v7550_v11  ;;  %v3238_v3 = vpop.permute.xlu0 %3237 }
 0x111   : > { %v2873_v20 = vsel %vm10002_vm1, %v7537_v0, %v7527_v50  ;;  %vm10003_vm5 = vmpackc.low %vm8771_vm3, %vm8771_vm3  ;;  %7040 = vmatpush1.bf16.msk.msra.mxu1 %vm7039_vm8, %v7038_v30  ;;  %vm8835_vm3 = vcmp.eq.s32.totalorder %v2908_v15, 1  ;;  %v7551_v45 = vunpack.i.l.bf16 %v7550_v11  ;;  %vm8840_vm9 = vcmp.eq.s32.totalorder %v2904_v56, 1 }
 0x112   : > { %7031 = vmatprep.subr.msk.bf16.mxu0 %vm10003_vm5, %v7029_v6  ;;  %vm7033_vm10 = vmpackc.low %vm8785_vm14, %vm8785_vm14  ;;  %v7032_v61 = vpack.c.bf16 %v2873_v20, %v2872_v22  ;;  %vm10008_vm14 = vcmask 130048   ;;  %v2865_v16 = vsel %vm10002_vm1, %v7522_v36, %v7547_v25  ;;  %vm8852_vm5 = vcmp.eq.s32.totalorder %v2900_v5, 1 }
 0x113   : > { %vm10004_vm11 = vmmov %vm10002_vm1 }
 0x114   : > { %v2875_v33 = vsel %vm10004_vm11, %v7542_v31, %v7537_v0  ;;  %vm10005_vm2 = vmmov %vm10002_vm1  ;;  %6629 = vmatmul.mubr.msk.f32.vlgmr.msra.gmra.mrb[0].mxu1 %vm10008_vm14, %v6619_v48  ;;  %7034 = vmatpush1.bf16.msk.msra.mxu0 %vm7033_vm10, %v7032_v61 }
 0x115   : > { %v2874_v59 = vsel %vm10005_vm2, %v7541_v51, %v7536_v19  ;;  %vm7048_vm8 = vmpackc.low %vm8789_vm13, %vm8789_vm13  ;;  %3219 = vmatprep.mubr.f32.mxu1 %v9908_v26 }
 0x116   : > { %v7047_v50 = vpack.c.bf16 %v2875_v33, %v2874_v59  ;;  %vm10011_vm13 = vmmov %vm10002_vm1 }
 0x117   : > { %v2864_v18 = vsel %vm10011_vm13, %v7521_v42, %v7546_v57  ;;  %vm10014_vm10 = vmmov %vm10002_vm1  ;;  %vm10018_vm13 = vcmask 130048  }
 0x118   : > { %7049 = vmatprep.subr.msk.bf16.mxu1 %vm7048_vm8, %v7047_v50  ;;  %v2863_v55 = vsel %vm10014_vm10, %v7547_v25, %v7552_v12  ;;  %vm10015_vm11 = vmmov %vm10002_vm1  ;;  %v7044_v4 = vpack.c.bf16 %v2865_v16, %v2864_v18  ;;  %6624 = vmatmul.mubr.msk.f32.vlgmr.msra.gmra.mrb[0].mxu0 %vm10018_vm13, %v6619_v48  ;;  %v4853_v18 = vld [vmem:[%s9736_s6] sm:$0xff] }
 0x119   : > { %v2860_v47 = vsel %vm10015_vm11, %v7551_v45, %v7541_v51  ;;  %vm10016_vm2 = vmmov %vm10002_vm1  ;;  %3148 = vmatprep.mubr.f32.mxu0 %v9908_v26 }
 0x11a   : > { %v2861_v42 = vsel %vm10016_vm2, %v7552_v12, %v7542_v31  ;;  %vm7051_vm14 = vmpackc.low %vm8835_vm3, %vm8835_vm3  ;;  %vm9795_vm2 = vcmask 64512  }
 0x11b   : > { %vm10017_vm8 = vmmov %vm10002_vm1  ;;  %v7050_v46 = vpack.c.bf16 %v2861_v42, %v2860_v47 }
 0x11c   : > { %v2862_v36 = vsel %vm10017_vm8, %v7546_v57, %v7551_v45  ;;  %vm7042_vm1 = vmpackc.low %vm8840_vm9, %vm8840_vm9  ;;  %vm10021_vm9 = vcmp.lt.s32.totalorder %v7875_v62, 1  ;;  %vm10024_vm8 = vnez %v9858_v44 }
 0x11d   : > { %v7041_v21 = vpack.c.bf16 %v2863_v55, %v2862_v36  ;;  %vm7045_vm10 = vmpackc.low %vm8852_vm5, %vm8852_vm5  ;;  %7052 = vmatpush1.bf16.msk.msra.mxu1 %vm7051_vm14, %v7050_v46 }
 0x11e   : > { %vm10019_vm3 = vmmov %vm10018_vm13 }
 0x11f   : > { %7043 = vmatprep.subr.msk.bf16.mxu0 %vm7042_vm1, %v7041_v21  ;;  %vm10020_vm11 = vmmov %vm10019_vm3 }
 0x120   : > { %7046 = vmatpush1.bf16.msk.msra.mxu0 %vm7045_vm10, %v7044_v4  ;;  %6639 = vmatmul.mubr.msk.f32.vlgmr.msra.gmra.mrb[2].mxu1 %vm10019_vm3, %v6619_v48  ;;  %vm10022_vm5 = vmmov %vm10021_vm9  ;;  %vm10028_vm3 = vnez %v9861_v28 }
 0x121   : > { %3462 = vmatprep.mubr.f32.mxu1 %v9908_v26  ;;  %vm10023_vm14 = vmmov %vm10022_vm5 }
 0x122   : > { %vm10025_vm13 = vmmov %vm10022_vm5 }
 0x123   : > { %6634 = vmatmul.mubr.msk.f32.vlgmr.msra.gmra.mrb[2].mxu0 %vm10020_vm11, %v6619_v48  ;;  %vm10026_vm1 = vmmov %vm10022_vm5  ;;  %vm10029_vm11 = vnez %v9863_v24 }
 0x124   : > { %3391 = vmatprep.mubr.f32.mxu0 %v9908_v26  ;;  %vm10027_vm10 = vmmov %vm10026_vm1 }
 0x1e7   : > { %v3079_v6 = vpop.f32.mrb[0].mxu1 }
 0x1e8   : > { %v3242_v30 = vadd.f32 %v3238_v3, %v3079_v6  ;;  %v3081_v0 = vpop.f32.mrb[1].mxu1  ;;  %v6640_v6 = vld [vmem:[%s9735_s5 + $0x8] sm:$0xff] }
 0x1e9   : > { %v3243_v33 = vadd.f32 %v3238_v3, %v3081_v0 }
 0x1ea   : > { %v8880_v19 = vmax.f32 %v3242_v30, 0.0 }
 0x1eb   : > { %v3008_v58 = vpop.f32.mrb[0].mxu0  ;;  %v8898_v60 = vmax.f32 %v3243_v33, 0.0 }
 0x1ec   : > { %v3240_v31 = vadd.f32 %v3238_v3, %v3008_v58  ;;  %v3010_v51 = vpop.f32.mrb[1].mxu0  ;;  %3260 = vrot.lane.b32.xlu0 %v8880_v19, %s7580_s25  ;;  %3293 = vrot.lane.b32.xlu1 %v8880_v19, %s7583_s16 }
 0x1ed   : > { %v3241_v56 = vadd.f32 %v3238_v3, %v3010_v51 }
 0x1ee   : > { %v8886_v22 = vmax.f32 %v3240_v31, 0.0 }
 0x1ef   : > { %v8888_v20 = vmax.f32 %v3241_v56, 0.0 }
 0x1f0   : > { %3289 = vrot.lane.b32.xlu1 %v8886_v22, %s7583_s16 }
 0x1f1   : > { %3291 = vrot.lane.b32.xlu0 %v8888_v20, %s7583_s16 }
 0x1f3   : > { %v3221_v48 = vpop.f32.mrb[2].mxu1 }
 0x1f4   : > { %v3223_v5 = vpop.f32.mrb[3].mxu1  ;;  %3256 = vrot.lane.b32.xlu1 %v8886_v22, %s7580_s25  ;;  %v3246_v50 = vadd.f32 %v3238_v3, %v3221_v48 }
 0x1f5   : > { %3258 = vrot.lane.b32.xlu0 %v8888_v20, %s7580_s25  ;;  %v3247_v12 = vadd.f32 %v3238_v3, %v3223_v5 }
 0x1f6   : > { %v3150_v61 = vpop.f32.mrb[2].mxu0  ;;  %v8904_v25 = vmax.f32 %v3246_v50, 0.0 }
 0x1f7   : > { %v3152_v59 = vpop.f32.mrb[3].mxu0  ;;  %v3244_v57 = vadd.f32 %v3238_v3, %v3150_v61  ;;  %v8922_v29 = vmax.f32 %v3247_v12, 0.0 }
 0x1f8   : > { %3295 = vrot.lane.b32.xlu1 %v8898_v60, %s7583_s16  ;;  %v3245_v14 = vadd.f32 %v3238_v3, %v3152_v59 }
 0x1f9   : > { %4201 = vrot.lane.b32.xlu0 %v8898_v60, %s7584_s17  ;;  %v8910_v11 = vmax.f32 %v3244_v57, 0.0 }
 0x1fa   : > { %v8916_v45 = vmax.f32 %v3245_v14, 0.0 }
 0x1fc   : > { %3262 = vrot.lane.b32.xlu1 %v8898_v60, %s7580_s25 }
 0x1fd   : > { %3301 = vrot.lane.b32.xlu0 %v8904_v25, %s7583_s16 }
 0x200   : > { %3297 = vrot.lane.b32.xlu1 %v8910_v11, %s7583_s16 }
 0x201   : > { %3268 = vrot.lane.b32.xlu0 %v8904_v25, %s7580_s25 }
 0x204   : > { %3264 = vrot.lane.b32.xlu1 %v8910_v11, %s7580_s25 }
 0x205   : > { %3299 = vrot.lane.b32.xlu0 %v8916_v45, %s7583_s16 }
 0x208   : > { %3303 = vrot.lane.b32.xlu1 %v8922_v29, %s7583_s16 }
 0x209   : > { %4199 = vrot.lane.b32.xlu0 %v8880_v19, %s7584_s17 }
 0x20c   : > { %4203 = vrot.lane.b32.xlu1 %v8910_v11, %s7584_s17 }
 0x20d   : > { %3266 = vrot.lane.b32.xlu0 %v8916_v45, %s7580_s25 }
 0x210   : > { %3270 = vrot.lane.b32.xlu1 %v8922_v29, %s7580_s25 }
 0x211   : > { %4195 = vrot.lane.b32.xlu0 %v8886_v22, %s7584_s17 }
 0x214   : > { %4197 = vrot.lane.b32.xlu1 %v8888_v20, %s7584_s17 }
 0x215   : > { %4207 = vrot.lane.b32.xlu0 %v8904_v25, %s7584_s17 }
 0x218   : > { %4532 = vrot.lane.b32.xlu1 %v8910_v11, %s7585_s18 }
 0x219   : > { %4530 = vrot.lane.b32.xlu0 %v8898_v60, %s7585_s18 }
 0x21c   : > { %4526 = vrot.lane.b32.xlu1 %v8888_v20, %s7585_s18 }
 0x21d   : > { %4528 = vrot.lane.b32.xlu0 %v8880_v19, %s7585_s18 }
 0x220   : > { %4209 = vrot.lane.b32.xlu1 %v8922_v29, %s7584_s17 }
 0x221   : > { %4524 = vrot.lane.b32.xlu0 %v8886_v22, %s7585_s18 }
 0x224   : > { %4205 = vrot.lane.b32.xlu1 %v8916_v45, %s7584_s17 }
 0x225   : > { %4536 = vrot.lane.b32.xlu0 %v8904_v25, %s7585_s18 }
 0x228   : > { %4538 = vrot.lane.b32.xlu1 %v8922_v29, %s7585_s18 }
 0x229   : > { %4856 = vperm.xlu0 %7553, %v4853_v18  }
 0x22c   : > { %4534 = vrot.lane.b32.xlu1 %v8916_v45, %s7585_s18 }
 0x25e   : > { %v3261_v16 = vpop.permute.xlu0 %3260  ;;  %v3294_v15 = vpop.permute.xlu1 %3293 }
 0x262   : > { %v3290_v55 = vpop.permute.xlu1 %3289 }
 0x263   : > { %v3292_v47 = vpop.permute.xlu0 %3291 }
 0x264   : > { %v3311_v42 = vsel %vm10021_vm9, %v3290_v55, %v3292_v47  ;;  %v3310_v30 = vsel %vm10023_vm14, %v3292_v47, %v3294_v15  ;;  %vm10030_vm9 = vmmov %vm10026_vm1  ;;  %vm10032_vm14 = vnez %v9879_v13 }
 0x265   : > { %6641 = vmatprep.subr.msk.mxu0 %vm8194_vm12, %v3311_v42  ;;  %v3288_v42 = vld [vmem:[%s9735_s5] sm:$0xff] }
 0x266   : > { %v3257_v4 = vpop.permute.xlu1 %3256 }
 0x267   : > { %v3259_v36 = vpop.permute.xlu0 %3258 }
 0x26a   : > { %v3296_v46 = vpop.permute.xlu1 %3295 }
 0x26b   : > { %v8967_v21 = vpop.permute.xlu0 %4201  ;;  %v3309_v3 = vsel %vm10022_vm5, %v3294_v15, %v3296_v46  ;;  %vm10031_vm5 = vmmov %vm10026_vm1 }
 0x26c   : > { %6644 = vmatprep.subr.msk.mxu1 %vm8164_vm15, %v3309_v3  ;;  %v10045_v3 = vld [vmem:[#allocation3_spill] sm:$0xff] }
 0x26d   : > { %6645 = vmatpush1.msk.msra.mxu1 %vm10024_vm8, %v3310_v30  ;;  %v10049_v30 = vld [vmem:[#allocation5_spill] sm:$0xff] }
 0x26e   : > { %v3263_v0 = vpop.permute.xlu1 %3262  ;;  %6646 = vmatmul.mubr.msk.f32.vlgmr.msra.gmra.mrb[4].mxu1 %vm9795_vm2, %v6640_v6 }
 0x26f   : > { %v3302_v58 = vpop.permute.xlu0 %3301  ;;  %3604 = vmatprep.mubr.f32.mxu1 %v9908_v26 }
 0x272   : > { %v3298_v31 = vpop.permute.xlu1 %3297 }
 0x273   : > { %v3269_v51 = vpop.permute.xlu0 %3268  ;;  %v3308_v57 = vsel %vm10030_vm9, %v3296_v46, %v3298_v31 }
 0x276   : > { %v3265_v56 = vpop.permute.xlu1 %3264 }
 0x277   : > { %v3300_v48 = vpop.permute.xlu0 %3299 }
 0x278   : > { %v3307_v50 = vsel %vm10027_vm10, %v3298_v31, %v3300_v48  ;;  %v3306_v14 = vsel %vm10031_vm5, %v3300_v48, %v3302_v58  ;;  %vm10035_vm10 = vnez %v9884_v35  ;;  %v10055_v48 = vld [vmem:[#allocation7_spill] sm:$0xff] }
 0x27a   : > { %v3304_v5 = vpop.permute.xlu1 %3303 }
 0x27b   : > { %v8982_v61 = vpop.permute.xlu0 %4199  ;;  %v3305_v33 = vsel %vm10025_vm13, %v3302_v58, %v3304_v5  ;;  %v3312_v59 = vsel %vm10026_vm1, %v3304_v5, %v3290_v55  ;;  %vm10033_vm13 = vcmp.lt.s32.totalorder %v7875_v62, 2  ;;  %vm10034_vm1 = vnez %v9881_v43 }
 0x27c   : > { %6642 = vmatpush1.msk.msra.mxu0 %vm10028_vm3, %v3312_v59  ;;  %6650 = vmatprep.subr.msk.mxu1 %vm10029_vm11, %v3305_v33  ;;  %v3276_v12 = vsel %vm10033_vm13, %v3261_v16, %v3263_v0  ;;  %vm10036_vm9 = vmmov %vm10033_vm13  ;;  %vm10039_vm13 = vnez %v9798_v8  ;;  %vm10054_vm11 = vcmask 64512  }
 0x27d   : > { %6643 = vmatmul.mubr.msk.f32.vlgmr.msra.gmra.mrb[4].mxu0 %vm9795_vm2, %v6640_v6  ;;  %6647 = vmatprep.subr.msk.mxu0 %vm10032_vm14, %v3307_v50  ;;  %v3277_v55 = vsel %vm10036_vm9, %v3259_v36, %v3261_v16  ;;  %vm10037_vm5 = vmmov %vm10036_vm9  ;;  %vm10038_vm14 = vnez %v9800_v9 }
 0x27e   : > { %6651 = vmatpush1.msk.msra.mxu1 %vm10034_vm1, %v3306_v14  ;;  %v9005_v18 = vpop.permute.xlu1 %4203  ;;  %6648 = vmatpush1.msk.msra.mxu0 %vm10035_vm10, %v3308_v57  ;;  %v3278_v47 = vsel %vm10037_vm5, %v3257_v4, %v3259_v36  ;;  %vm10040_vm1 = vnez %v9802_v10  ;;  %vm10042_vm9 = vmmov %vm10037_vm5 }
 0x27f   : > { %v3267_v15 = vpop.permute.xlu0 %3266  ;;  %6652 = vmatmul.mubr.msk.f32.vlgmr.msra.gmra.mrb[6].mxu1 %vm9795_vm2, %v6640_v6  ;;  %6656 = vmatprep.subr.msk.mxu1 %vm10038_vm14, %v3276_v12  ;;  %vm10041_vm14 = vmmov %vm10037_vm5 }
 0x280   : > { %6653 = vmatprep.subr.msk.mxu0 %vm10039_vm13, %v3278_v47  ;;  %6657 = vmatpush1.msk.msra.mxu1 %vm10040_vm1, %v3277_v55  ;;  %vm10043_vm1 = vmmov %vm10037_vm5  ;;  %vm10046_vm13 = vnez %v10045_v3 }
 0x281   : > { %3533 = vmatprep.mubr.f32.mxu0 %v9908_v26  ;;  %3749 = vmatprep.mubr.f32.mxu1 %v9908_v26  ;;  %v3273_v10 = vsel %vm10043_vm1, %v3267_v15, %v3269_v51  ;;  %vm10044_vm5 = vmmov %vm10043_vm1 }
 0x282   : > { %6649 = vmatmul.mubr.msk.f32.vlgmr.msra.gmra.mrb[6].mxu0 %vm9795_vm2, %v6640_v6  ;;  %v3271_v16 = vpop.permute.xlu1 %3270  ;;  %v3274_v46 = vsel %vm10044_vm5, %v3265_v56, %v3267_v15  ;;  %v10047_v6 = vld [vmem:[#allocation4_spill] sm:$0xff]  ;;  %vm10057_vm5 = vmmov %vm10054_vm11 }
 0x283   : > { %v4196_v36 = vpop.permute.xlu0 %4195  ;;  %v3272_v9 = vsel %vm10041_vm14, %v3269_v51, %v3271_v16  ;;  %v3279_v8 = vsel %vm10042_vm9, %v3271_v16, %v3257_v4  ;;  %6658 = vmatmul.mubr.msk.f32.vlgmr.msra.gmra.mrb[4].mxu1 %vm9795_vm2, %v3288_v42  ;;  %3678 = vmatprep.mubr.f32.mxu0 %v9908_v26  ;;  %vm10048_vm10 = vnez %v10047_v6  ;;  %vm10050_vm14 = vnez %v10049_v30  ;;  %v10051_v4 = vld [vmem:[#allocation6_spill] sm:$0xff]  ;;  %vm10053_vm2 = vmmov %vm10043_vm1 }
 0x284   : > { %6654 = vmatpush1.msk.msra.mxu0 %vm10046_vm13, %v3279_v8  ;;  %6662 = vmatprep.subr.msk.mxu1 %vm10048_vm10, %v3272_v9  ;;  %vm10052_vm9 = vnez %v10051_v4  ;;  %v3275_v58 = vsel %vm10053_vm2, %v3263_v0, %v3265_v56  ;;  %vm10056_vm1 = vnez %v10055_v48  ;;  %v6665_v0 = vld [vmem:[%s9735_s5 + $0x10] sm:$0xff]  ;;  %vm10058_vm2 = vmmov %vm10057_vm5  ;;  %vm10060_vm10 = vcmp.lt.s32.totalorder %v7875_v62, 127 }
 0x285   : > { %6659 = vmatprep.subr.msk.mxu0 %vm10050_vm14, %v3274_v46  ;;  %6663 = vmatpush1.msk.msra.mxu1 %vm10052_vm9, %v3273_v10  ;;  %vm10061_vm13 = vnez %v9895_v52  ;;  %vm10062_vm14 = vmmov %vm10058_vm2  ;;  %v5836_v52 = vld [vmem:[%s9732_s2 + $0x8] sm:$0xff] }
 0x286   : > { %6655 = vmatmul.mubr.msk.f32.vlgmr.msra.gmra.mrb[4].mxu0 %vm10054_vm11, %v3288_v42  ;;  %3891 = vmatprep.mubr.f32.mxu1 %v9908_v26  ;;  %v4198_v31 = vpop.permute.xlu1 %4197  ;;  %vm10059_vm11 = vmmov %vm10058_vm2 }
 0x287   : > { %v4208_v51 = vpop.permute.xlu0 %4207  ;;  %6660 = vmatpush1.msk.msra.mxu0 %vm10056_vm1, %v3275_v58  ;;  %6664 = vmatmul.mubr.msk.f32.vlgmr.msra.gmra.mrb[6].mxu1 %vm10057_vm5, %v3288_v42  ;;  %vm10063_vm9 = vmmov %vm10060_vm10 }
 0x288   : > { %3974 = vmatprep.subr.mxu1 %v8898_v60  ;;  %3903 = vmatprep.subr.mxu0 %v8888_v20  ;;  %v4216_v60 = vsel %vm10063_vm9, %v4198_v31, %v8982_v61  ;;  %vm10064_vm1 = vmmov %vm10063_vm9 }
 0x289   : > { %3975 = vmatpush1.msra.mxu1 %v8880_v19  ;;  %3820 = vmatprep.mubr.f32.mxu0 %v9908_v26  ;;  %v4214_v19 = vsel %vm10060_vm10, %v8967_v21, %v9005_v18  ;;  %vm10065_vm5 = vmmov %vm10058_vm2 }
 0x28a   : > { %4116 = vmatprep.subr.mxu1 %v8922_v29  ;;  %6661 = vmatmul.mubr.msk.f32.vlgmr.msra.gmra.mrb[6].mxu0 %vm10058_vm2, %v3288_v42  ;;  %v9060_v56 = vpop.permute.xlu1 %4532  ;;  %vm10066_vm2 = vnez %v9897_v41  ;;  %vm10068_vm10 = vmmov %vm10065_vm5  ;;  %v5883_v41 = vld [vmem:[%s9732_s2 + $0x180] sm:$0xff] }
 0x28b   : > { %v4531_v5 = vpop.permute.xlu0 %4530  ;;  %3904 = vmatpush1.msra.mxu0 %v8886_v22  ;;  %4038 = vmatprep.mubr.f32.mxu1 %v9908_v26  ;;  %vm10070_vm9 = vmmov %vm10064_vm1 }
 0x28c   : > { %6667 = vmatmul.mubr.msk.f32.vlgmr.msra.gmra.mrb[4].mxu1 %vm10059_vm11, %v6665_v0  ;;  %4045 = vmatprep.subr.mxu0 %v8916_v45  ;;  %vm10067_vm11 = vmmov %vm10064_vm1 }
 0x28d   : > { %4117 = vmatpush1.msra.mxu1 %v8904_v25  ;;  %3967 = vmatprep.mubr.f32.mxu0 %v9908_v26  ;;  %v4215_v25 = vsel %vm10064_vm1, %v8982_v61, %v8967_v21  ;;  %v4217_v45 = vsel %vm10067_vm11, %v4196_v36, %v4198_v31  ;;  %v6696_v31 = vld [vmem:[%s9737_s7 + $0x8] sm:$0xff] }
 0x28e   : > { %6674 = vmatprep.subr.msk.mxu1 %vm10061_vm13, %v4214_v19  ;;  %6666 = vmatmul.mubr.msk.f32.vlgmr.msra.gmra.mrb[4].mxu0 %vm10062_vm14, %v6665_v0  ;;  %v4527_v22 = vpop.permute.xlu1 %4526  ;;  %vm10069_vm14 = vmmov %vm10064_vm1 }
 0x28f   : > { %v4529_v20 = vpop.permute.xlu0 %4528  ;;  %4046 = vmatpush1.msra.mxu0 %v8910_v11  ;;  %4180 = vmatprep.mubr.f32.mxu1 %v9908_v26  ;;  %v6670_v11 = vld [vmem:[%s9735_s5 + $0x18] sm:$0xff]  ;;  %vm10071_vm1 = vmmov %vm10065_vm5 }
 0x290   : > { %6669 = vmatmul.mubr.msk.f32.vlgmr.msra.gmra.mrb[6].mxu1 %vm10065_vm5, %v6665_v0  ;;  %6671 = vmatprep.subr.msk.mxu0 %vm10066_vm2, %v4216_v60  ;;  %vm10072_vm5 = vcmp.lt.s32.totalorder %v7875_v62, 126  ;;  %vm10073_vm11 = vmmov %vm10071_vm1 }
 0x291   : > { %6675 = vmatpush1.msk.msra.mxu1 %vm8395_vm0, %v4215_v25  ;;  %4109 = vmatprep.mubr.f32.mxu0 %v9908_v26  ;;  %v4543_v59 = vsel %vm10072_vm5, %v4531_v5, %v9060_v56 }
 0x292   : > { %6668 = vmatmul.mubr.msk.f32.vlgmr.msra.gmra.mrb[6].mxu0 %vm10068_vm10, %v6665_v0  ;;  %4367 = vmatprep.mubr.f32.mxu1 %v9908_v26  ;;  %v4210_v29 = vpop.permute.xlu1 %4209  ;;  %vm10074_vm10 = vnez %v9929_v7  ;;  %v6683_v7 = vld [vmem:[%s9735_s5 + $0x20] sm:$0xff] }
 0x293   : > { %6672 = vmatpush1.msk.msra.mxu0 %vm8409_vm6, %v4217_v45  ;;  %v4211_v21 = vsel %vm10069_vm14, %v4208_v51, %v4210_v29  ;;  %v4218_v61 = vsel %vm10070_vm9, %v4210_v29, %v4196_v36  ;;  %4296 = vmatprep.mubr.f32.mxu0 %v9908_v26  ;;  %v4525_v33 = vpop.permute.xlu0 %4524  ;;  %vm10075_vm14 = vmmov %vm10070_vm9  ;;  %v6245_v45 = vld [vmem:[%s9740_s10] sm:$0xff] }
 0x294   : > { %6676 = vmatmul.mubr.msk.f32.vlgmr.msra.gmra.mrb[4].mxu1 %vm10071_vm1, %v6670_v11  ;;  %6680 = vmatprep.subr.msk.mxu1 %vm8413_vm7, %v4218_v61  ;;  %vm10076_vm1 = vmmov %vm10072_vm5  ;;  %v6342_v29 = vld [vmem:[%s9742_s12] sm:$0xff]  ;;  %v6246_v61 = vld [vmem:[%s9740_s10 + $0x8] sm:$0xff] }
 0x295   : > { %6681 = vmatpush1.msk.msra.mxu1 %vm8442_vm4, %v4211_v21  ;;  %4509 = vmatprep.mubr.f32.mxu1 %v9908_v26  ;;  %v4544_v12 = vsel %vm10076_vm1, %v4529_v20, %v4531_v5  ;;  %vm10077_vm5 = vmmov %vm10073_vm11  ;;  %vm10078_vm4 = vnez %v9910_v49  ;;  %v5813_v21 = vld [vmem:[%s9738_s8] sm:$0xff] }
 0x296   : > { %v4206_v50 = vpop.permute.xlu1 %4205  ;;  %6673 = vmatmul.mubr.msk.f32.vlgmr.msra.gmra.mrb[4].mxu0 %vm10073_vm11, %v6670_v11  ;;  %6687 = vmatprep.subr.msk.mxu1 %vm10074_vm10, %v4543_v59  ;;  %vm10079_vm11 = vnez %v9952_v40  ;;  %vm10080_vm10 = vnez %v9926_v32  ;;  %v4546_v40 = vsel %vm10076_vm1, %v4525_v33, %v4527_v22 }
 0x297   : > { %v4212_v57 = vsel %vm10075_vm14, %v4206_v50, %v4208_v51  ;;  %v4213_v14 = vsel %vm10070_vm9, %v9005_v18, %v4206_v50  ;;  %4438 = vmatprep.mubr.f32.mxu0 %v9908_v26  ;;  %vm10081_vm14 = vmmov %vm10076_vm1  ;;  %v4537_v15 = vpop.permute.xlu0 %4536 }
 0x298   : > { %6682 = vmatmul.mubr.msk.f32.vlgmr.msra.gmra.mrb[6].mxu1 %vm10077_vm5, %v6670_v11  ;;  %6677 = vmatprep.subr.msk.mxu0 %vm10078_vm4, %v4212_v57  ;;  %v4545_v18 = vsel %vm10081_vm14, %v4527_v22, %v4529_v20  ;;  %vm10082_vm9 = vmmov %vm10077_vm5  ;;  %vm10087_vm4 = vnez %v9955_v34 }
 0x299   : > { %6688 = vmatpush1.msk.msra.mxu1 %vm10079_vm11, %v4544_v12  ;;  %6678 = vmatpush1.msk.msra.mxu0 %vm10080_vm10, %v4213_v14  ;;  %vm10083_vm5 = vmmov %vm10076_vm1  ;;  %vm10085_vm10 = vnez %v9945_v37 }
 0x29a   : > { %4696 = vmatprep.mubr.f32.mxu1 %v9908_v26  ;;  %v4539_v55 = vpop.permute.xlu1 %4538  ;;  %6679 = vmatmul.mubr.msk.f32.vlgmr.msra.gmra.mrb[6].mxu0 %vm10082_vm9, %v6670_v11  ;;  %vm10084_vm11 = vmmov %vm10076_vm1  ;;  %vm10089_vm1 = vnez %v9972_v63 }
 0x29b   : > { %v4540_v47 = vsel %vm10083_vm5, %v4537_v15, %v4539_v55  ;;  %v4547_v42 = vsel %vm10084_vm11, %v4539_v55, %v4525_v33  ;;  %6684 = vmatprep.subr.msk.mxu0 %vm10085_vm10, %v4545_v18  ;;  %4625 = vmatprep.mubr.f32.mxu0 %v9908_v26  ;;  %vm10086_vm14 = vmmov %vm10082_vm9  ;;  %vm10088_vm9 = vnez %v9958_v53  ;;  %v6343_v33 = vld [vmem:[%s9742_s12 + $0x8] sm:$0x3] }
 0x29c   : > { %6689 = vmatmul.mubr.msk.f32.vlgmr.msra.gmra.mrb[4].mxu1 %vm10086_vm14, %v6683_v7  ;;  %6685 = vmatpush1.msk.msra.mxu0 %vm10087_vm4, %v4546_v40  ;;  %vm10090_vm5 = vmmov %vm10086_vm14  ;;  %vm10094_vm14 = vnez %v9970_v54 }
 0x29d   : > { %6693 = vmatprep.subr.msk.mxu1 %vm10088_vm9, %v4547_v42  ;;  %4838 = vmatprep.mubr.f32.mxu1 %v9908_v26  ;;  %vm10091_vm10 = vmmov %vm10084_vm11  ;;  %vm10095_vm9 = vnez %v9975_v23 }
 0x29e   : > { %6694 = vmatpush1.msk.msra.mxu1 %vm10089_vm1, %v4540_v47  ;;  %v4535_v16 = vpop.permute.xlu1 %4534  ;;  %6686 = vmatmul.mubr.msk.f32.vlgmr.msra.gmra.mrb[4].mxu0 %vm10090_vm5, %v6683_v7  ;;  %vm10092_vm11 = vmmov %vm10091_vm10 }
 0x29f   : > { %v4541_v37 = vsel %vm10091_vm10, %v4535_v16, %v4537_v15  ;;  %v4542_v36 = vsel %vm10092_vm11, %v9060_v56, %v4535_v16  ;;  %4767 = vmatprep.mubr.f32.mxu0 %v9908_v26  ;;  %vm10093_vm4 = vmmov %vm10090_vm5  ;;  %v4907_v15 = vld [vmem:[%s9737_s7] sm:$0xff] }
 0x2a0   : > { %6695 = vmatmul.mubr.msk.f32.vlgmr.msra.gmra.mrb[6].mxu1 %vm10093_vm4, %v6683_v7  ;;  %6690 = vmatprep.subr.msk.mxu0 %vm10094_vm14, %v4541_v37  ;;  %vm10096_vm1 = vmmov %vm10093_vm4  ;;  %vm10101_vm14 = vcmp.lt.s32.totalorder %v7875_v62, 1 }
 0x2a1   : > { %6691 = vmatpush1.msk.msra.mxu0 %vm10095_vm9, %v4542_v36  ;;  %5048 = vmatprep.mubr.f32.mxu1 %v9908_v26  ;;  %vm10097_vm5 = vmmov %vm10096_vm1 }
 0x2a2   : > { %6692 = vmatmul.mubr.msk.f32.vlgmr.msra.gmra.mrb[6].mxu0 %vm10096_vm1, %v6683_v7  ;;  %vm10098_vm10 = vmmov %vm10096_vm1 }
 0x2a3   : > { %4977 = vmatprep.mubr.f32.mxu0 %v9908_v26  ;;  %vm10099_vm11 = vmmov %vm10096_vm1 }
 0x2a4   : > { %vm10100_vm4 = vmmov %vm10096_vm1 }
 0x2a5   : > { %vm10102_vm9 = vmmov %vm10101_vm14 }
 0x2a6   : > { %vm10103_vm1 = vmmov %vm10102_vm9 }
 0x2a8   : > { %v4857_v34 = vpop.permute.xlu0 %4856 }
 0x36f   : > { %v4698_v53 = vpop.f32.mrb[4].mxu1 }
 0x370   : > { %v4861_v63 = vadd.f32 %v4857_v34, %v4698_v53  ;;  %v4700_v9 = vpop.f32.mrb[5].mxu1 }
 0x371   : > { %v4862_v8 = vadd.f32 %v4857_v34, %v4700_v9  ;;  %v4627_v10 = vpop.f32.mrb[4].mxu0  ;;  %v5884_v9 = vld [vmem:[%s9732_s2 + $0x188] sm:$0xff] }
 0x372   : > { %v4869_v46 = vmax.f32 %v4861_v63, 0.0  ;;  %v4859_v3 = vadd.f32 %v4857_v34, %v4627_v10  ;;  %v4629_v6 = vpop.f32.mrb[5].mxu0  ;;  %v5852_v10 = vld [vmem:[%s9732_s2 + $0x88] sm:$0xff] }
 0x373   : > { %v4870_v54 = vmax.f32 %v4862_v8, 0.0  ;;  %v4840_v30 = vpop.f32.mrb[6].mxu1  ;;  %v4860_v4 = vadd.f32 %v4857_v34, %v4629_v6  ;;  %v5867_v6 = vld [vmem:[%s9732_s2 + $0x100] sm:$0xff] }
 0x374   : > { %v4865_v23 = vadd.f32 %v4857_v34, %v4840_v30  ;;  %v4842_v58 = vpop.f32.mrb[7].mxu1  ;;  %4879 = vrot.lane.b32.xlu0 %v4869_v46, %s7583_s16  ;;  %v4867_v51 = vmax.f32 %v4859_v3, 0.0  ;;  %v5835_v3 = vld [vmem:[%s9732_s2] sm:$0xff] }
 0x375   : > { %v4868_v48 = vmax.f32 %v4860_v4, 0.0  ;;  %v4866_v0 = vadd.f32 %v4857_v34, %v4842_v58  ;;  %4881 = vrot.lane.b32.xlu1 %v4870_v54, %s7583_s16  ;;  %4984 = vmatprep.subr.mxu1 %v4870_v54  ;;  %v4769_v56 = vpop.f32.mrb[6].mxu0  ;;  %v7085_v4 = vpack.c.bf16 %v5884_v9, %v5883_v41  ;;  %v5886_v58 = vld [vmem:[%s9732_s2 + $0x198] sm:$0xff]  ;;  %v5844_v9 = vld [vmem:[%s9732_s2 + $0x48] sm:$0xff] }
 0x376   : > { %4985 = vmatpush1.msra.mxu1 %v4869_v46  ;;  %v4863_v5 = vadd.f32 %v4857_v34, %v4769_v56  ;;  %v4771_v19 = vpop.f32.mrb[7].mxu0  ;;  %v4873_v60 = vmax.f32 %v4865_v23, 0.0  ;;  %v5885_v23 = vld [vmem:[%s9732_s2 + $0x190] sm:$0xff] }
 0x377   : > { %v4874_v22 = vmax.f32 %v4866_v0, 0.0  ;;  %v4864_v20 = vadd.f32 %v4857_v34, %v4771_v19  ;;  %4913 = vmatprep.subr.mxu0 %v4868_v48  ;;  %6698 = vmatmul.mubr.msk.f32.vlgmr.msra.gmra.mrb[8].mxu1 %vm10097_vm5, %v6696_v31  ;;  %vm10104_vm5 = vmmov %vm10100_vm4  ;;  %v5854_v0 = vld [vmem:[%s9732_s2 + $0x98] sm:$0xff] }
 0x378   : > { %4877 = vrot.lane.b32.xlu0 %v4868_v48, %s7583_s16  ;;  %4914 = vmatpush1.msra.mxu0 %v4867_v51  ;;  %v4871_v11 = vmax.f32 %v4863_v5, 0.0 }
 0x379   : > { %v4872_v25 = vmax.f32 %v4864_v20, 0.0  ;;  %5126 = vmatprep.subr.mxu1 %v4874_v22  ;;  %4875 = vrot.lane.b32.xlu1 %v4867_v51, %s7583_s16  ;;  %v7055_v20 = vpack.c.bf16 %v5836_v52, %v5835_v3  ;;  %v5878_v52 = vld [vmem:[%s9732_s2 + $0x158] sm:$0xff] }
 0x37a   : > { %5127 = vmatpush1.msra.mxu1 %v4873_v60  ;;  %6697 = vmatmul.mubr.msk.f32.vlgmr.msra.gmra.mrb[8].mxu0 %vm10098_vm10, %v6696_v31  ;;  %vm10107_vm10 = vnez %v9863_v24 }
 0x37b   : > { %5055 = vmatprep.subr.mxu0 %v4872_v25  ;;  %5190 = vmatprep.mubr.f32.mxu1 %v9908_v26 }
 0x37c   : > { %4887 = vrot.lane.b32.xlu0 %v4873_v60, %s7583_s16  ;;  %5056 = vmatpush1.msra.mxu0 %v4871_v11 }
 0x37d   : > { %5486 = vrot.lane.b32.xlu1 %v4868_v48, %s7584_s17  ;;  %6700 = vmatmul.mubr.msk.f32.vlgmr.msra.gmra.mrb[10].mxu1 %vm10099_vm11, %v6696_v31  ;;  %vm10109_vm11 = vmmov %vm10103_vm1  ;;  %v5853_v48 = vld [vmem:[%s9732_s2 + $0x90] sm:$0xff] }
 0x37e   : > { %5119 = vmatprep.mubr.f32.mxu0 %v9908_v26  ;;  %5335 = vmatprep.mubr.f32.mxu1 %v9908_v26 }
 0x37f   : > { %6699 = vmatmul.mubr.msk.f32.vlgmr.msra.gmra.mrb[10].mxu0 %vm10100_vm4, %v6696_v31 }
 0x380   : > { %4883 = vrot.lane.b32.xlu0 %v4871_v11, %s7583_s16  ;;  %5264 = vmatprep.mubr.f32.mxu0 %v9908_v26 }
 0x381   : > { %4889 = vrot.lane.b32.xlu1 %v4874_v22, %s7583_s16 }
 0x384   : > { %5488 = vrot.lane.b32.xlu0 %v4869_v46, %s7584_s17 }
 0x385   : > { %4885 = vrot.lane.b32.xlu1 %v4872_v25, %s7583_s16 }
 0x388   : > { %5490 = vrot.lane.b32.xlu0 %v4870_v54, %s7584_s17  ;;  %v5868_v54 = vld [vmem:[%s9732_s2 + $0x108] sm:$0xff] }
 0x389   : > { %5484 = vrot.lane.b32.xlu1 %v4867_v51, %s7584_s17  ;;  %v7053_v51 = vpack.c.bf16 %v5852_v10, %v5851_v27  ;;  %v7087_v19 = vpack.c.bf16 %v5868_v54, %v5867_v6  ;;  %v5894_v27 = vld [vmem:[%s9732_s2 + $0x1d8] sm:$0xff]  ;;  %v5861_v10 = vld [vmem:[%s9732_s2 + $0xd0] sm:$0xff] }
 0x38c   : > { %5494 = vrot.lane.b32.xlu0 %v4872_v25, %s7584_s17  ;;  %v7089_v25 = vpack.c.bf16 %v5886_v58, %v5885_v23  ;;  %v5845_v23 = vld [vmem:[%s9732_s2 + $0x50] sm:$0xff]  ;;  %v5846_v58 = vld [vmem:[%s9732_s2 + $0x58] sm:$0xff] }
 0x38d   : > { %5492 = vrot.lane.b32.xlu1 %v4871_v11, %s7584_s17  ;;  %v5888_v11 = vld [vmem:[%s9732_s2 + $0x1a8] sm:$0xff] }
 0x390   : > { %5498 = vrot.lane.b32.xlu0 %v4874_v22, %s7584_s17 }
 0x391   : > { %5496 = vrot.lane.b32.xlu1 %v4873_v60, %s7584_s17  ;;  %v5837_v60 = vld [vmem:[%s9732_s2 + $0x10] sm:$0xff] }
 0x394   : > { %6249 = vperm.xlu0 %7553, %v6245_v45   ;;  %v5856_v45 = vld [vmem:[%s9732_s2 + $0xa8] sm:$0xff] }
 0x395   : > { %5816 = vperm.xlu1 %7554, %v5813_v21  }
 0x398   : > { %6346 = vperm.xlu0 %7553, %v6342_v29  }
 0x399   : > { %6254 = vperm.xlu1 %7554, %v6246_v61   ;;  %v5839_v61 = vld [vmem:[%s9732_s2 + $0x20] sm:$0xff] }
 0x39d   : > { %6351 = vperm.xlu1 %7554, %v6343_v33  }
 0x3e6   : > { %v4880_v59 = vpop.permute.xlu0 %4879 }
 0x3e7   : > { %v4882_v50 = vpop.permute.xlu1 %4881 }
 0x3e8   : > { %v4895_v57 = vsel %vm10101_vm14, %v4880_v59, %v4882_v50  ;;  %vm10111_vm14 = vmmov %vm10103_vm1 }
 0x3e9   : > { %6704 = vmatprep.subr.msk.mxu1 %vm8164_vm15, %v4895_v57  ;;  %vm10105_vm15 = vmmov %vm10103_vm1 }
 0x3ea   : > { %v4878_v14 = vpop.permute.xlu0 %4877 }
 0x3eb   : > { %v4896_v12 = vsel %vm10102_vm9, %v4878_v14, %v4880_v59  ;;  %v4876_v7 = vpop.permute.xlu1 %4875  ;;  %vm10113_vm9 = vnez %v9881_v43  ;;  %v6713_v43 = vld [vmem:[%s9737_s7 + $0x10] sm:$0xff]  ;;  %v5871_v59 = vld [vmem:[%s9732_s2 + $0x120] sm:$0xff] }
 0x3ec   : > { %v4897_v18 = vsel %vm10103_vm1, %v4876_v7, %v4878_v14  ;;  %6705 = vmatpush1.msk.msra.mxu1 %vm10024_vm8, %v4896_v12  ;;  %vm10106_vm8 = vmmov %vm10103_vm1  ;;  %v5840_v14 = vld [vmem:[%s9732_s2 + $0x28] sm:$0xff]  ;;  %v5889_v12 = vld [vmem:[%s9732_s2 + $0x1b0] sm:$0xff] }
 0x3ed   : > { %6701 = vmatprep.subr.msk.mxu0 %vm8194_vm12, %v4897_v18  ;;  %6706 = vmatmul.mubr.msk.f32.vlgmr.msra.gmra.mrb[8].mxu1 %vm10104_vm5, %v4907_v15  ;;  %vm10108_vm12 = vmmov %vm10100_vm4  ;;  %vm10115_vm5 = vnez %v9884_v35  ;;  %v5857_v18 = vld [vmem:[%s9732_s2 + $0xb0] sm:$0xff] }
 0x3ee   : > { %v4888_v39 = vpop.permute.xlu0 %4887  ;;  %5477 = vmatprep.mubr.f32.mxu1 %v9908_v26  ;;  %vm10110_vm4 = vmmov %vm10103_vm1  ;;  %vm10114_vm1 = vcmp.lt.s32.totalorder %v7875_v62, 127  ;;  %v5870_v62 = vld [vmem:[%s9732_s2 + $0x118] sm:$0xff] }
 0x3ef   : > { %v5487_v55 = vpop.permute.xlu1 %5486  ;;  %v7091_v29 = vpack.c.bf16 %v5870_v62, %v5869_v2  ;;  %v5896_v2 = vld [vmem:[%s9732_s2 + $0x1e8] sm:$0xff]  ;;  %v5879_v62 = vld [vmem:[%s9732_s2 + $0x160] sm:$0xff] }
 0x3f2   : > { %v4884_v40 = vpop.permute.xlu0 %4883 }
 0x3f3   : > { %v4890_v47 = vpop.permute.xlu1 %4889  ;;  %v4894_v34 = vsel %vm10111_vm14, %v4882_v50, %v4884_v40  ;;  %v5872_v50 = vld [vmem:[%s9732_s2 + $0x128] sm:$0xff] }
 0x3f4   : > { %v4891_v42 = vsel %vm10105_vm15, %v4888_v39, %v4890_v47  ;;  %v4898_v44 = vsel %vm10106_vm8, %v4890_v47, %v4876_v7  ;;  %vm10116_vm15 = vmmov %vm10108_vm12  ;;  %v5890_v7 = vld [vmem:[%s9732_s2 + $0x1b8] sm:$0xff] }
 0x3f5   : > { %6702 = vmatpush1.msk.msra.mxu0 %vm10028_vm3, %v4898_v44  ;;  %6710 = vmatprep.subr.msk.mxu1 %vm10107_vm10, %v4891_v42  ;;  %vm10112_vm3 = vnez %v9879_v13  ;;  %vm10117_vm8 = vmmov %vm10108_vm12  ;;  %v7097_v47 = vpack.c.bf16 %v5890_v7, %v5889_v12  ;;  %v5873_v42 = vld [vmem:[%s9732_s2 + $0x130] sm:$0xff]  ;;  %v5874_v44 = vld [vmem:[%s9732_s2 + $0x138] sm:$0xff] }
 0x3f6   : > { %v5489_v38 = vpop.permute.xlu0 %5488  ;;  %6703 = vmatmul.mubr.msk.f32.vlgmr.msra.gmra.mrb[8].mxu0 %vm10108_vm12, %v4907_v15  ;;  %vm10118_vm10 = vmmov %vm10114_vm1  ;;  %v5947_v7 = vld [vmem:[%s9732_s2 + $0x380] sm:$0xff] }
 0x3f7   : > { %v4886_v16 = vpop.permute.xlu1 %4885  ;;  %5406 = vmatprep.mubr.f32.mxu0 %v9908_v26  ;;  %v5505_v28 = vsel %vm10114_vm1, %v5487_v55, %v5489_v38  ;;  %vm10119_vm12 = vmmov %vm10117_vm8 }
 0x3f8   : > { %v4892_v37 = vsel %vm10109_vm11, %v4886_v16, %v4888_v39  ;;  %v4893_v36 = vsel %vm10110_vm4, %v4884_v40, %v4886_v16  ;;  %vm10123_vm11 = vmmov %vm10117_vm8  ;;  %v7095_v39 = vpack.c.bf16 %v5872_v50, %v5871_v59  ;;  %v5841_v40 = vld [vmem:[%s9732_s2 + $0x30] sm:$0xff]  ;;  %v5842_v16 = vld [vmem:[%s9732_s2 + $0x38] sm:$0xff] }
 0x3f9   : > { %6707 = vmatprep.subr.msk.mxu0 %vm10112_vm3, %v4893_v36  ;;  %6711 = vmatpush1.msk.msra.mxu1 %vm10113_vm9, %v4892_v37  ;;  %vm10127_vm3 = vnez %v9910_v49  ;;  %vm10128_vm9 = vnez %v9912_v17  ;;  %v5838_v49 = vld [vmem:[%s9732_s2 + $0x18] sm:$0xff]  ;;  %v5887_v17 = vld [vmem:[%s9732_s2 + $0x1a0] sm:$0xff]  ;;  %v5892_v36 = vld [vmem:[%s9732_s2 + $0x1c8] sm:$0xff] }
 0x3fa   : > { %6708 = vmatpush1.msk.msra.mxu0 %vm10115_vm5, %v4894_v34  ;;  %v5491_v24 = vpop.permute.xlu0 %5490  ;;  %6712 = vmatmul.mubr.msk.f32.vlgmr.msra.gmra.mrb[10].mxu1 %vm10116_vm15, %v4907_v15  ;;  %v7059_v21 = vpack.c.bf16 %v5838_v49, %v5837_v60  ;;  %v7093_v33 = vpack.c.bf16 %v5888_v11, %v5887_v17  ;;  %v5891_v37 = vld [vmem:[%s9732_s2 + $0x1c0] sm:$0xff]  ;;  %v5849_v11 = vld [vmem:[%s9732_s2 + $0x70] sm:$0xff]  ;;  %v5916_v59 = vld [vmem:[%s9732_s2 + $0x288] sm:$0xff] }
 0x3fb   : > { %v5485_v53 = vpop.permute.xlu1 %5484  ;;  %6709 = vmatmul.mubr.msk.f32.vlgmr.msra.gmra.mrb[10].mxu0 %vm10117_vm8, %v4907_v15  ;;  %6714 = vmatprep.subr.msk.mxu0 %vm10066_vm2, %v5505_v28  ;;  %vm10120_vm2 = vmmov %vm10114_vm1  ;;  %v5858_v15 = vld [vmem:[%s9732_s2 + $0xb8] sm:$0xff]  ;;  %v5859_v34 = vld [vmem:[%s9732_s2 + $0xc0] sm:$0xff] }
 0x3fc   : > { %v5506_v13 = vsel %vm10118_vm10, %v5485_v53, %v5487_v55  ;;  %5585 = vmatprep.mubr.f32.mxu0 %v9908_v26  ;;  %5656 = vmatprep.mubr.f32.mxu1 %v9908_v26  ;;  %v7063_v55 = vpack.c.bf16 %v5840_v14, %v5839_v61  ;;  %v5860_v28 = vld [vmem:[%s9732_s2 + $0xc8] sm:$0xff]  ;;  %v5895_v60 = vld [vmem:[%s9732_s2 + $0x1e0] sm:$0xff]  ;;  %v5881_v50 = vld [vmem:[%s9732_s2 + $0x170] sm:$0xff]  ;;  %vm10134_vm10 = vcmask 130048  }
 0x3fd   : > { %6715 = vmatpush1.msk.msra.mxu0 %vm8409_vm6, %v5506_v13  ;;  %vm10121_vm6 = vmmov %vm10114_vm1  ;;  %v5843_v13 = vld [vmem:[%s9732_s2 + $0x40] sm:$0xff]  ;;  %v7069_v41 = vpack.c.bf16 %v5860_v28, %v5859_v34  ;;  %v7109_v49 = vpack.c.bf16 %v5896_v2, %v5895_v60  ;;  %v5922_v60 = vld [vmem:[%s9732_s2 + $0x2b8] sm:$0xff] }
 0x3fe   : > { %v5495_v35 = vpop.permute.xlu0 %5494  ;;  %v5504_v46 = vsel %vm10121_vm6, %v5489_v38, %v5491_v24  ;;  %v7065_v38 = vpack.c.bf16 %v5858_v15, %v5857_v18  ;;  %v7071_v6 = vpack.c.bf16 %v5844_v9, %v5843_v13  ;;  %v5915_v61 = vld [vmem:[%s9732_s2 + $0x280] sm:$0xff]  ;;  %v5948_v18 = vld [vmem:[%s9732_s2 + $0x388] sm:$0xff] }
 0x3ff   : > { %v5493_v63 = vpop.permute.xlu1 %5492  ;;  %6716 = vmatmul.mubr.msk.f32.vlgmr.msra.gmra.mrb[8].mxu0 %vm10119_vm12, %v6713_v43  ;;  %v7117_v14 = vpack.c.bf16 %v5916_v59, %v5915_v61  ;;  %v7149_v15 = vpack.c.bf16 %v5948_v18, %v5947_v7  ;;  %v5932_v9 = vld [vmem:[%s9732_s2 + $0x308] sm:$0xff]  ;;  %v5907_v7 = vld [vmem:[%s9732_s2 + $0x240] sm:$0xff]  ;;  %vm10135_vm12 = vmmov %vm10134_vm10 }
 0x400   : > { %v5503_v8 = vsel %vm10120_vm2, %v5491_v24, %v5493_v63  ;;  %5727 = vmatprep.mubr.f32.mxu0 %v9908_v26  ;;  %v7099_v24 = vpack.c.bf16 %v5874_v44, %v5873_v42  ;;  %v5899_v42 = vld [vmem:[%s9732_s2 + $0x200] sm:$0xff]  ;;  %v5900_v44 = vld [vmem:[%s9732_s2 + $0x208] sm:$0xff]  ;;  %vm6436_vm2 = vcmask 58368  }
 0x401   : > { %6717 = vmatprep.subr.msk.mxu1 %vm10061_vm13, %v5503_v8  ;;  %vm10122_vm13 = vmmov %vm10114_vm1  ;;  %v5893_v8 = vld [vmem:[%s9732_s2 + $0x1d0] sm:$0xff]  ;;  %v7119_v28 = vpack.c.bf16 %v5900_v44, %v5899_v42  ;;  %v5952_v2 = vld [vmem:[%s9732_s2 + $0x3a8] sm:$0xff] }
 0x402   : > { %6718 = vmatpush1.msk.msra.mxu1 %vm8395_vm0, %v5504_v46  ;;  %v5499_v30 = vpop.permute.xlu0 %5498  ;;  %vm10124_vm0 = vmmov %vm10114_vm1  ;;  %v5862_v46 = vld [vmem:[%s9732_s2 + $0xd8] sm:$0xff]  ;;  %v7105_v54 = vpack.c.bf16 %v5894_v27, %v5893_v8  ;;  %v5919_v8 = vld [vmem:[%s9732_s2 + $0x2a0] sm:$0xff] }
 0x403   : > { %v5507_v31 = vsel %vm10122_vm13, %v5499_v30, %v5485_v53  ;;  %6719 = vmatmul.mubr.msk.f32.vlgmr.msra.gmra.mrb[8].mxu1 %vm10123_vm11, %v6713_v43  ;;  %v5497_v1 = vpop.permute.xlu1 %5496  ;;  %vm10125_vm4 = vmmov %vm10124_vm0  ;;  %v7067_v53 = vpack.c.bf16 %v5842_v16, %v5841_v40  ;;  %v5917_v16 = vld [vmem:[%s9732_s2 + $0x290] sm:$0xff]  ;;  %v5936_v61 = vld [vmem:[%s9732_s2 + $0x328] sm:$0xff] }
 0x404   : > { %v5500_v56 = vsel %vm10124_vm0, %v5497_v1, %v5499_v30  ;;  %v5501_v5 = vsel %vm10125_vm4, %v5495_v35, %v5497_v1  ;;  %6723 = vmatprep.subr.msk.mxu1 %vm8413_vm7, %v5507_v31  ;;  %5798 = vmatprep.mubr.f32.mxu1 %v9908_v26  ;;  %vm10126_vm14 = vmmov %vm10124_vm0  ;;  %vm10129_vm7 = vnez %v9926_v32  ;;  %v7057_v26 = vpack.c.bf16 %v5854_v0, %v5853_v48  ;;  %v5855_v32 = vld [vmem:[%s9732_s2 + $0xa0] sm:$0xff]  ;;  %v5877_v30 = vld [vmem:[%s9732_s2 + $0x150] sm:$0xff] }
 0x405   : > { %v5502_v22 = vsel %vm10126_vm14, %v5493_v63, %v5495_v35  ;;  %6720 = vmatprep.subr.msk.mxu0 %vm10127_vm3, %v5501_v5  ;;  %6724 = vmatpush1.msk.msra.mxu1 %vm10128_vm9, %v5500_v56  ;;  %vm10130_vm1 = vmmov %vm10117_vm8  ;;  %v7061_v57 = vpack.c.bf16 %v5856_v45, %v5855_v32  ;;  %v5875_v35 = vld [vmem:[%s9732_s2 + $0x140] sm:$0xff]  ;;  %v5876_v63 = vld [vmem:[%s9732_s2 + $0x148] sm:$0xff]  ;;  %v7075_v48 = vpack.c.bf16 %v5846_v58, %v5845_v23 }
 0x406   : > { %6721 = vmatpush1.msk.msra.mxu0 %vm10129_vm7, %v5502_v22  ;;  %7086 = vmatprep.subr.bf16.mxu1 %v7085_v4  ;;  %vm10131_vm5 = vmmov %vm10130_vm1  ;;  %v7103_v3 = vpack.c.bf16 %v5876_v63, %v5875_v35  ;;  %v7073_v4 = vpack.c.bf16 %v5862_v46, %v5861_v10  ;;  %v5863_v31 = vld [vmem:[%s9732_s2 + $0xe0] sm:$0xff]  ;;  %v5864_v1 = vld [vmem:[%s9732_s2 + $0xe8] sm:$0xff] }
 0x407   : > { %6722 = vmatmul.mubr.msk.f32.vlgmr.msra.gmra.mrb[10].mxu0 %vm10130_vm1, %v6713_v43  ;;  %6725 = vmatmul.mubr.msk.f32.vlgmr.msra.gmra.mrb[10].mxu1 %vm10131_vm5, %v6713_v43  ;;  %v7101_v43 = vpack.c.bf16 %v5892_v36, %v5891_v37  ;;  %v7077_v0 = vpack.c.bf16 %v5864_v1, %v5863_v31  ;;  %v5847_v56 = vld [vmem:[%s9732_s2 + $0x60] sm:$0xff]  ;;  %v5848_v5 = vld [vmem:[%s9732_s2 + $0x68] sm:$0xff]  ;;  %v5865_v22 = vld [vmem:[%s9732_s2 + $0xf0] sm:$0xff] }
 0x408   : > { %7054 = vmatprep.subr.bf16.mxu0 %v7053_v51  ;;  %7088 = vmatpush3.bf16.msra.mxu1 %v7087_v19  ;;  %v7107_v51 = vpack.c.bf16 %v5878_v52, %v5877_v30  ;;  %v7079_v19 = vpack.c.bf16 %v5848_v5, %v5847_v56  ;;  %v5850_v32 = vld [vmem:[%s9732_s2 + $0x78] sm:$0xff]  ;;  %v5920_v10 = vld [vmem:[%s9732_s2 + $0x2a8] sm:$0xff]  ;;  %v5949_v46 = vld [vmem:[%s9732_s2 + $0x390] sm:$0xff] }
 0x409   : > { %7056 = vmatpush3.bf16.msra.mxu0 %v7055_v20  ;;  %7090 = vmatprep.subr.bf16.mxu1 %v7089_v25  ;;  %v5866_v20 = vld [vmem:[%s9732_s2 + $0xf8] sm:$0xff]  ;;  %v7083_v45 = vpack.c.bf16 %v5850_v32, %v5849_v11  ;;  %v5903_v23 = vld [vmem:[%s9732_s2 + $0x220] sm:$0xff]  ;;  %v5904_v58 = vld [vmem:[%s9732_s2 + $0x228] sm:$0xff] }
 0x40a   : > { %7058 = vmatprep.subr.bf16.mxu0 %v7057_v26  ;;  %v7081_v25 = vpack.c.bf16 %v5866_v20, %v5865_v22  ;;  %v5880_v26 = vld [vmem:[%s9732_s2 + $0x168] sm:$0xff]  ;;  %v5918_v37 = vld [vmem:[%s9732_s2 + $0x298] sm:$0xff]  ;;  %v5933_v56 = vld [vmem:[%s9732_s2 + $0x310] sm:$0xff] }
 0x40b   : > { %v7111_v17 = vpack.c.bf16 %v5880_v26, %v5879_v62  ;;  %v7121_v63 = vpack.c.bf16 %v5918_v37, %v5917_v16  ;;  %v5934_v5 = vld [vmem:[%s9732_s2 + $0x318] sm:$0xff]  ;;  %v5905_v11 = vld [vmem:[%s9732_s2 + $0x230] sm:$0xff]  ;;  %v5924_v59 = vld [vmem:[%s9732_s2 + $0x2c8] sm:$0xff] }
 0x40c   : > { %7092 = vmatpush3.bf16.msra.mxu1 %v7091_v29  ;;  %v5897_v29 = vld [vmem:[%s9732_s2 + $0x1f0] sm:$0xff]  ;;  %v5906_v32 = vld [vmem:[%s9732_s2 + $0x238] sm:$0xff]  ;;  %v5908_v18 = vld [vmem:[%s9732_s2 + $0x248] sm:$0xff] }
 0x40d   : > { %7060 = vmatpush3.bf16.msra.mxu0 %v7059_v21  ;;  %7094 = vmatprep.subr.bf16.mxu1 %v7093_v33  ;;  %v5898_v21 = vld [vmem:[%s9732_s2 + $0x1f8] sm:$0xff]  ;;  %v5925_v42 = vld [vmem:[%s9732_s2 + $0x2d0] sm:$0xff]  ;;  %v5956_v16 = vld [vmem:[%s9732_s2 + $0x3c8] sm:$0xff]  ;;  %v7135_v37 = vpack.c.bf16 %v5908_v18, %v5907_v7 }
 0x40e   : > { %7062 = vmatprep.subr.bf16.mxu0 %v7061_v57  ;;  %v7113_v33 = vpack.c.bf16 %v5898_v21, %v5897_v29  ;;  %v5882_v57 = vld [vmem:[%s9732_s2 + $0x178] sm:$0xff]  ;;  %v5935_v21 = vld [vmem:[%s9732_s2 + $0x320] sm:$0xff]  ;;  %vm10132_vm15 = vmmov %vm10130_vm1 }
 0x40f   : > { %v7115_v12 = vpack.c.bf16 %v5882_v57, %v5881_v50  ;;  %v5953_v50 = vld [vmem:[%s9732_s2 + $0x3b0] sm:$0xff]  ;;  %v5954_v57 = vld [vmem:[%s9732_s2 + $0x3b8] sm:$0xff]  ;;  %vm10133_vm8 = vmmov %vm10130_vm1 }
 0x410   : > { %7096 = vmatpush3.bf16.msra.mxu1 %v7095_v39  ;;  %v5926_v44 = vld [vmem:[%s9732_s2 + $0x2d8] sm:$0xff]  ;;  %vm10136_vm6 = vmmov %vm10130_vm1 }
 0x411   : > { %7064 = vmatpush3.bf16.msra.mxu0 %v7063_v55  ;;  %7098 = vmatprep.subr.bf16.mxu1 %v7097_v47 }
 0x412   : > { %7066 = vmatprep.subr.bf16.mxu0 %v7065_v38 }
 0x414   : > { %7100 = vmatpush3.bf16.msra.mxu1 %v7099_v24  ;;  %v9500_v39 = vpop.permute.xlu1 %5816  ;;  %v5901_v24 = vld [vmem:[%s9732_s2 + $0x210] sm:$0xff] }
 0x415   : > { %7068 = vmatpush3.bf16.msra.mxu0 %v7067_v53  ;;  %7102 = vmatprep.subr.bf16.mxu1 %v7101_v43  ;;  %v5902_v53 = vld [vmem:[%s9732_s2 + $0x218] sm:$0xff] }
 0x416   : > { %7070 = vmatprep.subr.bf16.mxu0 %v7069_v41  ;;  %v5931_v41 = vld [vmem:[%s9732_s2 + $0x300] sm:$0xff]  ;;  %v7123_v52 = vpack.c.bf16 %v5902_v53, %v5901_v24  ;;  %v7137_v24 = vpack.c.bf16 %v5926_v44, %v5925_v42  ;;  %v6244_v42 = vld [vmem:[%s9739_s9 + $0x8] sm:$0xff] }
 0x417   : > { %v6340_v44 = vld [vmem:[%s9741_s11] sm:$0xff] }
 0x418   : > { %7104 = vmatpush3.bf16.msra.mxu1 %v7103_v3  ;;  %v5950_v3 = vld [vmem:[%s9732_s2 + $0x398] sm:$0xff] }
 0x419   : > { %7072 = vmatpush3.bf16.msra.mxu0 %v7071_v6  ;;  %7106 = vmatprep.subr.bf16.mxu1 %v7105_v54 }
 0x41a   : > { %7074 = vmatprep.subr.bf16.mxu0 %v7073_v4  ;;  %v7151_v4 = vpack.c.bf16 %v5932_v9, %v5931_v41  ;;  %v5957_v41 = vld [vmem:[%s9732_s2 + $0x3d0] sm:$0xff]  ;;  %v5958_v9 = vld [vmem:[%s9732_s2 + $0x3d8] sm:$0xff] }
 0x41c   : > { %7108 = vmatpush3.bf16.msra.mxu1 %v7107_v51 }
 0x41d   : > { %7076 = vmatpush3.bf16.msra.mxu0 %v7075_v48  ;;  %7110 = vmatprep.subr.bf16.mxu1 %v7109_v49  ;;  %v7125_v48 = vpack.c.bf16 %v5920_v10, %v5919_v8  ;;  %v7127_v49 = vpack.c.bf16 %v5904_v58, %v5903_v23  ;;  %v5911_v10 = vld [vmem:[%s9732_s2 + $0x260] sm:$0xff]  ;;  %v5929_v23 = vld [vmem:[%s9732_s2 + $0x2f0] sm:$0xff]  ;;  %v5930_v58 = vld [vmem:[%s9732_s2 + $0x2f8] sm:$0xff] }
 0x41e   : > { %7078 = vmatprep.subr.bf16.mxu0 %v7077_v0  ;;  %v7153_v0 = vpack.c.bf16 %v5950_v3, %v5949_v46  ;;  %v5912_v46 = vld [vmem:[%s9732_s2 + $0x268] sm:$0xff] }
 0x420   : > { %7112 = vmatpush3.bf16.msra.mxu1 %v7111_v17  ;;  %v7155_v17 = vpack.c.bf16 %v5934_v5, %v5933_v56  ;;  %v7145_v56 = vpack.c.bf16 %v5930_v58, %v5929_v23 }
 0x421   : > { %7080 = vmatpush3.bf16.msra.mxu0 %v7079_v19  ;;  %7114 = vmatprep.subr.bf16.mxu1 %v7113_v33  ;;  %v5921_v19 = vld [vmem:[%s9732_s2 + $0x2b0] sm:$0xff]  ;;  %v5923_v33 = vld [vmem:[%s9732_s2 + $0x2c0] sm:$0xff] }
 0x422   : > { %7082 = vmatprep.subr.bf16.mxu0 %v7081_v25  ;;  %v5951_v25 = vld [vmem:[%s9732_s2 + $0x3a0] sm:$0xff] }
 0x423   : > { %v7157_v29 = vpack.c.bf16 %v5952_v2, %v5951_v25  ;;  %v5962_v25 = vld [vmem:[%s9732_s2 + $0x3f8] sm:$0xff] }
 0x424   : > { %7116 = vmatpush3.bf16.msra.mxu1 %v7115_v12  ;;  %v7159_v12 = vpack.c.bf16 %v5936_v61, %v5935_v21  ;;  %v6243_v21 = vld [vmem:[%s9739_s9] sm:$0xff] }
 0x425   : > { %7084 = vmatpush3.bf16.msra.mxu0 %v7083_v45  ;;  %7150 = vmatprep.subr.bf16.mxu1 %v7149_v15  ;;  %v7129_v45 = vpack.c.bf16 %v5922_v60, %v5921_v19  ;;  %v7133_v15 = vpack.c.bf16 %v5924_v59, %v5923_v33  ;;  %v5914_v19 = vld [vmem:[%s9732_s2 + $0x278] sm:$0xff]  ;;  %v5961_v60 = vld [vmem:[%s9732_s2 + $0x3f0] sm:$0xff] }
 0x426   : > { %7118 = vmatprep.subr.bf16.mxu0 %v7117_v14  ;;  %v7131_v14 = vpack.c.bf16 %v5906_v32, %v5905_v11  ;;  %v5946_v11 = vld [vmem:[%s9732_s2 + $0x378] sm:$0xff] }
 0x4d2   : > { %v5587_v55 = vpop.f32.mrb[8].mxu0 }
 0x4d3   : > { %v5819_v40 = vadd.f32 %v9500_v39, %v5587_v55  ;;  %v5589_v47 = vpop.f32.mrb[9].mxu0  ;;  %v7161_v55 = vpack.c.bf16 %v5954_v57, %v5953_v50 }
 0x4d4   : > { %v5820_v38 = vadd.f32 %v9500_v39, %v5589_v47  ;;  %v5938_v47 = vld [vmem:[%s9732_s2 + $0x338] sm:$0xff] }
 0x4d5   : > { %v5827_v13 = vmax.f32 %v5819_v40, 0.0  ;;  %v5937_v40 = vld [vmem:[%s9732_s2 + $0x330] sm:$0xff] }
 0x4d6   : > { %v5828_v36 = vmax.f32 %v5820_v38, 0.0  ;;  %v5658_v34 = vpop.f32.mrb[8].mxu1  ;;  %v5955_v38 = vld [vmem:[%s9732_s2 + $0x3c0] sm:$0xff] }
 0x4d7   : > { %v5821_v43 = vadd.f32 %v9500_v39, %v5658_v34  ;;  %v5660_v35 = vpop.f32.mrb[9].mxu1  ;;  %v5909_v34 = vld [vmem:[%s9732_s2 + $0x250] sm:$0xff]  ;;  %v7165_v53 = vpack.c.bf16 %v5956_v16, %v5955_v38  ;;  %v6255_v38 = vpop.permute.xlu1 %6254 }
 0x4d8   : > { %v5822_v27 = vadd.f32 %v9500_v39, %v5660_v35  ;;  %6027 = vmatprep.mubr.f32.mxu0 %v5828_v36  ;;  %v7163_v36 = vpack.c.bf16 %v5938_v47, %v5937_v40  ;;  %v5927_v35 = vld [vmem:[%s9732_s2 + $0x2e0] sm:$0xff] }
 0x4d9   : > { %6028 = vmatmul.mubr.f32.vlgmr.msra.gmra.mrb[12].mxu0 %v5827_v13  ;;  %v5829_v31 = vmax.f32 %v5821_v43, 0.0  ;;  %v5939_v13 = vld [vmem:[%s9732_s2 + $0x340] sm:$0xff]  ;;  %v5940_v43 = vld [vmem:[%s9732_s2 + $0x348] sm:$0xff] }
 0x4da   : > { %v5830_v6 = vmax.f32 %v5822_v27, 0.0  ;;  %7120 = vmatpush3.bf16.msra.mxu0 %v7119_v28  ;;  %v9542_v54 = vpop.f32.mrb[10].mxu0  ;;  %v9544_v30 = vpop.f32.mrb[10].mxu1  ;;  %v5910_v28 = vld [vmem:[%s9732_s2 + $0x258] sm:$0xff]  ;;  %v7167_v27 = vpack.c.bf16 %v5940_v43, %v5939_v13  ;;  %v6341_v43 = vld [vmem:[%s9741_s11 + $0x8] sm:$0x3] }
 0x4db   : > { %v5731_v1 = vpop.f32.mrb[11].mxu0  ;;  %v5802_v51 = vpop.f32.mrb[11].mxu1  ;;  %7122 = vmatprep.subr.bf16.mxu0 %v7121_v63  ;;  %v5928_v63 = vld [vmem:[%s9732_s2 + $0x2e8] sm:$0xff]  ;;  %v7139_v8 = vpack.c.bf16 %v5910_v28, %v5909_v34 }
 0x4dc   : > { %v5824_v22 = vadd.f32 %v9500_v39, %v5731_v1  ;;  %v5826_v20 = vadd.f32 %v9500_v39, %v5802_v51  ;;  %6097 = vmatprep.mubr.f32.mxu1 %v5830_v6  ;;  %v7141_v3 = vpack.c.bf16 %v5928_v63, %v5927_v35  ;;  %v7169_v6 = vpack.c.bf16 %v5958_v9, %v5957_v41  ;;  %v5960_v1 = vld [vmem:[%s9732_s2 + $0x3e8] sm:$0xff]  ;;  %v6352_v35 = vpop.permute.xlu1 %6351 }
 0x4dd   : > { %6098 = vmatmul.mubr.f32.vlgmr.msra.gmra.mrb[12].mxu1 %v5829_v31  ;;  %v5959_v31 = vld [vmem:[%s9732_s2 + $0x3e0] sm:$0xff]  ;;  %v7143_v51 = vpack.c.bf16 %v5912_v46, %v5911_v10 }
 0x4de   : > { %v5832_v62 = vmax.f32 %v5824_v22, 0.0  ;;  %v5834_v26 = vmax.f32 %v5826_v20, 0.0  ;;  %7124 = vmatpush3.bf16.msra.mxu0 %v7123_v52  ;;  %7152 = vmatpush3.bf16.msra.mxu1 %v7151_v4  ;;  %v5941_v52 = vld [vmem:[%s9732_s2 + $0x350] sm:$0xff]  ;;  %v5942_v4 = vld [vmem:[%s9732_s2 + $0x358] sm:$0xff]  ;;  %v7173_v5 = vpack.c.bf16 %v5960_v1, %v5959_v31  ;;  %v5943_v22 = vld [vmem:[%s9732_s2 + $0x360] sm:$0xff] }
 0x4df   : > { %7126 = vmatprep.subr.bf16.mxu0 %v7125_v48  ;;  %7154 = vmatprep.subr.bf16.mxu1 %v7153_v0  ;;  %v7171_v48 = vpack.c.bf16 %v5942_v4, %v5941_v52  ;;  %v5913_v0 = vld [vmem:[%s9732_s2 + $0x270] sm:$0xff]  ;;  %v5944_v20 = vld [vmem:[%s9732_s2 + $0x368] sm:$0xff] }
 0x4e0   : > { %6167 = vmatprep.mubr.f32.mxu0 %v5832_v62  ;;  %6237 = vmatprep.mubr.f32.mxu1 %v5834_v26  ;;  %v7147_v2 = vpack.c.bf16 %v5914_v19, %v5913_v0  ;;  %v7175_v62 = vpack.c.bf16 %v5944_v20, %v5943_v22  ;;  %v5823_v26 = vadd.f32 %v9500_v39, %v9542_v54 }
 0x4e2   : > { %7128 = vmatpush3.bf16.msra.mxu0 %v7127_v49  ;;  %7156 = vmatpush3.bf16.msra.mxu1 %v7155_v17  ;;  %v7177_v49 = vpack.c.bf16 %v5962_v25, %v5961_v60  ;;  %v5945_v17 = vld [vmem:[%s9732_s2 + $0x370] sm:$0xff] }
 0x4e3   : > { %7130 = vmatprep.subr.bf16.mxu0 %v7129_v45  ;;  %7158 = vmatprep.subr.bf16.mxu1 %v7157_v29  ;;  %v7179_v32 = vpack.c.bf16 %v5946_v11, %v5945_v17  ;;  %v5831_v45 = vmax.f32 %v5823_v26, 0.0  ;;  %v5825_v29 = vadd.f32 %v9500_v39, %v9544_v30 }
 0x4e5   : > { %v5833_v54 = vmax.f32 %v5825_v29, 0.0 }
 0x4e6   : > { %7132 = vmatpush3.bf16.msra.mxu0 %v7131_v14  ;;  %7160 = vmatpush3.bf16.msra.mxu1 %v7159_v12 }
 0x4e7   : > { %7134 = vmatprep.subr.bf16.mxu0 %v7133_v15  ;;  %7162 = vmatprep.subr.bf16.mxu1 %v7161_v55 }
 0x4ea   : > { %7136 = vmatpush3.bf16.msra.mxu0 %v7135_v37  ;;  %7164 = vmatpush3.bf16.msra.mxu1 %v7163_v36  ;;  %v6250_v37 = vpop.permute.xlu0 %6249 }
 0x4eb   : > { %7138 = vmatprep.subr.bf16.mxu0 %v7137_v24  ;;  %7166 = vmatprep.subr.bf16.mxu1 %v7165_v53 }
 0x4ee   : > { %7140 = vmatpush3.bf16.msra.mxu0 %v7139_v8  ;;  %7168 = vmatpush3.bf16.msra.mxu1 %v7167_v27  ;;  %v6347_v41 = vpop.permute.xlu0 %6346 }
 0x4ef   : > { %7142 = vmatprep.subr.bf16.mxu0 %v7141_v3  ;;  %7170 = vmatprep.subr.bf16.mxu1 %v7169_v6 }
 0x4f2   : > { %7144 = vmatpush3.bf16.msra.mxu0 %v7143_v51  ;;  %7172 = vmatpush3.bf16.msra.mxu1 %v7171_v48 }
 0x4f3   : > { %7146 = vmatprep.subr.bf16.mxu0 %v7145_v56  ;;  %7174 = vmatprep.subr.bf16.mxu1 %v7173_v5 }
 0x4f6   : > { %7148 = vmatpush3.bf16.msra.mxu0 %v7147_v2  ;;  %7176 = vmatpush3.bf16.msra.mxu1 %v7175_v62 }
 0x4f7   : > { %7178 = vmatprep.subr.bf16.mxu1 %v7177_v49 }
 0x4f9   : > { %6168 = vmatmul.mubr.f32.vlgmr.msra.gmra.mrb[14].mxu0 %v5831_v45 }
 0x4fa   : > { %7180 = vmatpush3.bf16.msra.mxu1 %v7179_v32  ;;  %6883 = vmatprep.mubr.msk.f32.mxu0 %vm10132_vm15, %v6243_v21 }
 0x4fd   : > { %6238 = vmatmul.mubr.f32.vlgmr.msra.gmra.mrb[14].mxu1 %v5833_v54 }
 0x4fe   : > { %6890 = vmatprep.mubr.msk.f32.mxu1 %vm10134_vm10, %v6340_v44 }
 0x5ac   : > { %v6766_v61 = vpop.f32.mrb[12].mxu0 }
 0x5ad   : > { %v6767_v33 = vpop.f32.mrb[13].mxu0 }
 0x5ae   : > { %v6768_v59 = vadd.f32 %v6767_v33, %v6766_v61 }
 0x5b0   : > { %v6801_v50 = vpop.f32.mrb[12].mxu1 }
 0x5b1   : > { %v6802_v57 = vpop.f32.mrb[13].mxu1 }
 0x5b2   : > { %v6803_v14 = vadd.f32 %v6802_v57, %v6801_v50 }
 0x5b4   : > { %v6100_v12 = vadd.f32 %v6803_v14, %v6768_v59 }
 0x5cc   : > { %v6836_v7 = vpop.f32.mrb[14].mxu0 }
 0x5cd   : > { %v6837_v39 = vpop.f32.mrb[15].mxu0 }
 0x5ce   : > { %v6838_v30 = vadd.f32 %v6837_v39, %v6836_v7 }
 0x5d0   : > { %v6170_v18 = vadd.f32 %v6838_v30, %v6100_v12  ;;  %v6871_v15 = vpop.f32.mrb[14].mxu1 }
 0x5d1   : > { %v6872_v55 = vpop.f32.mrb[15].mxu1 }
 0x5d2   : > { %v6873_v40 = vadd.f32 %v6872_v55, %v6871_v15 }
 0x5d4   : > { %v6240_v47 = vadd.f32 %v6873_v40, %v6170_v18 }
 0x5d6   : > { %6881 = vmatprep.subr.mxu0 %v6240_v47 }
 0x5d7   : > { %6882 = vmatpush3.msra.mxu0 %v6240_v47 }
 0x5d8   : > { %6884 = vmatmul.mubr.msk.f32.vlgmr.msra.gmra.mrb[16].mxu0 %vm10133_vm8, %v6244_v42 }
 0x6ab   : > { %v6885_v16 = vpop.f32.mrb[16].mxu0 }
 0x6ac   : > { %v6335_v36 = vadd.f32 %v6885_v16, %v6255_v38  ;;  %v6329_v34 = vpop.f32.mrb[17].mxu0 }
 0x6ad   : > { %v6330_v28 = vadd.f32 %v6329_v34, %v6250_v37 }
 0x6ae   : > { %v6339_v24 = vmax.f32 %v6335_v36, 0.0 }
 0x6af   : > { %v6338_v53 = vmax.f32 %v6330_v28, 0.0 }
 0x6b1   : > { %v7181_v13 = vpack.c.bf16 %v6339_v24, %v6338_v53 }
 0x6b3   : > { %7182 = vmatprep.subr.bf16.mxu1 %v7181_v13 }
 0x6b4   : > { %7184 = vmatpush3.bf16.msra.mxu1 %v7181_v13 }
 0x6b7   : > { %6891 = vmatmul.mubr.msk.f32.vlgmr.msra.gmra.mrb[16].mxu1 %vm10135_vm12, %v6341_v43 }
 0x78a   : > { %v6892_v63 = vpop.f32.mrb[16].mxu1 }
 0x78b   : > { %v6432_v9 = vadd.f32 %v6892_v63, %v6352_v35  ;;  %v6426_v8 = vpop.f32.mrb[17].mxu1 }
 0x78c   : > { %v6427_v27 = vadd.f32 %v6426_v8, %v6347_v41 }
 0x78d   : > { %6437 = vst.msk [vmem:[%s491_s20 + $0x8] sm:$0x3] %vm6436_vm2, %v6432_v9 }
 0x78e   : > { %6435 = vst.msk [vmem:[%s491_s20] sm:$0xff] %vm10136_vm6, %v6427_v27 }
 0x78f PF: > { %p20_p9 = scmp.ge.s32.totalorder %s7674_s29, 4   ;;  %s10137_s25 = smov %s7573_s26 }
 0x790   : > { %s10138_s26 = smov %s7683_s15  ;;  %s10139_s27 = smov %s7674_s29 }
 0x791   :  { %22 = sbr.rel (!%p20_p9) target bundleno = 2 (0x2), region = 142 }

</bundles_post_ra>
